<compile_context>
chip_gen: v7x
topology: tpu7x:2x2x1
jax: 0.10.0
libtpu: 0.0.40
codegen_flags: <defaults>
</compile_context>

<pallas_src>
import math
import numpy as np
import jax
import jax.numpy as jnp
from jax.experimental import pallas as pl
from jax.experimental.pallas import tpu as pltpu

# ---------------- scaled-down but shape-consistent configuration ----------------
B = 2
IMG = 32                    # real model: 192
CIN = 3
PATCH = 8                   # total backbone downsample stand-in (real swinv2: 32x)
GH = GW = IMG // PATCH
HW = GH * GW                # spatial tokens fed to MLDecoder
PDIM = CIN * PATCH * PATCH  # patchified token dim (192)
CFEAT = 64                  # backbone channels (real: initial_num_features=1024)
D = 128                     # decoder embedding (real: 768)
NH = 8                      # MLDecoder cross-attention heads
HD = D // NH                # 16
FF = 256                    # decoder FFN (real: 2048)
NUM_CLASSES = 60
L = min(100, NUM_CLASSES)                 # embed_len_decoder = 60
DUP = int(NUM_CLASSES / L + 0.999)        # duplicate_factor = 1
assert DUP == 1
EPS = 1e-5
OUT_PAD = 128               # lane-dense logits block width

# bias-slab row indices: one (16, 256) f32 slab holds every bias / LN vector
R_B_PATCH, R_BN_G, R_BN_B = 0, 1, 2
R_B_EMB, R_B_KV, R_B_O = 3, 4, 5
R_LN2_G, R_LN2_B = 6, 7
R_B1, R_B2 = 8, 9
R_LN3_G, R_LN3_B = 10, 11
R_POOL_B = 12
N_BIAS_ROWS = 16
BIAS_W = 256


def _layer_norm(x, g, b):
    mu = jnp.mean(x, axis=-1, keepdims=True)
    var = jnp.mean((x - mu) ** 2, axis=-1, keepdims=True)
    return (x - mu) * jax.lax.rsqrt(var + EPS) * g + b


# --------------------------------- Pallas kernel ---------------------------------
def _mldecoder_kernel(patches_ref, w_patch_ref, w_emb_ref, wkvw1_ref, wow2_ref,
                      q_hm_ref, const_ref, bias_ref, out_ref):
    def bia(row, width):
        return bias_ref[row:row + 1, :width]          # (1, width) broadcastable row

    # ---- backbone stand-in: patch-embed + LayerNorm -> (HW, CFEAT) ----
    pt = patches_ref[0]                                                     # (HW, PDIM)
    feat = jnp.dot(pt, w_patch_ref[...],
                   preferred_element_type=jnp.float32) + bia(R_B_PATCH, CFEAT)
    feat = _layer_norm(feat, bia(R_BN_G, CFEAT), bia(R_BN_B, CFEAT))        # (HW, CFEAT)

    # ---- MLDecoder: embed_standart + ReLU ----
    emb = jnp.dot(feat, w_emb_ref[...],
                  preferred_element_type=jnp.float32) + bia(R_B_EMB, D)
    emb = jnp.maximum(emb, 0.0)                                             # (HW, D)

    # ---- fused K|V projection: ONE (HW,D)x(D,2D) matmul ----
    kv = jnp.dot(emb, wkvw1_ref[:D, :],
                 preferred_element_type=jnp.float32) + bia(R_B_KV, 2 * D)   # (HW, 2D)
    k = kv[:, :D]
    v = kv[:, D:]
    # one relayout to head-major (NH, HW, HD) feeding batched einsums
    kh = jnp.stack([k[:, h * HD:(h + 1) * HD] for h in range(NH)], axis=0)
    vh = jnp.stack([v[:, h * HD:(h + 1) * HD] for h in range(NH)], axis=0)

    # ---- multi-head cross attention (queries precomputed head-major, scale folded) ----
    q_hm = q_hm_ref[...]                                                    # (NH, L, HD)
    s = jnp.einsum('hld,hsd->hls', q_hm, kh,
                   preferred_element_type=jnp.float32)                      # (NH, L, HW)
    s = s - jnp.max(s, axis=-1, keepdims=True)
    p = jnp.exp(s)
    p = p * pl.reciprocal(jnp.sum(p, axis=-1, keepdims=True), approx=True)
    o = jnp.einsum('hls,hsd->hld', p, vh,
                   preferred_element_type=jnp.float32)                      # (NH, L, HD)
    o = jnp.concatenate([o[h] for h in range(NH)], axis=-1)                 # (L, D)

    # ONE full-width output projection
    attn = jnp.dot(o, wow2_ref[:D, :],
                   preferred_element_type=jnp.float32) + bia(R_B_O, D)      # (L, D)

    tgt0 = const_ref[0]                      # precomputed LN1(2*q_embed)   # (L, D)
    tgt = _layer_norm(tgt0 + attn, bia(R_LN2_G, D), bia(R_LN2_B, D))

    # ---- FFN ----
    ff = jnp.dot(tgt, wkvw1_ref[D:, :],
                 preferred_element_type=jnp.float32) + bia(R_B1, FF)
    ff = jnp.maximum(ff, 0.0)
    ff = jnp.dot(ff, wow2_ref[D:, :],
                 preferred_element_type=jnp.float32) + bia(R_B2, D)
    tgt = _layer_norm(tgt + ff, bia(R_LN3_G, D), bia(R_LN3_B, D))           # (L, D)

    # ---- GroupFC (duplicate_factor == 1): logits[l] = <h_l, pool_l> + bias ----
    prod = tgt * const_ref[1]                                               # (L, D)
    ones = jnp.ones((1, D), jnp.float32)
    lg = jax.lax.dot_general(ones, prod, (((1,), (1,)), ((), ())),
                             preferred_element_type=jnp.float32)            # (1, L)
    logits = jnp.concatenate(
        [lg, jnp.zeros((1, OUT_PAD - L), jnp.float32)], axis=-1)            # (1, 128)
    out_ref[0] = logits + bia(R_POOL_B, OUT_PAD)


# --------------------------------- glue / wrapper ---------------------------------
def _patchify(images):
    b, c, hgt, wdt = images.shape
    x = images.reshape(b, c, GH, PATCH, GW, PATCH)
    x = x.transpose(0, 2, 4, 1, 3, 5)                # (B, GH, GW, C, ph, pw)
    return x.reshape(b, GH * GW, PDIM)


def _pack_params(p):
    # input-independent query path hoisted out of the kernel
    scale = 1.0 / math.sqrt(HD)
    tgt0 = _layer_norm(2.0 * p["q_embed"], p["ln1_g"], p["ln1_b"])          # (L, D)
    q_scaled = (tgt0 @ p["wq"] + p["bq"]) * scale                           # scale folded
    q_hm = q_scaled.reshape(L, NH, HD).transpose(1, 0, 2)                   # (NH, L, HD)

    wkv_w1 = jnp.concatenate(
        [jnp.concatenate([p["wk"], p["wv"]], axis=1), p["w1"]], axis=0)     # (2D, 2D)
    wo_w2 = jnp.concatenate([p["wo"], p["w2"]], axis=0)                     # (3D, D)
    const_ld = jnp.stack([tgt0, p["pool"]], axis=0)                         # (2, L, D)

    def row(v):
        v = jnp.asarray(v, jnp.float32).reshape(-1)
        return jnp.pad(v, (0, BIAS_W - v.shape[0]))

    rows = [
        row(p["b_patch"]), row(p["bn_g"]), row(p["bn_b"]),
        row(p["b_emb"]),
        row(jnp.concatenate([p["bk"], p["bv"]], axis=1)),
        row(p["bo"]), row(p["ln2_g"]), row(p["ln2_b"]),
        row(p["b1"]), row(p["b2"]), row(p["ln3_g"]), row(p["ln3_b"]),
        row(p["pool_bias"]),
    ]
    rows += [jnp.zeros((BIAS_W,), jnp.float32)] * (N_BIAS_ROWS - len(rows))
    bias_slab = jnp.stack(rows, axis=0)                                     # (16, 256)

    return (p["w_patch"], p["w_emb"], wkv_w1, wo_w2, q_hm, const_ld, bias_slab)


def swinv2_mldecoder_forward(images, params):
    patches = _patchify(images)                      # (B, HW, PDIM)
    w_patch, w_emb, wkv_w1, wo_w2, q_hm, const_ld, bias_slab = _pack_params(params)

    in_specs = [
        pl.BlockSpec((1, HW, PDIM), lambda b: (b, 0, 0)),
        pl.BlockSpec((PDIM, CFEAT), lambda b: (0, 0)),
        pl.BlockSpec((CFEAT, D), lambda b: (0, 0)),
        pl.BlockSpec((2 * D, 2 * D), lambda b: (0, 0)),
        pl.BlockSpec((3 * D, D), lambda b: (0, 0)),
        pl.BlockSpec((NH, L, HD), lambda b: (0, 0, 0)),
        pl.BlockSpec((2, L, D), lambda b: (0, 0, 0)),
        pl.BlockSpec((N_BIAS_ROWS, BIAS_W), lambda b: (0, 0)),
    ]

    out = pl.pallas_call(
        _mldecoder_kernel,
        grid=(B,),
        in_specs=in_specs,
        out_specs=pl.BlockSpec((1, 1, OUT_PAD), lambda b: (b, 0, 0)),
        out_shape=jax.ShapeDtypeStruct((B, 1, OUT_PAD), jnp.float32),
        compiler_params=pltpu.CompilerParams(dimension_semantics=("parallel",)),
    )(patches, w_patch, w_emb, wkv_w1, wo_w2, q_hm, const_ld, bias_slab)
    return out.reshape(B, OUT_PAD)[:, :NUM_CLASSES]


# --------------------------- deterministic parameter init ---------------------------
def init_params(key):
    ks = jax.random.split(key, 32)

    def w(i, shape, std):
        return jax.random.normal(ks[i], shape, jnp.float32) * std

    return {
        "w_patch": w(0, (PDIM, CFEAT), 1.0 / math.sqrt(PDIM)),
        "b_patch": w(1, (1, CFEAT), 0.02),
        "bn_g": jnp.ones((1, CFEAT), jnp.float32),
        "bn_b": jnp.zeros((1, CFEAT), jnp.float32),
        "w_emb": w(2, (CFEAT, D), 1.0 / math.sqrt(CFEAT)),
        "b_emb": w(3, (1, D), 0.02),
        "q_embed": w(4, (L, D), 1.0),                 # nn.Embedding ~ N(0,1), frozen
        "ln1_g": jnp.ones((1, D), jnp.float32), "ln1_b": jnp.zeros((1, D), jnp.float32),
        "wq": w(5, (D, D), 1.0 / math.sqrt(D)), "bq": w(6, (1, D), 0.02),
        "wk": w(7, (D, D), 1.0 / math.sqrt(D)), "bk": w(8, (1, D), 0.02),
        "wv": w(9, (D, D), 1.0 / math.sqrt(D)), "bv": w(10, (1, D), 0.02),
        "wo": w(11, (D, D), 1.0 / math.sqrt(D)), "bo": w(12, (1, D), 0.02),
        "ln2_g": jnp.ones((1, D), jnp.float32), "ln2_b": jnp.zeros((1, D), jnp.float32),
        "w1": w(13, (D, FF), 1.0 / math.sqrt(D)), "b1": w(14, (1, FF), 0.02),
        "w2": w(15, (FF, D), 1.0 / math.sqrt(FF)), "b2": w(16, (1, D), 0.02),
        "ln3_g": jnp.ones((1, D), jnp.float32), "ln3_b": jnp.zeros((1, D), jnp.float32),
        "pool": w(17, (L, D), math.sqrt(2.0 / (D + DUP))),   # xavier_normal
        "pool_bias": jnp.zeros((1, NUM_CLASSES), jnp.float32),
    }


# --------------------------------- pure-JAX reference ---------------------------------
def reference_forward(images, p):
    patches = _patchify(images)

    def one(pt):
        feat = _layer_norm(pt @ p["w_patch"] + p["b_patch"], p["bn_g"], p["bn_b"])
        emb = jax.nn.relu(feat @ p["w_emb"] + p["b_emb"])
        tgt = _layer_norm(2.0 * p["q_embed"], p["ln1_g"], p["ln1_b"])
        q = tgt @ p["wq"] + p["bq"]
        k = emb @ p["wk"] + p["bk"]
        v = emb @ p["wv"] + p["bv"]
        qh = q.reshape(L, NH, HD).transpose(1, 0, 2)
        kh = k.reshape(HW, NH, HD).transpose(1, 0, 2)
        vh = v.reshape(HW, NH, HD).transpose(1, 0, 2)
        s = jnp.einsum("hld,hsd->hls", qh, kh) / math.sqrt(HD)
        a = jax.nn.softmax(s, axis=-1)
        o = jnp.einsum("hls,hsd->hld", a, vh).transpose(1, 0, 2).reshape(L, D)
        o = o @ p["wo"] + p["bo"]
        tgt = _layer_norm(tgt + o, p["ln2_g"], p["ln2_b"])
        ff = jax.nn.relu(tgt @ p["w1"] + p["b1"]) @ p["w2"] + p["b2"]
        tgt = _layer_norm(tgt + ff, p["ln3_g"], p["ln3_b"])
        return jnp.sum(tgt * p["pool"], axis=-1)[:NUM_CLASSES] + p["pool_bias"][0]

    return jax.vmap(one)(patches)


if __name__ == "__main__":
    key = jax.random.PRNGKey(0)
    k_img, k_par = jax.random.split(key)
    images = jax.random.normal(k_img, (B, CIN, IMG, IMG), jnp.float32)
    params = init_params(k_par)

    out = swinv2_mldecoder_forward(images, params)
    out = jax.block_until_ready(out)
    assert out.shape == (B, NUM_CLASSES)

    ref = reference_forward(images, params)
    np.testing.assert_allclose(np.asarray(out), np.asarray(ref), rtol=1e-2, atol=1e-2)

    print("KERNEL_OK")
</pallas_src>

<mosaic_0001>
module attributes {stable_mosaic.version = 11 : i64} {
  func.func @_mldecoder_kernel(%arg0: i32, %arg1: memref<1x16x192xf32, #tpu.memory_space<vmem>>, %arg2: memref<192x64xf32, #tpu.memory_space<vmem>>, %arg3: memref<64x128xf32, #tpu.memory_space<vmem>>, %arg4: memref<256x256xf32, #tpu.memory_space<vmem>>, %arg5: memref<384x128xf32, #tpu.memory_space<vmem>>, %arg6: memref<8x60x16xf32, #tpu.memory_space<vmem>>, %arg7: memref<2x60x128xf32, #tpu.memory_space<vmem>>, %arg8: memref<16x256xf32, #tpu.memory_space<vmem>>, %arg9: memref<1x1x128xf32, #tpu.memory_space<vmem>>) attributes {dimension_semantics = [#tpu.dimension_semantics<parallel>], iteration_bounds = array<i64: 2>, scalar_prefetch = 0 : i64, scratch_operands = 0 : i64, tpu.core_type = #tpu.core_type<tc>, window_params = [{transform_indices = @transform_0, window_bounds = array<i64: 1, 16, 192>}, {pipeline_mode = #tpu.pipeline_mode<synchronous>, transform_indices = @transform_1, window_bounds = array<i64: 192, 64>}, {pipeline_mode = #tpu.pipeline_mode<synchronous>, transform_indices = @transform_2, window_bounds = array<i64: 64, 128>}, {pipeline_mode = #tpu.pipeline_mode<synchronous>, transform_indices = @transform_3, window_bounds = array<i64: 256, 256>}, {pipeline_mode = #tpu.pipeline_mode<synchronous>, transform_indices = @transform_4, window_bounds = array<i64: 384, 128>}, {pipeline_mode = #tpu.pipeline_mode<synchronous>, transform_indices = @transform_5, window_bounds = array<i64: 8, 60, 16>}, {pipeline_mode = #tpu.pipeline_mode<synchronous>, transform_indices = @transform_6, window_bounds = array<i64: 2, 60, 128>}, {pipeline_mode = #tpu.pipeline_mode<synchronous>, transform_indices = @transform_7, window_bounds = array<i64: 16, 256>}, {transform_indices = @transform_8, window_bounds = array<i64: 1, 1, 128>}]} {
    %c0 = arith.constant 0 : index
    %c0_0 = arith.constant 0 : index
    %c0_1 = arith.constant 0 : index
    %0 = vector.load %arg1[%c0, %c0_0, %c0_1] : memref<1x16x192xf32, #tpu.memory_space<vmem>>, vector<1x16x192xf32>
    %1 = vector.shape_cast %0 : vector<1x16x192xf32> to vector<16x192xf32>
    %c0_2 = arith.constant 0 : index
    %c0_3 = arith.constant 0 : index
    %2 = vector.load %arg2[%c0_2, %c0_3] : memref<192x64xf32, #tpu.memory_space<vmem>>, vector<192x64xf32>
    %cst = arith.constant dense<0.000000e+00> : vector<16x64xf32>
    %3 = tpu.matmul %1, %2, %cst {dimension_numbers = #tpu.dot_dimension_numbers<[1], [0], [0], [1], [0, 0, 1, 1], [], []>} : vector<16x192xf32>, vector<192x64xf32>, vector<16x64xf32> -> vector<16x64xf32>
    %c0_4 = arith.constant 0 : index
    %c0_5 = arith.constant 0 : index
    %4 = vector.load %arg8[%c0_4, %c0_5] : memref<16x256xf32, #tpu.memory_space<vmem>>, vector<1x64xf32>
    %5 = vector.broadcast %4 : vector<1x64xf32> to vector<16x64xf32>
    %6 = arith.addf %3, %5 : vector<16x64xf32>
    %c1 = arith.constant 1 : index
    %c0_6 = arith.constant 0 : index
    %7 = vector.load %arg8[%c1, %c0_6] : memref<16x256xf32, #tpu.memory_space<vmem>>, vector<1x64xf32>
    %c2 = arith.constant 2 : index
    %c0_7 = arith.constant 0 : index
    %8 = vector.load %arg8[%c2, %c0_7] : memref<16x256xf32, #tpu.memory_space<vmem>>, vector<1x64xf32>
    %cst_8 = arith.constant dense<0.000000e+00> : vector<16xf32>
    %9 = vector.multi_reduction <add>, %6, %cst_8 [1] : vector<16x64xf32> to vector<16xf32>
    %10 = vector.shape_cast %9 : vector<16xf32> to vector<16x1xf32>
    %cst_9 = arith.constant 6.400000e+01 : f32
    %11 = vector.broadcast %cst_9 : f32 to vector<16x1xf32>
    %12 = arith.divf %10, %11 : vector<16x1xf32>
    %13 = vector.broadcast %12 : vector<16x1xf32> to vector<16x64xf32>
    %14 = arith.subf %6, %13 : vector<16x64xf32>
    %15 = arith.mulf %14, %14 : vector<16x64xf32>
    %cst_10 = arith.constant dense<0.000000e+00> : vector<16xf32>
    %16 = vector.multi_reduction <add>, %15, %cst_10 [1] : vector<16x64xf32> to vector<16xf32>
    %17 = vector.shape_cast %16 : vector<16xf32> to vector<16x1xf32>
    %cst_11 = arith.constant 6.400000e+01 : f32
    %18 = vector.broadcast %cst_11 : f32 to vector<16x1xf32>
    %19 = arith.divf %17, %18 : vector<16x1xf32>
    %20 = vector.broadcast %12 : vector<16x1xf32> to vector<16x64xf32>
    %21 = arith.subf %6, %20 : vector<16x64xf32>
    %cst_12 = arith.constant 9.99999974E-6 : f32
    %22 = vector.broadcast %cst_12 : f32 to vector<16x1xf32>
    %23 = arith.addf %19, %22 : vector<16x1xf32>
    %24 = math.rsqrt %23 : vector<16x1xf32>
    %25 = vector.broadcast %24 : vector<16x1xf32> to vector<16x64xf32>
    %26 = arith.mulf %21, %25 : vector<16x64xf32>
    %27 = vector.broadcast %7 : vector<1x64xf32> to vector<16x64xf32>
    %28 = arith.mulf %26, %27 : vector<16x64xf32>
    %29 = vector.broadcast %8 : vector<1x64xf32> to vector<16x64xf32>
    %30 = arith.addf %28, %29 : vector<16x64xf32>
    %c0_13 = arith.constant 0 : index
    %c0_14 = arith.constant 0 : index
    %31 = vector.load %arg3[%c0_13, %c0_14] : memref<64x128xf32, #tpu.memory_space<vmem>>, vector<64x128xf32>
    %cst_15 = arith.constant dense<0.000000e+00> : vector<16x128xf32>
    %32 = tpu.matmul %30, %31, %cst_15 {dimension_numbers = #tpu.dot_dimension_numbers<[1], [0], [0], [1], [0, 0, 1, 1], [], []>} : vector<16x64xf32>, vector<64x128xf32>, vector<16x128xf32> -> vector<16x128xf32>
    %c3 = arith.constant 3 : index
    %c0_16 = arith.constant 0 : index
    %33 = vector.load %arg8[%c3, %c0_16] : memref<16x256xf32, #tpu.memory_space<vmem>>, vector<1x128xf32>
    %34 = vector.broadcast %33 : vector<1x128xf32> to vector<16x128xf32>
    %35 = arith.addf %32, %34 : vector<16x128xf32>
    %cst_17 = arith.constant 0.000000e+00 : f32
    %36 = vector.broadcast %cst_17 : f32 to vector<16x128xf32>
    %37 = arith.maximumf %35, %36 : vector<16x128xf32>
    %c0_18 = arith.constant 0 : index
    %c0_19 = arith.constant 0 : index
    %38 = vector.load %arg4[%c0_18, %c0_19] : memref<256x256xf32, #tpu.memory_space<vmem>>, vector<128x256xf32>
    %cst_20 = arith.constant dense<0.000000e+00> : vector<16x256xf32>
    %39 = tpu.matmul %37, %38, %cst_20 {dimension_numbers = #tpu.dot_dimension_numbers<[1], [0], [0], [1], [0, 0, 1, 1], [], []>} : vector<16x128xf32>, vector<128x256xf32>, vector<16x256xf32> -> vector<16x256xf32>
    %c4 = arith.constant 4 : index
    %c0_21 = arith.constant 0 : index
    %40 = vector.load %arg8[%c4, %c0_21] : memref<16x256xf32, #tpu.memory_space<vmem>>, vector<1x256xf32>
    %41 = vector.broadcast %40 : vector<1x256xf32> to vector<16x256xf32>
    %42 = arith.addf %39, %41 : vector<16x256xf32>
    %43 = vector.extract_strided_slice %42 {offsets = [0, 0], sizes = [16, 128], strides = [1, 1]} : vector<16x256xf32> to vector<16x128xf32>
    %44 = vector.extract_strided_slice %42 {offsets = [0, 128], sizes = [16, 128], strides = [1, 1]} : vector<16x256xf32> to vector<16x128xf32>
    %45 = vector.extract_strided_slice %43 {offsets = [0, 0], sizes = [16, 16], strides = [1, 1]} : vector<16x128xf32> to vector<16x16xf32>
    %46 = vector.extract_strided_slice %43 {offsets = [0, 16], sizes = [16, 16], strides = [1, 1]} : vector<16x128xf32> to vector<16x16xf32>
    %47 = vector.extract_strided_slice %43 {offsets = [0, 32], sizes = [16, 16], strides = [1, 1]} : vector<16x128xf32> to vector<16x16xf32>
    %48 = vector.extract_strided_slice %43 {offsets = [0, 48], sizes = [16, 16], strides = [1, 1]} : vector<16x128xf32> to vector<16x16xf32>
    %49 = vector.extract_strided_slice %43 {offsets = [0, 64], sizes = [16, 16], strides = [1, 1]} : vector<16x128xf32> to vector<16x16xf32>
    %50 = vector.extract_strided_slice %43 {offsets = [0, 80], sizes = [16, 16], strides = [1, 1]} : vector<16x128xf32> to vector<16x16xf32>
    %51 = vector.extract_strided_slice %43 {offsets = [0, 96], sizes = [16, 16], strides = [1, 1]} : vector<16x128xf32> to vector<16x16xf32>
    %52 = vector.extract_strided_slice %43 {offsets = [0, 112], sizes = [16, 16], strides = [1, 1]} : vector<16x128xf32> to vector<16x16xf32>
    %53 = vector.shape_cast %45 : vector<16x16xf32> to vector<1x16x16xf32>
    %54 = vector.shape_cast %46 : vector<16x16xf32> to vector<1x16x16xf32>
    %55 = vector.shape_cast %47 : vector<16x16xf32> to vector<1x16x16xf32>
    %56 = vector.shape_cast %48 : vector<16x16xf32> to vector<1x16x16xf32>
    %57 = vector.shape_cast %49 : vector<16x16xf32> to vector<1x16x16xf32>
    %58 = vector.shape_cast %50 : vector<16x16xf32> to vector<1x16x16xf32>
    %59 = vector.shape_cast %51 : vector<16x16xf32> to vector<1x16x16xf32>
    %60 = vector.shape_cast %52 : vector<16x16xf32> to vector<1x16x16xf32>
    %61 = tpu.concatenate %53, %54, %55, %56, %57, %58, %59, %60 in 0 : vector<1x16x16xf32>, vector<1x16x16xf32>, vector<1x16x16xf32>, vector<1x16x16xf32>, vector<1x16x16xf32>, vector<1x16x16xf32>, vector<1x16x16xf32>, vector<1x16x16xf32> -> vector<8x16x16xf32>
    %62 = vector.extract_strided_slice %44 {offsets = [0, 0], sizes = [16, 16], strides = [1, 1]} : vector<16x128xf32> to vector<16x16xf32>
    %63 = vector.extract_strided_slice %44 {offsets = [0, 16], sizes = [16, 16], strides = [1, 1]} : vector<16x128xf32> to vector<16x16xf32>
    %64 = vector.extract_strided_slice %44 {offsets = [0, 32], sizes = [16, 16], strides = [1, 1]} : vector<16x128xf32> to vector<16x16xf32>
    %65 = vector.extract_strided_slice %44 {offsets = [0, 48], sizes = [16, 16], strides = [1, 1]} : vector<16x128xf32> to vector<16x16xf32>
    %66 = vector.extract_strided_slice %44 {offsets = [0, 64], sizes = [16, 16], strides = [1, 1]} : vector<16x128xf32> to vector<16x16xf32>
    %67 = vector.extract_strided_slice %44 {offsets = [0, 80], sizes = [16, 16], strides = [1, 1]} : vector<16x128xf32> to vector<16x16xf32>
    %68 = vector.extract_strided_slice %44 {offsets = [0, 96], sizes = [16, 16], strides = [1, 1]} : vector<16x128xf32> to vector<16x16xf32>
    %69 = vector.extract_strided_slice %44 {offsets = [0, 112], sizes = [16, 16], strides = [1, 1]} : vector<16x128xf32> to vector<16x16xf32>
    %70 = vector.shape_cast %62 : vector<16x16xf32> to vector<1x16x16xf32>
    %71 = vector.shape_cast %63 : vector<16x16xf32> to vector<1x16x16xf32>
    %72 = vector.shape_cast %64 : vector<16x16xf32> to vector<1x16x16xf32>
    %73 = vector.shape_cast %65 : vector<16x16xf32> to vector<1x16x16xf32>
    %74 = vector.shape_cast %66 : vector<16x16xf32> to vector<1x16x16xf32>
    %75 = vector.shape_cast %67 : vector<16x16xf32> to vector<1x16x16xf32>
    %76 = vector.shape_cast %68 : vector<16x16xf32> to vector<1x16x16xf32>
    %77 = vector.shape_cast %69 : vector<16x16xf32> to vector<1x16x16xf32>
    %78 = tpu.concatenate %70, %71, %72, %73, %74, %75, %76, %77 in 0 : vector<1x16x16xf32>, vector<1x16x16xf32>, vector<1x16x16xf32>, vector<1x16x16xf32>, vector<1x16x16xf32>, vector<1x16x16xf32>, vector<1x16x16xf32>, vector<1x16x16xf32> -> vector<8x16x16xf32>
    %c0_22 = arith.constant 0 : index
    %c0_23 = arith.constant 0 : index
    %c0_24 = arith.constant 0 : index
    %79 = vector.load %arg6[%c0_22, %c0_23, %c0_24] : memref<8x60x16xf32, #tpu.memory_space<vmem>>, vector<8x60x16xf32>
    "tpu.trace_start"() <{level = 10 : i32, message = "hld,hsd->hls"}> : () -> ()
    %cst_25 = arith.constant dense<0.000000e+00> : vector<8x60x16xf32>
    %80 = tpu.matmul %79, %61, %cst_25 {dimension_numbers = #tpu.dot_dimension_numbers<[2], [2], [1], [1], [0, 0, 0, 1, 1, 1], [0], [0]>} : vector<8x60x16xf32>, vector<8x16x16xf32>, vector<8x60x16xf32> -> vector<8x60x16xf32>
    "tpu.trace_stop"() : () -> ()
    %cst_26 = arith.constant dense<0xFF800000> : vector<8x60xf32>
    %81 = vector.multi_reduction <maximumf>, %80, %cst_26 [2] : vector<8x60x16xf32> to vector<8x60xf32>
    %82 = vector.shape_cast %81 : vector<8x60xf32> to vector<8x60x1xf32>
    %83 = vector.broadcast %82 : vector<8x60x1xf32> to vector<8x60x16xf32>
    %84 = arith.subf %80, %83 : vector<8x60x16xf32>
    %85 = math.exp %84 : vector<8x60x16xf32>
    %cst_27 = arith.constant dense<0.000000e+00> : vector<8x60xf32>
    %86 = vector.multi_reduction <add>, %85, %cst_27 [2] : vector<8x60x16xf32> to vector<8x60xf32>
    %87 = vector.shape_cast %86 : vector<8x60xf32> to vector<8x60x1xf32>
    %88 = tpu.reciprocal %87 {approx = true} : vector<8x60x1xf32> -> vector<8x60x1xf32>
    %89 = vector.broadcast %88 : vector<8x60x1xf32> to vector<8x60x16xf32>
    %90 = arith.mulf %85, %89 : vector<8x60x16xf32>
    "tpu.trace_start"() <{level = 10 : i32, message = "hls,hsd->hld"}> : () -> ()
    %cst_28 = arith.constant dense<0.000000e+00> : vector<8x60x16xf32>
    %91 = tpu.matmul %90, %78, %cst_28 {dimension_numbers = #tpu.dot_dimension_numbers<[2], [1], [1], [2], [0, 0, 0, 1, 1, 2], [0], [0]>} : vector<8x60x16xf32>, vector<8x16x16xf32>, vector<8x60x16xf32> -> vector<8x60x16xf32>
    "tpu.trace_stop"() : () -> ()
    %92 = vector.extract_strided_slice %91 {offsets = [0, 0, 0], sizes = [1, 60, 16], strides = [1, 1, 1]} : vector<8x60x16xf32> to vector<1x60x16xf32>
    %93 = vector.shape_cast %92 : vector<1x60x16xf32> to vector<60x16xf32>
    %94 = vector.extract_strided_slice %91 {offsets = [1, 0, 0], sizes = [1, 60, 16], strides = [1, 1, 1]} : vector<8x60x16xf32> to vector<1x60x16xf32>
    %95 = vector.shape_cast %94 : vector<1x60x16xf32> to vector<60x16xf32>
    %96 = vector.extract_strided_slice %91 {offsets = [2, 0, 0], sizes = [1, 60, 16], strides = [1, 1, 1]} : vector<8x60x16xf32> to vector<1x60x16xf32>
    %97 = vector.shape_cast %96 : vector<1x60x16xf32> to vector<60x16xf32>
    %98 = vector.extract_strided_slice %91 {offsets = [3, 0, 0], sizes = [1, 60, 16], strides = [1, 1, 1]} : vector<8x60x16xf32> to vector<1x60x16xf32>
    %99 = vector.shape_cast %98 : vector<1x60x16xf32> to vector<60x16xf32>
    %100 = vector.extract_strided_slice %91 {offsets = [4, 0, 0], sizes = [1, 60, 16], strides = [1, 1, 1]} : vector<8x60x16xf32> to vector<1x60x16xf32>
    %101 = vector.shape_cast %100 : vector<1x60x16xf32> to vector<60x16xf32>
    %102 = vector.extract_strided_slice %91 {offsets = [5, 0, 0], sizes = [1, 60, 16], strides = [1, 1, 1]} : vector<8x60x16xf32> to vector<1x60x16xf32>
    %103 = vector.shape_cast %102 : vector<1x60x16xf32> to vector<60x16xf32>
    %104 = vector.extract_strided_slice %91 {offsets = [6, 0, 0], sizes = [1, 60, 16], strides = [1, 1, 1]} : vector<8x60x16xf32> to vector<1x60x16xf32>
    %105 = vector.shape_cast %104 : vector<1x60x16xf32> to vector<60x16xf32>
    %106 = vector.extract_strided_slice %91 {offsets = [7, 0, 0], sizes = [1, 60, 16], strides = [1, 1, 1]} : vector<8x60x16xf32> to vector<1x60x16xf32>
    %107 = vector.shape_cast %106 : vector<1x60x16xf32> to vector<60x16xf32>
    %108 = tpu.concatenate %93, %95, %97, %99, %101, %103, %105, %107 in 1 : vector<60x16xf32>, vector<60x16xf32>, vector<60x16xf32>, vector<60x16xf32>, vector<60x16xf32>, vector<60x16xf32>, vector<60x16xf32>, vector<60x16xf32> -> vector<60x128xf32>
    %c0_29 = arith.constant 0 : index
    %c0_30 = arith.constant 0 : index
    %109 = vector.load %arg5[%c0_29, %c0_30] : memref<384x128xf32, #tpu.memory_space<vmem>>, vector<128x128xf32>
    %cst_31 = arith.constant dense<0.000000e+00> : vector<60x128xf32>
    %110 = tpu.matmul %108, %109, %cst_31 {dimension_numbers = #tpu.dot_dimension_numbers<[1], [0], [0], [1], [0, 0, 1, 1], [], []>} : vector<60x128xf32>, vector<128x128xf32>, vector<60x128xf32> -> vector<60x128xf32>
    %c5 = arith.constant 5 : index
    %c0_32 = arith.constant 0 : index
    %111 = vector.load %arg8[%c5, %c0_32] : memref<16x256xf32, #tpu.memory_space<vmem>>, vector<1x128xf32>
    %112 = vector.broadcast %111 : vector<1x128xf32> to vector<60x128xf32>
    %113 = arith.addf %110, %112 : vector<60x128xf32>
    %c0_33 = arith.constant 0 : index
    %c0_34 = arith.constant 0 : index
    %c0_35 = arith.constant 0 : index
    %114 = vector.load %arg7[%c0_33, %c0_34, %c0_35] : memref<2x60x128xf32, #tpu.memory_space<vmem>>, vector<1x60x128xf32>
    %115 = vector.shape_cast %114 : vector<1x60x128xf32> to vector<60x128xf32>
    %116 = arith.addf %115, %113 : vector<60x128xf32>
    %c6 = arith.constant 6 : index
    %c0_36 = arith.constant 0 : index
    %117 = vector.load %arg8[%c6, %c0_36] : memref<16x256xf32, #tpu.memory_space<vmem>>, vector<1x128xf32>
    %c7 = arith.constant 7 : index
    %c0_37 = arith.constant 0 : index
    %118 = vector.load %arg8[%c7, %c0_37] : memref<16x256xf32, #tpu.memory_space<vmem>>, vector<1x128xf32>
    %cst_38 = arith.constant dense<0.000000e+00> : vector<60xf32>
    %119 = vector.multi_reduction <add>, %116, %cst_38 [1] : vector<60x128xf32> to vector<60xf32>
    %120 = vector.shape_cast %119 : vector<60xf32> to vector<60x1xf32>
    %cst_39 = arith.constant 1.280000e+02 : f32
    %121 = vector.broadcast %cst_39 : f32 to vector<60x1xf32>
    %122 = arith.divf %120, %121 : vector<60x1xf32>
    %123 = vector.broadcast %122 : vector<60x1xf32> to vector<60x128xf32>
    %124 = arith.subf %116, %123 : vector<60x128xf32>
    %125 = arith.mulf %124, %124 : vector<60x128xf32>
    %cst_40 = arith.constant dense<0.000000e+00> : vector<60xf32>
    %126 = vector.multi_reduction <add>, %125, %cst_40 [1] : vector<60x128xf32> to vector<60xf32>
    %127 = vector.shape_cast %126 : vector<60xf32> to vector<60x1xf32>
    %cst_41 = arith.constant 1.280000e+02 : f32
    %128 = vector.broadcast %cst_41 : f32 to vector<60x1xf32>
    %129 = arith.divf %127, %128 : vector<60x1xf32>
    %130 = vector.broadcast %122 : vector<60x1xf32> to vector<60x128xf32>
    %131 = arith.subf %116, %130 : vector<60x128xf32>
    %cst_42 = arith.constant 9.99999974E-6 : f32
    %132 = vector.broadcast %cst_42 : f32 to vector<60x1xf32>
    %133 = arith.addf %129, %132 : vector<60x1xf32>
    %134 = math.rsqrt %133 : vector<60x1xf32>
    %135 = vector.broadcast %134 : vector<60x1xf32> to vector<60x128xf32>
    %136 = arith.mulf %131, %135 : vector<60x128xf32>
    %137 = vector.broadcast %117 : vector<1x128xf32> to vector<60x128xf32>
    %138 = arith.mulf %136, %137 : vector<60x128xf32>
    %139 = vector.broadcast %118 : vector<1x128xf32> to vector<60x128xf32>
    %140 = arith.addf %138, %139 : vector<60x128xf32>
    %c128 = arith.constant 128 : index
    %c0_43 = arith.constant 0 : index
    %141 = vector.load %arg4[%c128, %c0_43] : memref<256x256xf32, #tpu.memory_space<vmem>>, vector<128x256xf32>
    %cst_44 = arith.constant dense<0.000000e+00> : vector<60x256xf32>
    %142 = tpu.matmul %140, %141, %cst_44 {dimension_numbers = #tpu.dot_dimension_numbers<[1], [0], [0], [1], [0, 0, 1, 1], [], []>} : vector<60x128xf32>, vector<128x256xf32>, vector<60x256xf32> -> vector<60x256xf32>
    %c8 = arith.constant 8 : index
    %c0_45 = arith.constant 0 : index
    %143 = vector.load %arg8[%c8, %c0_45] : memref<16x256xf32, #tpu.memory_space<vmem>>, vector<1x256xf32>
    %144 = vector.broadcast %143 : vector<1x256xf32> to vector<60x256xf32>
    %145 = arith.addf %142, %144 : vector<60x256xf32>
    %cst_46 = arith.constant 0.000000e+00 : f32
    %146 = vector.broadcast %cst_46 : f32 to vector<60x256xf32>
    %147 = arith.maximumf %145, %146 : vector<60x256xf32>
    %c128_47 = arith.constant 128 : index
    %c0_48 = arith.constant 0 : index
    %148 = vector.load %arg5[%c128_47, %c0_48] : memref<384x128xf32, #tpu.memory_space<vmem>>, vector<256x128xf32>
    %cst_49 = arith.constant dense<0.000000e+00> : vector<60x128xf32>
    %149 = tpu.matmul %147, %148, %cst_49 {dimension_numbers = #tpu.dot_dimension_numbers<[1], [0], [0], [1], [0, 0, 1, 1], [], []>} : vector<60x256xf32>, vector<256x128xf32>, vector<60x128xf32> -> vector<60x128xf32>
    %c9 = arith.constant 9 : index
    %c0_50 = arith.constant 0 : index
    %150 = vector.load %arg8[%c9, %c0_50] : memref<16x256xf32, #tpu.memory_space<vmem>>, vector<1x128xf32>
    %151 = vector.broadcast %150 : vector<1x128xf32> to vector<60x128xf32>
    %152 = arith.addf %149, %151 : vector<60x128xf32>
    %153 = arith.addf %140, %152 : vector<60x128xf32>
    %c10 = arith.constant 10 : index
    %c0_51 = arith.constant 0 : index
    %154 = vector.load %arg8[%c10, %c0_51] : memref<16x256xf32, #tpu.memory_space<vmem>>, vector<1x128xf32>
    %c11 = arith.constant 11 : index
    %c0_52 = arith.constant 0 : index
    %155 = vector.load %arg8[%c11, %c0_52] : memref<16x256xf32, #tpu.memory_space<vmem>>, vector<1x128xf32>
    %cst_53 = arith.constant dense<0.000000e+00> : vector<60xf32>
    %156 = vector.multi_reduction <add>, %153, %cst_53 [1] : vector<60x128xf32> to vector<60xf32>
    %157 = vector.shape_cast %156 : vector<60xf32> to vector<60x1xf32>
    %cst_54 = arith.constant 1.280000e+02 : f32
    %158 = vector.broadcast %cst_54 : f32 to vector<60x1xf32>
    %159 = arith.divf %157, %158 : vector<60x1xf32>
    %160 = vector.broadcast %159 : vector<60x1xf32> to vector<60x128xf32>
    %161 = arith.subf %153, %160 : vector<60x128xf32>
    %162 = arith.mulf %161, %161 : vector<60x128xf32>
    %cst_55 = arith.constant dense<0.000000e+00> : vector<60xf32>
    %163 = vector.multi_reduction <add>, %162, %cst_55 [1] : vector<60x128xf32> to vector<60xf32>
    %164 = vector.shape_cast %163 : vector<60xf32> to vector<60x1xf32>
    %cst_56 = arith.constant 1.280000e+02 : f32
    %165 = vector.broadcast %cst_56 : f32 to vector<60x1xf32>
    %166 = arith.divf %164, %165 : vector<60x1xf32>
    %167 = vector.broadcast %159 : vector<60x1xf32> to vector<60x128xf32>
    %168 = arith.subf %153, %167 : vector<60x128xf32>
    %cst_57 = arith.constant 9.99999974E-6 : f32
    %169 = vector.broadcast %cst_57 : f32 to vector<60x1xf32>
    %170 = arith.addf %166, %169 : vector<60x1xf32>
    %171 = math.rsqrt %170 : vector<60x1xf32>
    %172 = vector.broadcast %171 : vector<60x1xf32> to vector<60x128xf32>
    %173 = arith.mulf %168, %172 : vector<60x128xf32>
    %174 = vector.broadcast %154 : vector<1x128xf32> to vector<60x128xf32>
    %175 = arith.mulf %173, %174 : vector<60x128xf32>
    %176 = vector.broadcast %155 : vector<1x128xf32> to vector<60x128xf32>
    %177 = arith.addf %175, %176 : vector<60x128xf32>
    %c1_58 = arith.constant 1 : index
    %c0_59 = arith.constant 0 : index
    %c0_60 = arith.constant 0 : index
    %178 = vector.load %arg7[%c1_58, %c0_59, %c0_60] : memref<2x60x128xf32, #tpu.memory_space<vmem>>, vector<1x60x128xf32>
    %179 = vector.shape_cast %178 : vector<1x60x128xf32> to vector<60x128xf32>
    %180 = arith.mulf %177, %179 : vector<60x128xf32>
    %cst_61 = arith.constant 1.000000e+00 : f32
    %181 = vector.broadcast %cst_61 : f32 to vector<1x128xf32>
    %cst_62 = arith.constant dense<0.000000e+00> : vector<1x60xf32>
    %182 = tpu.matmul %181, %180, %cst_62 {dimension_numbers = #tpu.dot_dimension_numbers<[1], [1], [0], [0], [0, 0, 1, 0], [], []>} : vector<1x128xf32>, vector<60x128xf32>, vector<1x60xf32> -> vector<1x60xf32>
    %cst_63 = arith.constant 0.000000e+00 : f32
    %183 = vector.broadcast %cst_63 : f32 to vector<1x68xf32>
    %184 = tpu.concatenate %182, %183 in 1 : vector<1x60xf32>, vector<1x68xf32> -> vector<1x128xf32>
    %c12 = arith.constant 12 : index
    %c0_64 = arith.constant 0 : index
    %185 = vector.load %arg8[%c12, %c0_64] : memref<16x256xf32, #tpu.memory_space<vmem>>, vector<1x128xf32>
    %186 = arith.addf %184, %185 : vector<1x128xf32>
    %c0_65 = arith.constant 0 : index
    %c0_66 = arith.constant 0 : index
    %c0_67 = arith.constant 0 : index
    %187 = vector.load %arg9[%c0_65, %c0_66, %c0_67] : memref<1x1x128xf32, #tpu.memory_space<vmem>>, vector<1x1x128xf32>
    %188 = vector.shape_cast %187 : vector<1x1x128xf32> to vector<1x128xf32>
    %189 = vector.shape_cast %186 : vector<1x128xf32> to vector<1x1x128xf32>
    tpu.vector_store %arg9[%c0_65, %c0_66, %c0_67], %189 {strides = array<i32>} : memref<1x1x128xf32, #tpu.memory_space<vmem>>, vector<1x1x128xf32>,
    return
  }
  func.func @transform_0(%arg0: i32) -> (i32, i32, i32) {
    %c0_i32 = arith.constant 0 : i32
    %c0_i32_0 = arith.constant 0 : i32
    %c0_i32_1 = arith.constant 0 : i32
    return %arg0, %c0_i32, %c0_i32_0 : i32, i32, i32
  }
  func.func @transform_1(%arg0: i32) -> (i32, i32) {
    %c0_i32 = arith.constant 0 : i32
    %c0_i32_0 = arith.constant 0 : i32
    %c0_i32_1 = arith.constant 0 : i32
    return %c0_i32, %c0_i32_0 : i32, i32
  }
  func.func @transform_2(%arg0: i32) -> (i32, i32) {
    %c0_i32 = arith.constant 0 : i32
    %c0_i32_0 = arith.constant 0 : i32
    %c0_i32_1 = arith.constant 0 : i32
    return %c0_i32, %c0_i32_0 : i32, i32
  }
  func.func @transform_3(%arg0: i32) -> (i32, i32) {
    %c0_i32 = arith.constant 0 : i32
    %c0_i32_0 = arith.constant 0 : i32
    %c0_i32_1 = arith.constant 0 : i32
    return %c0_i32, %c0_i32_0 : i32, i32
  }
  func.func @transform_4(%arg0: i32) -> (i32, i32) {
    %c0_i32 = arith.constant 0 : i32
    %c0_i32_0 = arith.constant 0 : i32
    %c0_i32_1 = arith.constant 0 : i32
    return %c0_i32, %c0_i32_0 : i32, i32
  }
  func.func @transform_5(%arg0: i32) -> (i32, i32, i32) {
    %c0_i32 = arith.constant 0 : i32
    %c0_i32_0 = arith.constant 0 : i32
    %c0_i32_1 = arith.constant 0 : i32
    %c0_i32_2 = arith.constant 0 : i32
    return %c0_i32, %c0_i32_0, %c0_i32_1 : i32, i32, i32
  }
  func.func @transform_6(%arg0: i32) -> (i32, i32, i32) {
    %c0_i32 = arith.constant 0 : i32
    %c0_i32_0 = arith.constant 0 : i32
    %c0_i32_1 = arith.constant 0 : i32
    %c0_i32_2 = arith.constant 0 : i32
    return %c0_i32, %c0_i32_0, %c0_i32_1 : i32, i32, i32
  }
  func.func @transform_7(%arg0: i32) -> (i32, i32) {
    %c0_i32 = arith.constant 0 : i32
    %c0_i32_0 = arith.constant 0 : i32
    %c0_i32_1 = arith.constant 0 : i32
    return %c0_i32, %c0_i32_0 : i32, i32
  }
  func.func @transform_8(%arg0: i32) -> (i32, i32, i32) {
    %c0_i32 = arith.constant 0 : i32
    %c0_i32_0 = arith.constant 0 : i32
    %c0_i32_1 = arith.constant 0 : i32
    return %arg0, %c0_i32, %c0_i32_0 : i32, i32, i32
  }
}

</mosaic_0001>

<bundles_post_ra>
// kernel: tpu_custom_call.1
= control target key start
LH: loop header
LB: loop body
LE: loop exit
PB: predicated region body
PF: predicated region fallthrough
CT: control target
= control target key end

     0   :  { %13 = vsyncpa [#allocation3], 0  ;;  %s8724_s0 = inlined_call_operand.hbm [shape: f32[2,16,192], index: 0, kind: input, shape index: {}]   ;;  %s8725_s1 = inlined_call_operand.vmem [shape: f32[192,64], index: 1, kind: input, shape index: {}]   ;;  %s8726_s2 = inlined_call_operand.hbm [shape: f32[64,128], index: 2, kind: input, shape index: {}]   ;;  %s8727_s3 = inlined_call_operand.vmem [shape: f32[256,256], index: 3, kind: input, shape index: {}]   ;;  %s8728_s4 = inlined_call_operand.vmem [shape: f32[384,128], index: 4, kind: input, shape index: {}]   ;;  %s8729_s5 = inlined_call_operand.vmem [shape: f32[8,60,16], index: 5, kind: input, shape index: {}]   ;;  %s8730_s6 = inlined_call_operand.vmem [shape: f32[2,60,128], index: 6, kind: input, shape index: {}]   ;;  %s8731_s7 = inlined_call_operand.vmem [shape: f32[16,256], index: 7, kind: input, shape index: {}]   ;;  %s8732_s8 = inlined_call_operand.hbm [shape: f32[2,1,128], index: 8, kind: output, shape index: {}]  }
   0x1   :  { %15 = vsyncpa [#allocation3 + $0x1], 0 }
   0x2   :  { %16 = vsyncpa [#allocation6], 0 }
   0x3   :  { %17 = vsyncpa [#allocation4], 0 }
   0x4   :  { %19 = vsyncpa [#allocation4 + $0x1], 0  ;;  %s6586_s27 = smov 0   ;;  %s6588_s28 = smov 0  }
   0x5   :  { %s6590_s29 = smov 0   ;;  %s6592_s30 = smov 0  }
   0x6 LB: > { %s6607_s9 = sadd.s32 4294967295, %s6521_s30   ;;  %s4778_s10 = sadd.s32 4294967294, %s6521_s30   ;;  %s6521_s30 = sphi %s6592_s30, %s8872_s30   ;;  %s6517_s29 = sphi %s6590_s29, %s8875_s29   ;;  %s6513_s28 = sphi %s6588_s28, %s8874_s28   ;;  %s6509_s27 = sphi %s6586_s27, %s8873_s27  }
   0x7   : > { %p45_p0 = scmp.ne.s32.totalorder %s6513_s28, %s6509_s27  ;;  %p8733_p1 = scmp.eq.s32.totalorder %s6607_s9, 0 }
   0x8   : > { %p222_p3 = scmp.eq.s32.totalorder %s4778_s10, 1  ;;  %p4779_p5 = scmp.ge.s32.totalorder %s6521_s30, 1 }
   0x9   : > { %p6616_p4 = por %p8733_p1, %p45_p0  ;;  %p229_p7 = scmp.lt.s32.totalorder %s6521_s30, 3 }
   0xa   : > { %p6621_p6 = por %p222_p3, %p45_p0  ;;  %s6523_s14 = smov [#allocation5]  }
   0xb   : > { %s8784_s11 = scalar_select %p6616_p4, 1, 0 }
   0xc   : > { %s8785_s12 = scalar_select %p6621_p6, 1, 0 }
   0xd   : > { %p6626_p8 = pnand %p4779_p5, %p229_p7  ;;  %s244_s15 = sshll.u32 %s6523_s14, 4  ;;  %s6630_s15 = int_to_ptr.vmem [resolvable:$true] %s244_s15 }
   0xe   : > { %s6642_s17 = sadd.s32 1, %s6521_s30   ;;  %s32_s18 = sadd.s32 1, %s6517_s29 }
   0xf   : > { %s8786_s13 = scalar_select %p6626_p8, 1, 0 }
  0x10   : > { %p5827_p9 = pneg %p6626_p8  ;;  %8788 = sst [smem:[#allocation11_spill]] %s6642_s17 }
  0x11   : > { %s29_s19 = ssub.s32 %s6521_s30, %s6642_s17  ;;  %s6393_s22 = scalar_lea.hbm %s8726_s2, 1024 }
  0x12   : > { %p6637_p11 = pnand %p5827_p9, %p8733_p1  ;;  %p6394_p12 = scmp.ne.s32.totalorder %s8726_s2, %s6393_s22 }
  0x13   : > { %p6400_p5 = scmp.lt.u32.totalorder %s6393_s22, %s8726_s2 }
  0x14   : > { %p6395_p13 = pneg %p6637_p11 }
  0x16   : > { %p6396_p0 = pnand %p6395_p13, %p6394_p12 }
  0x18   : > { %p6397_p3 = pneg %p6396_p0 }
  0x1a   : > { %p6402_p7 = pnand %p6400_p5, %p6397_p3 }
  0x1c   : > { %6405 = shalt.err (!%p6402_p7)
}
  0x1d   : > { %s6406_s10 = scalar_lea.vmem %s6630_s15, 1024  ;;  %p6414_p2 = scmp.lt.s32.totalorder %s6630_s15, %s6630_s15 }
  0x1e   : > { %p6407_p9 = scmp.ne.s32.totalorder %s6630_s15, %s6406_s10  ;;  %p6415_p6 = scmp.lt.s32.totalorder %s6406_s10, %s6406_s10 }
  0x20   : > { %p6409_p10 = pnand %p6407_p9, %p6395_p13  ;;  %p6416_p4 = por %p6415_p6, %p6414_p2 }
  0x22   : > { %p6410_p1 = pneg %p6409_p10 }
  0x24   : > { %p6417_p8 = pnand %p6416_p4, %p6410_p1 }
  0x26   : > { %6420 = shalt.err (!%p6417_p8)
}
  0x27   : > { %s6524_s14 = smov 128   ;;  %s6525_s20 = smov 8  }
  0x28   : > { %5830 = dma.hbm_to_vmem [thread:$0]  (!%p6637_p11), %s8726_s2, 1024, %s6630_s15, [#allocation6], %s6524_s14, %s6524_s14, %s6525_s20  }
  0x29   : > { %p30_p2 = scmp.eq.s32.totalorder %s29_s19, 0  ;;  %p39_p1 = scmp.ne.s32.totalorder %s6517_s29, %s6513_s28 }
  0x2a   : > { %p40_p4 = scmp.eq.s32.totalorder %s6521_s30, 0  ;;  %p5840_p6 = scmp.lt.s32.totalorder %s6521_s30, 2 }
  0x2b   : > { %s6673_s23 = scalar_select %p30_p2, %s6517_s29, %s32_s18  }
  0x2c   : > { %p41_p8 = por %p40_p4, %p39_p1  ;;  %p8789_p10 = scmp.eq.s32.totalorder %s6607_s9, 1 }
  0x2d   : > { %s273_s25 = sand.u32 1, %s6517_s29   ;;  %s4949_s26 = sshll.u32 %s6521_s30, 9 }
  0x2e   : > { %p6677_p12 = por %p8789_p10, %p39_p1  ;;  %s4782_s10 = sshll.u32 %s273_s25, 5 }
  0x2f   : > { %s6686_s21 = scalar_lea.hbm %s8724_s0, %s4949_s26  ;;  %s277_s15 = scalar_lea.vmem [#allocation2], %s4782_s10 }
  0x30   : > { %s284_s18 = sshll.u32 %s277_s15, 4  ;;  %p6688_p11 = pnand %p5840_p6, %p41_p8  ;;  %s6692_s18 = int_to_ptr.vmem [resolvable:$true] %s284_s18 }
  0x31   : > { %s6694_s14 = scalar_lea.sflag [#allocation3], %s273_s25  ;;  %s6421_s20 = scalar_lea.hbm %s6686_s21, 512 }
  0x32   : > { %p6422_p13 = scmp.ne.s32.totalorder %s6686_s21, %s6421_s20  ;;  %p6423_p0 = pneg %p6688_p11 }
  0x33   : > { %s6426_s26 = scalar_lea.hbm %s8724_s0, 1024  ;;  %p6427_p7 = scmp.lt.u32.totalorder %s6686_s21, %s8724_s0 }
  0x34   : > { %p6424_p3 = pnand %p6423_p0, %p6422_p13  ;;  %p6428_p9 = scmp.lt.u32.totalorder %s6426_s26, %s6421_s20 }
  0x35   : > { %p6430_p1 = scmp.lt.u32.totalorder %s6421_s20, %s6686_s21 }
  0x36   : > { %p6425_p5 = pneg %p6424_p3  ;;  %p6429_p2 = por %p6428_p9, %p6427_p7 }
  0x38   : > { %p6431_p4 = por %p6430_p1, %p6429_p2 }
  0x3a   : > { %p6432_p6 = pnand %p6431_p4, %p6425_p5 }
  0x3c   : > { %6435 = shalt.err (!%p6432_p6)
}
  0x3d   : > { %s6436_s25 = scalar_lea.vmem %s6692_s18, 512  ;;  %s6526_s15 = smov [#allocation2]  }
  0x3e   : > { %p6437_p8 = scmp.ne.s32.totalorder %s6692_s18, %s6436_s25  ;;  %s6441_s17 = sshll.u32 %s6526_s15, 4  ;;  %s6442_s17 = int_to_ptr.vmem [resolvable:$false] %s6441_s17 }
  0x3f   : > { %s6443_s22 = scalar_lea.vmem %s6442_s17, 1024  ;;  %p6444_p3 = scmp.lt.s32.totalorder %s6692_s18, %s6442_s17 }
  0x40   : > { %p6439_p10 = pnand %p6437_p8, %p6423_p0  ;;  %p6445_p7 = scmp.lt.s32.totalorder %s6443_s22, %s6436_s25 }
  0x42   : > { %p6440_p13 = pneg %p6439_p10  ;;  %p6446_p9 = por %p6445_p7, %p6444_p3 }
  0x44   : > { %p6447_p2 = pnand %p6446_p9, %p6440_p13 }
  0x46   : > { %6450 = shalt.err (!%p6447_p2)
}
  0x47   : > { %s6527_s20 = smov 256   ;;  %s6528_s26 = smov 16  }
  0x48   : > { %5834 = dma.hbm_to_vmem [thread:$0]  (!%p6688_p11), %s6686_s21, 512, %s6692_s18, %s6694_s14, %s6527_s20, %s6527_s20, %s6528_s26  }
  0x49   : > { %p8792_p0 = scmp.ne.s32.totalorder %s8786_s13, 0 }
  0x4b   : > { %296 = sbr.rel (%p8792_p0) target bundleno = 3802 (0xeda), region = 52 }
  0x52   : > { %s6725_s10 = sand.u32 1, %s6513_s28   ;;  %p8793_p5 = scmp.ne.s32.totalorder %s8784_s11, 0 }
  0x53   : > { %s4786_s16 = sshll.u32 %s6725_s10, 5  ;;  %s299_s25 = scalar_lea.sflag [#allocation3], %s6725_s10 }
  0x54   : > { %s6729_s15 = scalar_lea.vmem [#allocation2], %s4786_s16 }
  0x55   : > { %6496 = dma.done.wait (%p8793_p5), %s299_s25, 512  }
  0x56   : > { %6498 = vsyncadd (%p8793_p5), %s299_s25, 4294966784  ;;  %p8794_p11 = scmp.eq.s32.totalorder %s6607_s9, 0 }
  0x58   : > { %6500 = dma.done.wait (%p8794_p11), [#allocation6], 1024   ;;  %p8795_p1 = pmov %p8794_p11 }
  0x59   : > { %v8744_v0 = vmov 0.0|0.0   ;;  %v342_v1 = vld [vmem:[%s8725_s1] sm:$0xff]  ;;  %v343_v2 = vld [vmem:[%s8725_s1 + $0x8] sm:$0xff]  ;;  %v344_v3 = vld [vmem:[%s8725_s1 + $0x10] sm:$0xff]  ;;  %vm367_vm0 = vcmask 523264   ;;  %vm834_vm1 = vcmask 130048  }
  0x5a   : > { %6502 = vsyncadd (%p8795_p1), [#allocation6], 4294966272  ;;  %5547 = vmatprep.subr.bf16.mxu0 %v8744_v0  ;;  %v5548_v4 = vpack.c.bf16 %v343_v2, %v342_v1  ;;  %v345_v5 = vld [vmem:[%s8725_s1 + $0x18] sm:$0xff]  ;;  %v346_v7 = vld [vmem:[%s8725_s1 + $0x20] sm:$0xff]  ;;  %s8740_s13 = smov 96   ;;  %s8738_s21 = smov 112  }
  0x5b   : > { %v5551_v6 = vpack.c.bf16 %v345_v5, %v344_v3  ;;  %v347_v8 = vld [vmem:[%s8725_s1 + $0x28] sm:$0xff]  ;;  %v348_v10 = vld [vmem:[%s8725_s1 + $0x30] sm:$0xff]  ;;  %v349_v11 = vld [vmem:[%s8725_s1 + $0x38] sm:$0xff]  ;;  %s6534_s18 = smov 48   ;;  %s6535_s22 = smov 64   ;;  %vm1920_vm3 = vcmask 125952  }
  0x5c   : > { %5549 = vmatpush1.bf16.msra.mxu0 %v5548_v4  ;;  %v5554_v9 = vpack.c.bf16 %v347_v8, %v346_v7  ;;  %v339_v12 = vld [vmem:[%s6729_s15 + $0x8] sm:$0xff]  ;;  %v5557_v13 = vpack.c.bf16 %v349_v11, %v348_v10  ;;  %v350_v14 = vld [vmem:[%s8725_s1 + $0x40] sm:$0xff]  ;;  %v352_v17 = vld [vmem:[%s8725_s1 + $0x50] sm:$0xff]  ;;  %s8783_s20 = smov 16   ;;  %s8782_s11 = smov 32   ;;  %vm3868_vm4 = vcmask 261120  }
  0x5d   : > { %5550 = vmatprep.subr.bf16.mxu0 %v8744_v0  ;;  %4788 = vmatprep.mubr.msk.f32.mxu0 %vm367_vm0, %v339_v12  ;;  %v351_v15 = vld [vmem:[%s8725_s1 + $0x48] sm:$0xff]  ;;  %v353_v18 = vld [vmem:[%s8725_s1 + $0x58] sm:$0xff]  ;;  %v354_v20 = vld [vmem:[%s8725_s1 + $0x60] sm:$0xff]  ;;  %s8863_s26 = smov 112   ;;  %s8865_s16 = smov 32   ;;  %vm3877_vm5 = vcmask 392192  }
  0x5e   : > { %v5560_v16 = vpack.c.bf16 %v351_v15, %v350_v14  ;;  %v5563_v19 = vpack.c.bf16 %v353_v18, %v352_v17  ;;  %v355_v21 = vld [vmem:[%s8725_s1 + $0x68] sm:$0xff]  ;;  %v356_v23 = vld [vmem:[%s8725_s1 + $0x70] sm:$0xff]  ;;  %v357_v24 = vld [vmem:[%s8725_s1 + $0x78] sm:$0xff]  ;;  %vm3894_vm6 = vcmask 654336   ;;  %vm3903_vm7 = vcmask 785408   ;;  %s337_s14 = scalar_lea.vmem [#allocation7], %s6725_s10 }
  0x5f   : > { %v5566_v22 = vpack.c.bf16 %v355_v21, %v354_v20  ;;  %v5569_v25 = vpack.c.bf16 %v357_v24, %v356_v23  ;;  %v358_v26 = vld [vmem:[%s8725_s1 + $0x80] sm:$0xff]  ;;  %v359_v27 = vld [vmem:[%s8725_s1 + $0x88] sm:$0xff]  ;;  %v360_v29 = vld [vmem:[%s8725_s1 + $0x90] sm:$0xff]  ;;  %vm3912_vm8 = vcmask 916480   ;;  %vm4075_vm9 = vcmask 1043456   ;;  %s4702_s17 = sshll.u32 %s337_s14, 4  ;;  %s8682_s17 = int_to_ptr.vmem [resolvable:$true] %s4702_s17 }
  0x60   : > { %5552 = vmatpush1.bf16.msra.mxu0 %v5551_v6  ;;  %v5572_v28 = vpack.c.bf16 %v359_v27, %v358_v26  ;;  %v361_v30 = vld [vmem:[%s8725_s1 + $0x98] sm:$0xff]  ;;  %v362_v32 = vld [vmem:[%s8725_s1 + $0xa0] sm:$0xff]  ;;  %v363_v33 = vld [vmem:[%s8725_s1 + $0xa8] sm:$0xff]  ;;  %vm6538_vm10 = vmmov 0   ;;  %vm4684_vm11 = vcmask 490496  }
  0x61   : > { %5553 = vmatprep.subr.bf16.mxu0 %v8744_v0  ;;  %v5575_v31 = vpack.c.bf16 %v361_v30, %v360_v29  ;;  %v5578_v34 = vpack.c.bf16 %v363_v33, %v362_v32  ;;  %v364_v35 = vld [vmem:[%s8725_s1 + $0xb0] sm:$0xff]  ;;  %v365_v36 = vld [vmem:[%s8725_s1 + $0xb8] sm:$0xff]  ;;  %v338_v38 = vld [vmem:[%s6729_s15] sm:$0xff] }
  0x62   : > { %v5581_v37 = vpack.c.bf16 %v365_v36, %v364_v35  ;;  %v341_v39 = vld [vmem:[%s6729_s15 + $0x18] sm:$0xff]  ;;  %v340_v40 = vld [vmem:[%s6729_s15 + $0x10] sm:$0xff]  ;;  %v366_v41 = vld [vmem:[%s8731_s7] ss:$0 sm:$0xff]  ;;  %s6533_s15 = smov 80  }
  0x63   : > { %v482_v60 = vld [vmem:[#allocation5] sm:$0xff]  ;;  %v483_v61 = vld [vmem:[#allocation5 + $0x8] sm:$0xff]  ;;  %v484_v63 = vld [vmem:[#allocation5 + $0x10] sm:$0xff] }
  0x64   : > { %5555 = vmatpush1.bf16.msra.mxu0 %v5554_v9  ;;  %v5583_v62 = vpack.c.bf16 %v483_v61, %v482_v60  ;;  %v485_v1 = vld [vmem:[#allocation5 + $0x18] sm:$0xff]  ;;  %v486_v2 = vld [vmem:[#allocation5 + $0x20] sm:$0xff]  ;;  %v487_v4 = vld [vmem:[#allocation5 + $0x28] sm:$0xff] }
  0x65   : > { %5556 = vmatprep.subr.bf16.mxu0 %v8744_v0  ;;  %v5587_v3 = vpack.c.bf16 %v485_v1, %v484_v63  ;;  %v5591_v5 = vpack.c.bf16 %v487_v4, %v486_v2  ;;  %v488_v6 = vld [vmem:[#allocation5 + $0x30] sm:$0xff]  ;;  %v489_v7 = vld [vmem:[#allocation5 + $0x38] sm:$0xff]  ;;  %v575_v9 = vld [vmem:[%s8727_s3 + $0x8] sm:$0xff] }
  0x66   : > { %5584 = vmatprep.subr.bf16.mxu1 %v5583_v62  ;;  %v5595_v8 = vpack.c.bf16 %v489_v7, %v488_v6  ;;  %v577_v10 = vld [vmem:[%s8727_s3 + $0x18] sm:$0xff]  ;;  %v450_v21 = vld [vmem:[%s8731_s7 + $0x2] ss:$0 sm:$0xff]  ;;  %v576_v27 = vld [vmem:[%s8727_s3 + $0x10] sm:$0xff] }
  0x67   : > { %5586 = vmatpush3.bf16.msra.mxu1 %v5583_v62  ;;  %v5599_v11 = vpack.c.bf16 %v577_v10, %v575_v9  ;;  %v574_v26 = vld [vmem:[%s8727_s3] sm:$0xff]  ;;  %v581_v29 = vld [vmem:[%s8727_s3 + $0x38] sm:$0xff]  ;;  %v580_v35 = vld [vmem:[%s8727_s3 + $0x30] sm:$0xff]  ;;  %v8746_v10 = vmov 0.0  }
  0x68   : > { %5558 = vmatpush1.bf16.msra.mxu0 %v5557_v13  ;;  %5588 = vmatprep.subr.bf16.mxu1 %v5587_v3  ;;  %v583_v36 = vld [vmem:[%s8727_s3 + $0x48] sm:$0xff]  ;;  %v601_v61 = vld [vmem:[%s8727_s3 + $0xd8] sm:$0xff]  ;;  %v598_v1 = vld [vmem:[%s8727_s3 + $0xc0] sm:$0xff] }
  0x69   : > { %5559 = vmatprep.subr.bf16.mxu0 %v8744_v0  ;;  %v599_v60 = vld [vmem:[%s8727_s3 + $0xc8] sm:$0xff]  ;;  %v600_v2 = vld [vmem:[%s8727_s3 + $0xd0] sm:$0xff]  ;;  %v602_v7 = vld [vmem:[%s8727_s3 + $0xe0] sm:$0xff] }
  0x6a   : > { %v5623_v63 = vpack.c.bf16 %v601_v61, %v599_v60  ;;  %v603_v4 = vld [vmem:[%s8727_s3 + $0xe8] sm:$0xff]  ;;  %vm6965_vm2 = vmpackc.low %vm834_vm1, %vm834_vm1 }
  0x6b   : > { %5590 = vmatpush3.bf16.msra.mxu1 %v5587_v3  ;;  %v5625_v3 = vpack.c.bf16 %v600_v2, %v598_v1 }
  0x6c   : > { %5561 = vmatpush1.bf16.msra.mxu0 %v5560_v16  ;;  %5592 = vmatprep.subr.bf16.mxu1 %v5591_v5 }
  0x6d   : > { %5562 = vmatprep.subr.bf16.mxu0 %v8744_v0 }
  0x6f   : > { %5594 = vmatpush3.bf16.msra.mxu1 %v5591_v5  ;;  %v605_v5 = vld [vmem:[%s8727_s3 + $0xf8] sm:$0xff] }
  0x70   : > { %5564 = vmatpush1.bf16.msra.mxu0 %v5563_v19  ;;  %5596 = vmatprep.subr.bf16.mxu1 %v5595_v8  ;;  %v449_v19 = vld [vmem:[%s8731_s7 + $0x1] ss:$0 sm:$0xff]  ;;  %v5627_v6 = vpack.c.bf16 %v605_v5, %v603_v4  ;;  %v787_v4 = vld [vmem:[%s8729_s5 + $0x88] sm:$0xff] }
  0x71   : > { %5565 = vmatprep.subr.bf16.mxu0 %v8744_v0 }
  0x73   : > { %5598 = vmatpush3.bf16.msra.mxu1 %v5595_v8  ;;  %v604_v8 = vld [vmem:[%s8727_s3 + $0xf0] sm:$0xff] }
  0x74   : > { %5567 = vmatpush1.bf16.msra.mxu0 %v5566_v22  ;;  %5600 = vmatprep.subr.bf16.mxu1 %v5599_v11  ;;  %v5629_v9 = vpack.c.bf16 %v604_v8, %v602_v7  ;;  %v490_v11 = vld [vmem:[%s8731_s7 + $0x3] ss:$0 sm:$0xff] }
  0x75   : > { %5568 = vmatprep.subr.bf16.mxu0 %v8744_v0 }
  0x78   : > { %5570 = vmatpush1.bf16.msra.mxu0 %v5569_v25 }
  0x79   : > { %5571 = vmatprep.subr.bf16.mxu0 %v8744_v0 }
  0x7c   : > { %5573 = vmatpush1.bf16.msra.mxu0 %v5572_v28  ;;  %v579_v28 = vld [vmem:[%s8727_s3 + $0x28] sm:$0xff] }
  0x7d   : > { %5574 = vmatprep.subr.bf16.mxu0 %v8744_v0  ;;  %v5603_v33 = vpack.c.bf16 %v581_v29, %v579_v28 }
  0x80   : > { %5576 = vmatpush1.bf16.msra.mxu0 %v5575_v31  ;;  %v5601_v31 = vpack.c.bf16 %v576_v27, %v574_v26 }
  0x81   : > { %5577 = vmatprep.subr.bf16.mxu0 %v8744_v0 }
  0x84   : > { %5579 = vmatpush1.bf16.msra.mxu0 %v5578_v34  ;;  %v578_v34 = vld [vmem:[%s8727_s3 + $0x20] sm:$0xff] }
  0x85   : > { %5580 = vmatprep.subr.bf16.mxu0 %v8744_v0 }
  0x88   : > { %5582 = vmatpush1.bf16.msra.mxu0 %v5581_v37  ;;  %v585_v37 = vld [vmem:[%s8727_s3 + $0x58] sm:$0xff] }
  0x8b   : > { %439 = vmatmul.mubr.f32.vlgmr.msra.gmra.mrb[0].mxu0 %v338_v38  ;;  %v5605_v38 = vpack.c.bf16 %v580_v35, %v578_v34  ;;  %v786_v34 = vld [vmem:[%s8729_s5 + $0x80] sm:$0xff] }
  0x8c   : > { %4789 = vmatprep.mubr.msk.f32.mxu0 %vm367_vm0, %v341_v39  ;;  %v5607_v39 = vpack.c.bf16 %v585_v37, %v583_v36  ;;  %v822_v37 = vld [vmem:[%s8729_s5 + $0x1a0] sm:$0xff] }
  0x8f   : > { %444 = vmatmul.mubr.f32.gmra.mrb[2].mxu0 %v340_v40  ;;  %v582_v40 = vld [vmem:[%s8727_s3 + $0x40] sm:$0xff] }
  0x90   : > { %5264 = vmatprep.mubr.msk.f32.mxu0 %vm834_vm1, %v786_v34 }
 0x15e   : > { %v440_v42 = vpop.f32.mrb[0].mxu0 }
 0x15f   : > { %v441_v43 = vadd.f32 %v440_v42, %v366_v41  ;;  %v442_v44 = vpop.f32.mrb[1].mxu0  ;;  %v587_v42 = vld [vmem:[%s8727_s3 + $0x68] sm:$0xff] }
 0x161   : > { %v451_v45 = vsel %vm367_vm0, %v441_v43, 0.0 }
 0x162   : > { %v445_v46 = vpop.f32.mrb[2].mxu0  ;;  %452 = vadd.xlane.f32.xlu0 %v451_v45 }
 0x163   : > { %v446_v47 = vadd.f32 %v445_v46, %v366_v41  ;;  %v447_v48 = vpop.f32.mrb[3].mxu0  ;;  %v584_v41 = vld [vmem:[%s8727_s3 + $0x50] sm:$0xff]  ;;  %v586_v46 = vld [vmem:[%s8727_s3 + $0x60] sm:$0xff] }
 0x164   : > { %v5609_v44 = vpack.c.bf16 %v584_v41, %v582_v40  ;;  %v591_v48 = vld [vmem:[%s8727_s3 + $0x88] sm:$0xff]  ;;  %v772_v41 = vld [vmem:[%s8729_s5 + $0x10] sm:$0xff] }
 0x165   : > { %v454_v49 = vsel %vm367_vm0, %v446_v47, 0.0  ;;  %v771_v40 = vld [vmem:[%s8729_s5 + $0x8] sm:$0xff] }
 0x166   : > { %455 = vadd.xlane.f32.xlu0 %v454_v49  ;;  %v593_v49 = vld [vmem:[%s8727_s3 + $0x98] sm:$0xff] }
 0x1ef   : > { %v453_v50 = vpop.xlane.xlu0 %452 }
 0x1f0   : > { %v458_v51 = vmul.f32 0.015625, %v453_v50 }
 0x1f2   : > { %v460_v52 = vsub.f32 %v441_v43, %v458_v51  ;;  %v589_v43 = vld [vmem:[%s8727_s3 + $0x78] sm:$0xff]  ;;  %v5615_v51 = vpack.c.bf16 %v593_v49, %v591_v48 }
 0x1f3   : > { %v456_v53 = vpop.xlane.xlu0 %455  ;;  %v5611_v45 = vpack.c.bf16 %v589_v43, %v587_v42  ;;  %v773_v42 = vld [vmem:[%s8729_s5 + $0x18] sm:$0xff]  ;;  %v774_v43 = vld [vmem:[%s8729_s5 + $0x20] sm:$0xff] }
 0x1f4   : > { %v459_v54 = vmul.f32 0.015625, %v456_v53  ;;  %v462_v55 = vmul.f32 %v460_v52, %v460_v52  ;;  %v592_v53 = vld [vmem:[%s8727_s3 + $0x90] sm:$0xff] }
 0x1f6   : > { %v461_v56 = vsub.f32 %v446_v47, %v459_v54  ;;  %v464_v57 = vsel %vm367_vm0, %v462_v55, 0.0  ;;  %v588_v47 = vld [vmem:[%s8727_s3 + $0x70] sm:$0xff]  ;;  %v595_v54 = vld [vmem:[%s8727_s3 + $0xa8] sm:$0xff]  ;;  %v597_v55 = vld [vmem:[%s8727_s3 + $0xb8] sm:$0xff] }
 0x1f7   : > { %465 = vadd.xlane.f32.xlu1 %v464_v57  ;;  %v5613_v50 = vpack.c.bf16 %v588_v47, %v586_v46  ;;  %v5619_v57 = vpack.c.bf16 %v597_v55, %v595_v54  ;;  %v777_v46 = vld [vmem:[%s8729_s5 + $0x38] sm:$0xf]  ;;  %v778_v47 = vld [vmem:[%s8729_s5 + $0x40] sm:$0xff] }
 0x1f8   : > { %v463_v58 = vmul.f32 %v461_v56, %v461_v56 }
 0x1fa   : > { %v467_v59 = vsel %vm367_vm0, %v463_v58, 0.0  ;;  %v594_v58 = vld [vmem:[%s8727_s3 + $0xa0] sm:$0xff] }
 0x1fb   : > { %468 = vadd.xlane.f32.xlu1 %v467_v59  ;;  %v596_v59 = vld [vmem:[%s8727_s3 + $0xb0] sm:$0xff] }
 0x1fc   : > { %v5621_v62 = vpack.c.bf16 %v596_v59, %v594_v58 }
 0x284   : > { %v466_v12 = vpop.xlane.xlu1 %465 }
 0x285   : > { %v470_v13 = vmul.f32 0.015625, %v466_v12 }
 0x287   : > { %v472_v14 = vadd.f32 1e-05, %v470_v13 }
 0x288   : > { %v469_v15 = vpop.xlane.xlu1 %468 }
 0x289   : > { %6101 = vrsqrt.f32 %v472_v14  ;;  %v471_v16 = vmul.f32 0.015625, %v469_v15 }
 0x28b   : > { %v473_v17 = vadd.f32 1e-05, %v471_v16 }
 0x28d   : > { %6103 = vrsqrt.f32 %v473_v17 }
 0x293   : > { %v6102_v18 = vpop.eup %6101 }
 0x294   : > { %v476_v20 = vmul.f32 %v6102_v18, %v460_v52  ;;  %v590_v52 = vld [vmem:[%s8727_s3 + $0x80] sm:$0xff] }
 0x295   : > { %v770_v18 = vld [vmem:[%s8729_s5] sm:$0xff] }
 0x296   : > { %v478_v22 = vmul.f32 %v476_v20, %v449_v19 }
 0x297   : > { %v6104_v23 = vpop.eup %6103 }
 0x298   : > { %v477_v24 = vmul.f32 %v6104_v23, %v461_v56  ;;  %v480_v25 = vadd.f32 %v478_v22, %v450_v21  ;;  %v5617_v56 = vpack.c.bf16 %v592_v53, %v590_v52  ;;  %v4792_v22 = vld [vmem:[%s8731_s7 + $0x4] ss:$8 sm:$0x3] }
 0x29a   : > { %v479_v30 = vmul.f32 %v477_v24, %v449_v19  ;;  %5225 = vmatprep.mubr.msk.f32.mxu1 %vm367_vm0, %v480_v25  ;;  %v609_v19 = vlaneseq }
 0x29c   : > { %v481_v32 = vadd.f32 %v479_v30, %v450_v21  ;;  %v6949_v20 = vshrl.u32 %v609_v19, 7  ;;  %v791_v19 = vld [vmem:[%s8729_s5 + $0xa8] sm:$0xff] }
 0x29e   : > { %5226 = vmatmul.mubr.msk.f32.vlgmr.msra.gmra.mrb[0].mxu1 %vm367_vm0, %v481_v32  ;;  %8796 = vst [vmem:[#allocation12_spill] sm:$0xff] %v6949_v20  ;;  %v8743_v21 = vsub.s32 0, %v6949_v20  ;;  %v8742_v23 = vsub.s32 1, %v6949_v20 }
 0x29f   : > { %5602 = vmatpush1.bf16.msra.mxu1 %v5601_v31  ;;  %683 = vmatprep.mubr.f32.mxu1 %v8746_v10 }
 0x2a0   : > { %5604 = vmatprep.subr.bf16.mxu1 %v5603_v33  ;;  %v612_v25 = vrot.slane %v4792_v22, %v8743_v21  ;;  %v616_v27 = vrot.slane %v4792_v22, %v8742_v23  ;;  %v784_v22 = vld [vmem:[%s8729_s5 + $0x70] sm:$0xff] }
 0x2a3   : > { %5606 = vmatpush1.bf16.msra.mxu1 %v5605_v38 }
 0x2a4   : > { %5608 = vmatprep.subr.bf16.mxu1 %v5607_v39 }
 0x2a7   : > { %5610 = vmatpush1.bf16.msra.mxu1 %v5609_v44  ;;  %v775_v44 = vld [vmem:[%s8729_s5 + $0x28] sm:$0xff] }
 0x2a8   : > { %5612 = vmatprep.subr.bf16.mxu1 %v5611_v45  ;;  %v776_v45 = vld [vmem:[%s8729_s5 + $0x30] sm:$0xff] }
 0x2ab   : > { %5614 = vmatpush1.bf16.msra.mxu1 %v5613_v50 }
 0x2ac   : > { %5616 = vmatprep.subr.bf16.mxu1 %v5615_v51 }
 0x2af   : > { %5618 = vmatpush1.bf16.msra.mxu1 %v5617_v56 }
 0x2b0   : > { %5620 = vmatprep.subr.bf16.mxu1 %v5619_v57 }
 0x2b3   : > { %5622 = vmatpush1.bf16.msra.mxu1 %v5621_v62 }
 0x2b4   : > { %5624 = vmatprep.subr.bf16.mxu1 %v5623_v63 }
 0x2b7   : > { %5626 = vmatpush1.bf16.msra.mxu1 %v5625_v3  ;;  %v779_v3 = vld [vmem:[%s8729_s5 + $0x48] sm:$0xff] }
 0x2b8   : > { %5628 = vmatprep.subr.bf16.mxu1 %v5627_v6 }
 0x2bb   : > { %5630 = vmatpush1.bf16.msra.mxu1 %v5629_v9 }
 0x371   : > { %v5227_v12 = vpop.f32.mrb[0].mxu1 }
 0x372   : > { %v563_v13 = vpop.f32.mrb[1].mxu1  ;;  %v569_v15 = vadd.f32 %v5227_v12, %v490_v11  ;;  %v780_v12 = vld [vmem:[%s8729_s5 + $0x50] sm:$0xff] }
 0x373   : > { %v564_v14 = vadd.f32 %v563_v13, %v490_v11  ;;  %v788_v11 = vld [vmem:[%s8729_s5 + $0x90] sm:$0xff]  ;;  %v781_v13 = vld [vmem:[%s8729_s5 + $0x58] sm:$0xff] }
 0x374   : > { %v573_v17 = vmax.f32 %v569_v15, 0.0 }
 0x375   : > { %v572_v16 = vmax.f32 %v564_v14, 0.0  ;;  %v789_v14 = vld [vmem:[%s8729_s5 + $0x98] sm:$0xff] }
 0x377   : > { %684 = vmatmul.mubr.f32.vlgmr.msra.gmra.mrb[2].mxu1 %v572_v16  ;;  %v782_v16 = vld [vmem:[%s8729_s5 + $0x60] sm:$0xff] }
 0x378   : > { %689 = vmatprep.mubr.f32.mxu1 %v8746_v10 }
 0x37b   : > { %690 = vmatmul.mubr.f32.gmra.mrb[4].mxu1 %v573_v17  ;;  %v790_v17 = vld [vmem:[%s8729_s5 + $0xa0] sm:$0xff] }
 0x37c   : > { %5232 = vmatprep.mubr.msk.f32.mxu1 %vm834_vm1, %v770_v18  ;;  %v783_v18 = vld [vmem:[%s8729_s5 + $0x68] sm:$0xff] }
 0x44a   : > { %v685_v24 = vpop.f32.mrb[2].mxu1 }
 0x44b   : > { %v687_v26 = vpop.f32.mrb[3].mxu1  ;;  %v686_v29 = vadd.f32 %v685_v24, %v612_v25  ;;  %v792_v24 = vld [vmem:[%s8729_s5 + $0xb0] sm:$0xff] }
 0x44c   : > { %v688_v32 = vadd.f32 %v687_v26, %v616_v27  ;;  %v785_v26 = vld [vmem:[%s8729_s5 + $0x78] sm:$0xf] }
 0x44e   : > { %v691_v28 = vpop.f32.mrb[4].mxu1 }
 0x44f   : > { %v692_v30 = vadd.f32 %v691_v28, %v612_v25  ;;  %v693_v31 = vpop.f32.mrb[5].mxu1  ;;  %v794_v28 = vld [vmem:[%s8729_s5 + $0xc0] sm:$0xff] }
 0x450   : > { %v694_v33 = vadd.f32 %v693_v31, %v616_v27  ;;  %v793_v27 = vld [vmem:[%s8729_s5 + $0xb8] sm:$0xf] }
 0x451   : > { %v5896_v35 = vpack.i.bf16 %v692_v30, %v686_v29  ;;  %v5631_v36 = vpack.c.bf16 %v692_v30, %v686_v29  ;;  %v802_v29 = vld [vmem:[%s8729_s5 + $0x100] sm:$0xff] }
 0x452   : > { %v6972_v38 = vpack.i.bf16 %v694_v33, %v688_v32  ;;  %v6976_v39 = vpack.c.bf16 %v694_v33, %v688_v32  ;;  %v795_v32 = vld [vmem:[%s8729_s5 + $0xc8] sm:$0xff] }
 0x453   : > { %5897 = vrot.lane.b32.xlu1 %v5896_v35, %s8740_s13  ;;  %5892 = vrot.lane.b32.xlu0 %v5896_v35, %s8738_s21  ;;  %v803_v33 = vld [vmem:[%s8729_s5 + $0x108] sm:$0xff] }
 0x454   : > { %8799 = vst [vmem:[#allocation13_spill] sm:$0xff] %v6972_v38  ;;  %5633 = vmatprep.subr.msk.bf16.mxu1 %vm6965_vm2, %v5631_v36 }
 0x455   : > { %5636 = vmatpush3.bf16.xpose.msk.msra.mxu1 %vm6965_vm2, %v5631_v36  ;;  %v804_v36 = vld [vmem:[%s8729_s5 + $0x110] sm:$0xff] }
 0x457   : > { %5902 = vrot.lane.b32.xlu1 %v5896_v35, %s6533_s15  ;;  %5912 = vrot.lane.b32.xlu0 %v5896_v35, %s6534_s18 }
 0x45b   : > { %5907 = vrot.lane.b32.xlu1 %v5896_v35, %s6535_s22  ;;  %5922 = vrot.lane.b32.xlu0 %v5896_v35, %s8783_s20 }
 0x45c   : > { %5233 = vmatmul.mubr.msk.f32.vlgmr.msra.gmra.mrb[6].mxu1 %vm834_vm1, %v771_v40  ;;  %v797_v40 = vld [vmem:[%s8729_s5 + $0xd8] sm:$0xff] }
 0x45d   : > { %5235 = vmatprep.mubr.msk.f32.mxu1 %vm834_vm1, %v772_v41  ;;  %v805_v41 = vld [vmem:[%s8729_s5 + $0x118] sm:$0xff] }
 0x45f   : > { %5917 = vrot.lane.b32.xlu1 %v5896_v35, %s8782_s11  ;;  %5932 = vrot.lane.b32.xlu0 %v6972_v38, %s8740_s13  ;;  %v796_v35 = vld [vmem:[%s8729_s5 + $0xd0] sm:$0xff]  ;;  %s8864_s13 = smov 16  }
 0x460   : > { %5236 = vmatmul.mubr.msk.f32.gmra.mrb[8].mxu1 %vm834_vm1, %v773_v42  ;;  %v798_v42 = vld [vmem:[%s8729_s5 + $0xe0] sm:$0xff] }
 0x461   : > { %5238 = vmatprep.mubr.msk.f32.mxu1 %vm834_vm1, %v774_v43  ;;  %v806_v43 = vld [vmem:[%s8729_s5 + $0x120] sm:$0xff] }
 0x463   : > { %5927 = vrot.lane.b32.xlu1 %v6972_v38, %s8738_s21  ;;  %5947 = vrot.lane.b32.xlu0 %v6972_v38, %s6534_s18  ;;  %s4946_s21 = sshll.u32 %s6607_s9, 4  ;;  %s6540_s9 = smov [#allocation7]  }
 0x464   : > { %5239 = vmatmul.mubr.msk.f32.gmra.mrb[10].mxu1 %vm834_vm1, %v775_v44  ;;  %v799_v44 = vld [vmem:[%s8729_s5 + $0xe8] sm:$0xff] }
 0x465   : > { %5241 = vmatprep.mubr.msk.f32.mxu1 %vm834_vm1, %v776_v45  ;;  %v807_v45 = vld [vmem:[%s8729_s5 + $0x128] sm:$0xff] }
 0x467   : > { %5937 = vrot.lane.b32.xlu1 %v6972_v38, %s6533_s15 }
 0x468   : > { %5242 = vmatmul.mubr.msk.f32.gmra.mrb[12].mxu1 %vm834_vm1, %v777_v46  ;;  %v800_v46 = vld [vmem:[%s8729_s5 + $0xf0] sm:$0xff] }
 0x469   : > { %5248 = vmatprep.mubr.msk.f32.mxu1 %vm834_vm1, %v778_v47  ;;  %v808_v47 = vld [vmem:[%s8729_s5 + $0x130] sm:$0xff] }
 0x46b   : > { %5942 = vrot.lane.b32.xlu1 %v6972_v38, %s6535_s22 }
 0x4c5   : > { %v5898_v48 = vpop.permute.xlu1 %5897  ;;  %v5893_v49 = vpop.permute.xlu0 %5892 }
 0x4c6   : > { %v5900_v50 = vunpack.i.h.bf16 %v5898_v48  ;;  %v5899_v51 = vunpack.i.l.bf16 %v5898_v48  ;;  %v5895_v52 = vunpack.i.h.bf16 %v5893_v49  ;;  %v5894_v53 = vunpack.i.l.bf16 %v5893_v49 }
 0x4c8   : > { %v5643_v54 = vpack.c.bf16 %v5900_v50, %v5899_v51  ;;  %v5637_v55 = vpack.c.bf16 %v5895_v52, %v5894_v53  ;;  %v801_v50 = vld [vmem:[%s8729_s5 + $0xf8] sm:$0xf]  ;;  %v810_v52 = vld [vmem:[%s8729_s5 + $0x140] sm:$0xff] }
 0x4c9   : > { %v5903_v56 = vpop.permute.xlu1 %5902  ;;  %v5913_v59 = vpop.permute.xlu0 %5912  ;;  %v809_v51 = vld [vmem:[%s8729_s5 + $0x138] sm:$0xf]  ;;  %v818_v53 = vld [vmem:[%s8729_s5 + $0x180] sm:$0xff] }
 0x4ca   : > { %v5905_v57 = vunpack.i.h.bf16 %v5903_v56  ;;  %v5904_v58 = vunpack.i.l.bf16 %v5903_v56  ;;  %5639 = vmatprep.subr.msk.bf16.mxu1 %vm6965_vm2, %v5637_v55  ;;  %5645 = vmatprep.subr.msk.bf16.mxu0 %vm6965_vm2, %v5643_v54  ;;  %v5915_v62 = vunpack.i.h.bf16 %v5913_v59  ;;  %v5914_v63 = vunpack.i.l.bf16 %v5913_v59  ;;  %v819_v59 = vld [vmem:[%s8729_s5 + $0x188] sm:$0xff] }
 0x4cb   : > { %5642 = vmatpush3.bf16.xpose.msk.msra.mxu1 %vm6965_vm2, %v5637_v55  ;;  %5648 = vmatpush3.bf16.xpose.msk.msra.mxu0 %vm6965_vm2, %v5643_v54 }
 0x4cc   : > { %v5649_v60 = vpack.c.bf16 %v5905_v57, %v5904_v58  ;;  %v5661_v7 = vpack.c.bf16 %v5915_v62, %v5914_v63  ;;  %v811_v58 = vld [vmem:[%s8729_s5 + $0x148] sm:$0xff]  ;;  %v812_v62 = vld [vmem:[%s8729_s5 + $0x150] sm:$0xff] }
 0x4cd   : > { %v5908_v61 = vpop.permute.xlu1 %5907  ;;  %v5923_v25 = vpop.permute.xlu0 %5922  ;;  %v820_v63 = vld [vmem:[%s8729_s5 + $0x190] sm:$0xff] }
 0x4ce   : > { %v5910_v1 = vunpack.i.h.bf16 %v5908_v61  ;;  %v5909_v2 = vunpack.i.l.bf16 %v5908_v61  ;;  %5651 = vmatprep.subr.msk.bf16.mxu1 %vm6965_vm2, %v5649_v60  ;;  %v5925_v30 = vunpack.i.h.bf16 %v5923_v25  ;;  %v5924_v31 = vunpack.i.l.bf16 %v5923_v25 }
 0x4d0   : > { %v5655_v5 = vpack.c.bf16 %v5910_v1, %v5909_v2  ;;  %v5673_v34 = vpack.c.bf16 %v5925_v30, %v5924_v31  ;;  %v813_v1 = vld [vmem:[%s8729_s5 + $0x158] sm:$0xff] }
 0x4d1   : > { %v5918_v6 = vpop.permute.xlu1 %5917  ;;  %v5933_v48 = vpop.permute.xlu0 %5932  ;;  %v821_v2 = vld [vmem:[%s8729_s5 + $0x198] sm:$0xff] }
 0x4d2   : > { %v5920_v8 = vunpack.i.h.bf16 %v5918_v6  ;;  %v5919_v9 = vunpack.i.l.bf16 %v5918_v6  ;;  %5249 = vmatmul.mubr.msk.f32.vlgmr.msra.gmra.mrb[14].mxu1 %vm834_vm1, %v779_v3  ;;  %5265 = vmatmul.mubr.msk.f32.vlgmr.msra.gmra.mrb[4].mxu0 %vm834_vm1, %v787_v4  ;;  %v5935_v54 = vunpack.i.h.bf16 %v5933_v48  ;;  %v5934_v55 = vunpack.i.l.bf16 %v5933_v48  ;;  %v814_v3 = vld [vmem:[%s8729_s5 + $0x160] sm:$0xff]  ;;  %v823_v4 = vld [vmem:[%s8729_s5 + $0x1a8] sm:$0xff]  ;;  %v824_v6 = vld [vmem:[%s8729_s5 + $0x1b0] sm:$0xff] }
 0x4d3   : > { %5657 = vmatprep.subr.msk.bf16.mxu0 %vm6965_vm2, %v5655_v5  ;;  %5654 = vmatpush3.bf16.xpose.msk.msra.mxu1 %vm6965_vm2, %v5649_v60 }
 0x4d4   : > { %v5667_v15 = vpack.c.bf16 %v5920_v8, %v5919_v9  ;;  %5660 = vmatpush3.bf16.xpose.msk.msra.mxu0 %vm6965_vm2, %v5655_v5  ;;  %5663 = vmatprep.subr.msk.bf16.mxu1 %vm6965_vm2, %v5661_v7  ;;  %v7190_v61 = vpack.c.bf16 %v5935_v54, %v5934_v55  ;;  %v816_v5 = vld [vmem:[%s8729_s5 + $0x170] sm:$0xff]  ;;  %v817_v8 = vld [vmem:[%s8729_s5 + $0x178] sm:$0xf] }
 0x4d5   : > { %5267 = vmatprep.mubr.msk.f32.mxu0 %vm834_vm1, %v788_v11  ;;  %5251 = vmatprep.mubr.msk.f32.mxu1 %vm834_vm1, %v780_v12  ;;  %v5928_v49 = vpop.permute.xlu1 %5927  ;;  %v825_v9 = vld [vmem:[%s8729_s5 + $0x1b8] sm:$0xf]  ;;  %v826_v11 = vld [vmem:[%s8729_s5 + $0x1c0] sm:$0xff] }
 0x4d6   : > { %5252 = vmatmul.mubr.msk.f32.gmra.mrb[16].mxu1 %vm834_vm1, %v781_v13  ;;  %5268 = vmatmul.mubr.msk.f32.gmra.mrb[6].mxu0 %vm834_vm1, %v789_v14  ;;  %v5930_v56 = vunpack.i.h.bf16 %v5928_v49  ;;  %v5929_v57 = vunpack.i.l.bf16 %v5928_v49  ;;  %8800 = vst [vmem:[#allocation14_spill] sm:$0xff] %v7190_v61  ;;  %v827_v14 = vld [vmem:[%s8729_s5 + $0x1c8] sm:$0xff] }
 0x4d7   : > { %5669 = vmatprep.subr.msk.bf16.mxu0 %vm6965_vm2, %v5667_v15  ;;  %5254 = vmatprep.mubr.msk.f32.mxu1 %vm834_vm1, %v782_v16 }
 0x4d8   : > { %5270 = vmatprep.mubr.msk.f32.mxu0 %vm834_vm1, %v790_v17  ;;  %v5683_v60 = vpack.c.bf16 %v5930_v56, %v5929_v57  ;;  %v829_v17 = vld [vmem:[%s8729_s5 + $0x1d8] sm:$0xff] }
 0x4da   : > { %5255 = vmatmul.mubr.msk.f32.gmra.mrb[18].mxu1 %vm834_vm1, %v783_v18  ;;  %5271 = vmatmul.mubr.msk.f32.gmra.mrb[8].mxu0 %vm834_vm1, %v791_v19  ;;  %v830_v18 = vld [vmem:[%s8729_s5 + $0x1e0] sm:$0xff]  ;;  %v831_v19 = vld [vmem:[%s8729_s5 + $0x1e8] sm:$0xff] }
 0x4db   : > { %5257 = vmatprep.mubr.msk.f32.mxu1 %vm834_vm1, %v784_v22  ;;  %5273 = vmatprep.mubr.msk.f32.mxu0 %vm834_vm1, %v792_v24  ;;  %v832_v22 = vld [vmem:[%s8729_s5 + $0x1f0] sm:$0xff]  ;;  %v833_v24 = vld [vmem:[%s8729_s5 + $0x1f8] sm:$0xf] }
 0x4de   : > { %5258 = vmatmul.mubr.msk.f32.gmra.mrb[20].mxu1 %vm834_vm1, %v785_v26  ;;  %5274 = vmatmul.mubr.msk.f32.gmra.mrb[10].mxu0 %vm834_vm1, %v793_v27 }
 0x4df   : > { %5280 = vmatprep.mubr.msk.f32.mxu1 %vm834_vm1, %v794_v28  ;;  %5296 = vmatprep.mubr.msk.f32.mxu0 %vm834_vm1, %v802_v29 }
 0x4e2   : > { %5281 = vmatmul.mubr.msk.f32.vlgmr.msra.gmra.mrb[22].mxu1 %vm834_vm1, %v795_v32  ;;  %5297 = vmatmul.mubr.msk.f32.vlgmr.msra.gmra.mrb[12].mxu0 %vm834_vm1, %v803_v33 }
 0x4e3   : > { %5666 = vmatpush3.bf16.xpose.msk.msra.mxu1 %vm6965_vm2, %v5661_v7  ;;  %5672 = vmatpush3.bf16.xpose.msk.msra.mxu0 %vm6965_vm2, %v5667_v15  ;;  %v5938_v7 = vpop.permute.xlu1 %5937  ;;  %v828_v15 = vld [vmem:[%s8729_s5 + $0x1d0] sm:$0xff] }
 0x4e4   : > { %5675 = vmatprep.subr.msk.bf16.mxu1 %vm6965_vm2, %v5673_v34  ;;  %5680 = vmatprep.subr.bf16.mxu0 %v6976_v39  ;;  %v5940_v12 = vunpack.i.h.bf16 %v5938_v7  ;;  %v5939_v13 = vunpack.i.l.bf16 %v5938_v7 }
 0x4e5   : > { %5283 = vmatprep.mubr.msk.f32.mxu1 %vm834_vm1, %v796_v35  ;;  %5299 = vmatprep.mubr.msk.f32.mxu0 %vm834_vm1, %v804_v36 }
 0x4e6   : > { %5284 = vmatmul.mubr.msk.f32.gmra.mrb[24].mxu1 %vm834_vm1, %v797_v40  ;;  %5300 = vmatmul.mubr.msk.f32.gmra.mrb[14].mxu0 %vm834_vm1, %v805_v41  ;;  %v7255_v16 = vpack.c.bf16 %v5940_v12, %v5939_v13 }
 0x4e7   : > { %5286 = vmatprep.mubr.msk.f32.mxu1 %vm834_vm1, %v798_v42  ;;  %5302 = vmatprep.mubr.msk.f32.mxu0 %vm834_vm1, %v806_v43 }
 0x4e8   : > { %8801 = vst [vmem:[#allocation15_spill] sm:$0xff] %v7255_v16 }
 0x4ea   : > { %5287 = vmatmul.mubr.msk.f32.gmra.mrb[26].mxu1 %vm834_vm1, %v799_v44  ;;  %5303 = vmatmul.mubr.msk.f32.gmra.mrb[16].mxu0 %vm834_vm1, %v807_v45 }
 0x4eb   : > { %5289 = vmatprep.mubr.msk.f32.mxu1 %vm834_vm1, %v800_v46  ;;  %5305 = vmatprep.mubr.msk.f32.mxu0 %vm834_vm1, %v808_v47 }
 0x4ee   : > { %5290 = vmatmul.mubr.msk.f32.gmra.mrb[28].mxu1 %vm834_vm1, %v801_v50  ;;  %5306 = vmatmul.mubr.msk.f32.gmra.mrb[18].mxu0 %vm834_vm1, %v809_v51 }
 0x4ef   : > { %5312 = vmatprep.mubr.msk.f32.mxu1 %vm834_vm1, %v810_v52  ;;  %5328 = vmatprep.mubr.msk.f32.mxu0 %vm834_vm1, %v818_v53 }
 0x4f2   : > { %5313 = vmatmul.mubr.msk.f32.vlgmr.msra.gmra.mrb[30].mxu1 %vm834_vm1, %v811_v58  ;;  %5329 = vmatmul.mubr.msk.f32.vlgmr.msra.gmra.mrb[20].mxu0 %vm834_vm1, %v819_v59 }
 0x4f3   : > { %5678 = vmatpush3.bf16.xpose.msk.msra.mxu1 %vm6965_vm2, %v5673_v34  ;;  %5682 = vmatpush3.bf16.msra.mxu0 %v6976_v39  ;;  %v815_v39 = vld [vmem:[%s8729_s5 + $0x168] sm:$0xff] }
 0x4f4   : > { %5684 = vmatprep.subr.bf16.mxu1 %v5683_v60  ;;  %5688 = vmatprep.subr.bf16.mxu0 %v7190_v61 }
 0x4f5   : > { %5315 = vmatprep.mubr.msk.f32.mxu1 %vm834_vm1, %v812_v62  ;;  %5331 = vmatprep.mubr.msk.f32.mxu0 %vm834_vm1, %v820_v63 }
 0x4f6   : > { %5316 = vmatmul.mubr.msk.f32.gmra.mrb[32].mxu1 %vm834_vm1, %v813_v1  ;;  %5332 = vmatmul.mubr.msk.f32.gmra.mrb[22].mxu0 %vm834_vm1, %v821_v2 }
 0x4f7   : > { %5318 = vmatprep.mubr.msk.f32.mxu1 %vm834_vm1, %v814_v3  ;;  %5334 = vmatprep.mubr.msk.f32.mxu0 %vm834_vm1, %v822_v37 }
 0x4fa   : > { %5319 = vmatmul.mubr.msk.f32.gmra.mrb[34].mxu1 %vm834_vm1, %v815_v39  ;;  %5335 = vmatmul.mubr.msk.f32.gmra.mrb[24].mxu0 %vm834_vm1, %v823_v4 }
 0x4fb   : > { %5321 = vmatprep.mubr.msk.f32.mxu1 %vm834_vm1, %v816_v5  ;;  %5337 = vmatprep.mubr.msk.f32.mxu0 %vm834_vm1, %v824_v6 }
 0x4fe   : > { %5322 = vmatmul.mubr.msk.f32.gmra.mrb[36].mxu1 %vm834_vm1, %v817_v8  ;;  %5338 = vmatmul.mubr.msk.f32.gmra.mrb[26].mxu0 %vm834_vm1, %v825_v9 }
 0x4ff   : > { %5344 = vmatprep.mubr.msk.f32.mxu1 %vm834_vm1, %v826_v11 }
 0x502   : > { %5345 = vmatmul.mubr.msk.f32.vlgmr.msra.gmra.mrb[38].mxu1 %vm834_vm1, %v827_v14 }
 0x503   : > { %5686 = vmatpush3.bf16.msra.mxu1 %v5683_v60  ;;  %5347 = vmatprep.mubr.msk.f32.mxu1 %vm834_vm1, %v828_v15 }
 0x504   : > { %5692 = vmatprep.subr.bf16.mxu1 %v7255_v16 }
 0x506   : > { %5348 = vmatmul.mubr.msk.f32.gmra.mrb[40].mxu1 %vm834_vm1, %v829_v17 }
 0x507   : > { %5350 = vmatprep.mubr.msk.f32.mxu1 %vm834_vm1, %v830_v18 }
 0x50a   : > { %5351 = vmatmul.mubr.msk.f32.gmra.mrb[42].mxu1 %vm834_vm1, %v831_v19 }
 0x50b   : > { %5353 = vmatprep.mubr.msk.f32.mxu1 %vm834_vm1, %v832_v22 }
 0x50e   : > { %5354 = vmatmul.mubr.msk.f32.gmra.mrb[44].mxu1 %vm834_vm1, %v833_v24 }
 0x52f   : > { %v7279_v25 = vpop.f32.mrb[6].mxu1 }
 0x530   : > { %v7281_v26 = vpop.f32.mrb[7].mxu1  ;;  %v1902_v27 = vsel %vm834_vm1, %v7279_v25, -inf }
 0x531   : > { %1903 = vmax.xlane.f32.xlu0 %v1902_v27  ;;  %v1899_v28 = vsel %vm834_vm1, %v7281_v26, -inf }
 0x532   : > { %1900 = vmax.xlane.f32.xlu1 %v1899_v28 }
 0x533   : > { %v7287_v29 = vpop.f32.mrb[8].mxu1 }
 0x534   : > { %v7289_v30 = vpop.f32.mrb[9].mxu1  ;;  %v1908_v31 = vsel %vm834_vm1, %v7287_v29, -inf }
 0x535   : > { %1909 = vmax.xlane.f32.xlu0 %v1908_v31  ;;  %v1905_v32 = vsel %vm834_vm1, %v7289_v30, -inf }
 0x536   : > { %1906 = vmax.xlane.f32.xlu1 %v1905_v32 }
 0x537   : > { %v7295_v33 = vpop.f32.mrb[10].mxu1 }
 0x538   : > { %v7297_v34 = vpop.f32.mrb[11].mxu1  ;;  %v1914_v35 = vsel %vm834_vm1, %v7295_v33, -inf }
 0x539   : > { %1915 = vmax.xlane.f32.xlu0 %v1914_v35  ;;  %v1911_v36 = vsel %vm834_vm1, %v7297_v34, -inf }
 0x53a   : > { %1912 = vmax.xlane.f32.xlu1 %v1911_v36 }
 0x53b   : > { %v7303_v40 = vpop.f32.mrb[12].mxu1 }
 0x53c   : > { %v7305_v41 = vpop.f32.mrb[13].mxu1  ;;  %v1921_v42 = vsel %vm1920_vm3, %v7303_v40, -inf }
 0x53d   : > { %1922 = vmax.xlane.f32.xlu0 %v1921_v42  ;;  %v1917_v43 = vsel %vm834_vm1, %v7305_v41, -inf }
 0x53e   : > { %1918 = vmax.xlane.f32.xlu1 %v1917_v43 }
 0x5a5   : > { %v7311_v44 = vpop.f32.mrb[14].mxu1  ;;  %v7313_v45 = vpop.f32.mrb[4].mxu0 }
 0x5a6   : > { %v7315_v46 = vpop.f32.mrb[5].mxu0  ;;  %v1927_v47 = vsel %vm834_vm1, %v7311_v44, -inf  ;;  %v7319_v48 = vpop.f32.mrb[15].mxu1  ;;  %v1951_v50 = vsel %vm834_vm1, %v7313_v45, -inf }
 0x5a7   : > { %1928 = vmax.xlane.f32.xlu0 %v1927_v47  ;;  %v1948_v49 = vsel %vm834_vm1, %v7315_v46, -inf  ;;  %v1924_v59 = vsel %vm834_vm1, %v7319_v48, -inf }
 0x5a8   : > { %1949 = vmax.xlane.f32.xlu1 %v1948_v49 }
 0x5a9   : > { %v7325_v51 = vpop.f32.mrb[16].mxu1  ;;  %v7327_v52 = vpop.f32.mrb[6].mxu0 }
 0x5aa   : > { %v7329_v53 = vpop.f32.mrb[17].mxu1  ;;  %v7331_v54 = vpop.f32.mrb[7].mxu0  ;;  %v1933_v63 = vsel %vm834_vm1, %v7325_v51, -inf  ;;  %v1957_v4 = vsel %vm834_vm1, %v7327_v52, -inf }
 0x5ab   : > { %1952 = vmax.xlane.f32.xlu0 %v1951_v50  ;;  %v1930_v55 = vsel %vm834_vm1, %v7329_v53, -inf  ;;  %v1954_v56 = vsel %vm834_vm1, %v7331_v54, -inf }
 0x5ac   : > { %1931 = vmax.xlane.f32.xlu1 %v1930_v55 }
 0x5ad   : > { %v7337_v57 = vpop.f32.mrb[18].mxu1  ;;  %v7339_v58 = vpop.f32.mrb[8].mxu0 }
 0x5ae   : > { %v7343_v60 = vpop.f32.mrb[19].mxu1  ;;  %v7345_v62 = vpop.f32.mrb[9].mxu0  ;;  %v1939_v11 = vsel %vm834_vm1, %v7337_v57, -inf  ;;  %v1963_v18 = vsel %vm834_vm1, %v7339_v58, -inf }
 0x5af   : > { %1925 = vmax.xlane.f32.xlu0 %v1924_v59  ;;  %v1936_v1 = vsel %vm834_vm1, %v7343_v60, -inf  ;;  %v1960_v5 = vsel %vm834_vm1, %v7345_v62, -inf }
 0x5b0   : > { %1955 = vmax.xlane.f32.xlu1 %v1954_v56 }
 0x5b1   : > { %v7351_v2 = vpop.f32.mrb[20].mxu1  ;;  %v7353_v3 = vpop.f32.mrb[10].mxu0 }
 0x5b2   : > { %v7355_v37 = vpop.f32.mrb[21].mxu1  ;;  %v7357_v39 = vpop.f32.mrb[11].mxu0  ;;  %v1945_v31 = vsel %vm1920_vm3, %v7351_v2, -inf  ;;  %v1969_v47 = vsel %vm1920_vm3, %v7353_v3, -inf }
 0x5b3   : > { %1934 = vmax.xlane.f32.xlu0 %v1933_v63  ;;  %v1942_v12 = vsel %vm834_vm1, %v7355_v37, -inf  ;;  %v1966_v19 = vsel %vm834_vm1, %v7357_v39, -inf }
 0x5b4   : > { %1937 = vmax.xlane.f32.xlu1 %v1936_v1 }
 0x5b5   : > { %v7363_v6 = vpop.f32.mrb[22].mxu1  ;;  %v7365_v7 = vpop.f32.mrb[12].mxu0 }
 0x5b6   : > { %v7367_v8 = vpop.f32.mrb[23].mxu1  ;;  %v7369_v9 = vpop.f32.mrb[13].mxu0  ;;  %v1975_v63 = vsel %vm834_vm1, %v7363_v6, -inf }
 0x5b7   : > { %1958 = vmax.xlane.f32.xlu0 %v1957_v4  ;;  %v1972_v32 = vsel %vm834_vm1, %v7367_v8, -inf  ;;  %v1996_v49 = vsel %vm834_vm1, %v7369_v9, -inf }
 0x5b8   : > { %1961 = vmax.xlane.f32.xlu1 %v1960_v5 }
 0x5b9   : > { %v7375_v13 = vpop.f32.mrb[24].mxu1  ;;  %v7377_v14 = vpop.f32.mrb[14].mxu0 }
 0x5ba   : > { %v7379_v15 = vpop.f32.mrb[25].mxu1  ;;  %v7381_v17 = vpop.f32.mrb[15].mxu0 }
 0x5bb   : > { %8802 = vst [vmem:[#allocation16_spill] sm:$0xff] %v7381_v17  ;;  %1940 = vmax.xlane.f32.xlu0 %v1939_v11  ;;  %v1978_v1 = vsel %vm834_vm1, %v7379_v15, -inf }
 0x5bc   : > { %1943 = vmax.xlane.f32.xlu1 %v1942_v12 }
 0x5bd   : > { %v7387_v22 = vpop.f32.mrb[26].mxu1  ;;  %v7389_v24 = vpop.f32.mrb[16].mxu0 }
 0x5be   : > { %8803 = vst [vmem:[#allocation17_spill] sm:$0xff] %v7387_v22  ;;  %8804 = vst [vmem:[#allocation18_spill] sm:$0xff] %v7389_v24  ;;  %v7391_v27 = vpop.f32.mrb[27].mxu1  ;;  %v7393_v28 = vpop.f32.mrb[17].mxu0  ;;  %v1987_v38 = vsel %vm834_vm1, %v7387_v22, -inf }
 0x5bf   : > { %8805 = vst [vmem:[#allocation19_spill] sm:$0xff] %v7391_v27  ;;  %1964 = vmax.xlane.f32.xlu0 %v1963_v18  ;;  %8806 = vst [vmem:[#allocation20_spill] sm:$0xff] %v7393_v28  ;;  %v1999_v18 = vsel %vm834_vm1, %v7365_v7, -inf  ;;  %v7479_v22 = vpop.permute.xlu1 %5942 }
 0x5c0   : > { %1967 = vmax.xlane.f32.xlu1 %v1966_v19  ;;  %v2002_v19 = vsel %vm834_vm1, %v7381_v17, -inf  ;;  %8815 = vst [vmem:[#allocation29_spill] sm:$0xff] %v7479_v22 }
 0x5c1   : > { %v7399_v35 = vpop.f32.mrb[28].mxu1  ;;  %v7401_v36 = vpop.f32.mrb[18].mxu0 }
 0x5c2   : > { %8807 = vst [vmem:[#allocation21_spill] sm:$0xff] %v7399_v35  ;;  %8808 = vst [vmem:[#allocation22_spill] sm:$0xff] %v7401_v36  ;;  %v7403_v42 = vpop.f32.mrb[29].mxu1  ;;  %v7405_v43 = vpop.f32.mrb[19].mxu0 }
 0x5c3   : > { %8809 = vst [vmem:[#allocation23_spill] sm:$0xff] %v7403_v42  ;;  %1946 = vmax.xlane.f32.xlu0 %v1945_v31  ;;  %8810 = vst [vmem:[#allocation24_spill] sm:$0xff] %v7405_v43  ;;  %v1990_v61 = vsel %vm834_vm1, %v7403_v42, -inf  ;;  %v1993_v42 = vsel %vm1920_vm3, %v7399_v35, -inf  ;;  %v1901_v17 = vpop.xlane.xlu1 %1900 }
 0x5c4   : > { %1973 = vmax.xlane.f32.xlu1 %v1972_v32  ;;  %v2092_v22 = vsub.f32 %v7281_v26, %v1901_v17 }
 0x5c5   : > { %v7411_v50 = vpop.f32.mrb[30].mxu1  ;;  %v7413_v55 = vpop.f32.mrb[20].mxu0 }
 0x5c6   : > { %v7415_v56 = vpop.f32.mrb[31].mxu1  ;;  %v7417_v59 = vpop.f32.mrb[21].mxu0 }
 0x5c7   : > { %8811 = vst [vmem:[#allocation25_spill] sm:$0xff] %v7415_v56  ;;  %1970 = vmax.xlane.f32.xlu0 %v1969_v47  ;;  %8812 = vst [vmem:[#allocation26_spill] sm:$0xff] %v7417_v59  ;;  %v1907_v17 = vpop.xlane.xlu1 %1906 }
 0x5c8   : > { %1997 = vmax.xlane.f32.xlu1 %v1996_v49 }
 0x5c9   : > { %v7423_v4 = vpop.f32.mrb[32].mxu1  ;;  %v7425_v5 = vpop.f32.mrb[22].mxu0 }
 0x5ca   : > { %v7427_v11 = vpop.f32.mrb[33].mxu1  ;;  %v7429_v12 = vpop.f32.mrb[23].mxu0 }
 0x5cb   : > { %1976 = vmax.xlane.f32.xlu0 %v1975_v63  ;;  %v1981_v63 = vsel %vm834_vm1, %v7375_v13, -inf  ;;  %v2026_v35 = vsel %vm834_vm1, %v7427_v11, -inf  ;;  %v2050_v26 = vsel %vm834_vm1, %v7429_v12, -inf }
 0x5cc   : > { %1979 = vmax.xlane.f32.xlu1 %v1978_v1  ;;  %v1984_v1 = vsel %vm834_vm1, %v7391_v27, -inf  ;;  %v2014_v27 = vsel %vm834_vm1, %v7405_v43, -inf  ;;  %v2017_v43 = vsel %vm1920_vm3, %v7401_v36, -inf  ;;  %v2047_v36 = vsel %vm834_vm1, %v7413_v55, -inf }
 0x5cd   : > { %v7435_v31 = vpop.f32.mrb[34].mxu1  ;;  %v7437_v32 = vpop.f32.mrb[24].mxu0 }
 0x5ce   : > { %v7439_v47 = vpop.f32.mrb[35].mxu1  ;;  %v7441_v49 = vpop.f32.mrb[25].mxu0 }
 0x5cf   : > { %2000 = vmax.xlane.f32.xlu0 %v1999_v18  ;;  %v2005_v18 = vsel %vm834_vm1, %v7377_v14, -inf }
 0x5d0   : > { %2003 = vmax.xlane.f32.xlu1 %v2002_v19  ;;  %v2008_v19 = vsel %vm834_vm1, %v7393_v28, -inf  ;;  %v2011_v28 = vsel %vm834_vm1, %v7389_v24, -inf }
 0x5d1   : > { %v7447_v23 = vpop.f32.mrb[36].mxu1  ;;  %v7449_v21 = vpop.f32.mrb[26].mxu0 }
 0x5d2   : > { %8813 = vst [vmem:[#allocation27_spill] sm:$0xff] %v7449_v21  ;;  %v7451_v0 = vpop.f32.mrb[37].mxu1  ;;  %v7453_v10 = vpop.f32.mrb[27].mxu0 }
 0x5d3   : > { %1982 = vmax.xlane.f32.xlu0 %v1981_v63 }
 0x5d4   : > { %1985 = vmax.xlane.f32.xlu1 %v1984_v1 }
 0x5d5   : > { %v7459_v20 = vpop.f32.mrb[38].mxu1 }
 0x5d6   : > { %v7461_v16 = vpop.f32.mrb[39].mxu1 }
 0x5d7   : > { %2006 = vmax.xlane.f32.xlu0 %v2005_v18 }
 0x5d8   : > { %2009 = vmax.xlane.f32.xlu1 %v2008_v19 }
 0x5d9   : > { %v7467_v63 = vpop.f32.mrb[40].mxu1 }
 0x5da   : > { %v7469_v1 = vpop.f32.mrb[41].mxu1 }
 0x5db   : > { %1988 = vmax.xlane.f32.xlu0 %v1987_v38  ;;  %v2020_v38 = vsel %vm834_vm1, %v7415_v56, -inf  ;;  %v2023_v56 = vsel %vm834_vm1, %v7411_v50, -inf }
 0x5dc   : > { %1991 = vmax.xlane.f32.xlu1 %v1990_v61 }
 0x5dd   : > { %v7475_v18 = vpop.f32.mrb[42].mxu1 }
 0x5de   : > { %8814 = vst [vmem:[#allocation28_spill] sm:$0xff] %v7475_v18  ;;  %v7477_v19 = vpop.f32.mrb[43].mxu1 }
 0x5df   : > { %2012 = vmax.xlane.f32.xlu0 %v2011_v28  ;;  %v2044_v28 = vsel %vm834_vm1, %v7417_v59, -inf }
 0x5e0   : > { %2015 = vmax.xlane.f32.xlu1 %v2014_v27  ;;  %v7493_v27 = vpop.permute.xlu0 %5947 }
 0x5e1   : > { %v7485_v61 = vpop.f32.mrb[44].mxu1  ;;  %8818 = vst [vmem:[#allocation32_spill] sm:$0xff] %v7493_v27 }
 0x5e2   : > { %8816 = vst [vmem:[#allocation30_spill] sm:$0xff] %v7485_v61  ;;  %v7487_v24 = vpop.f32.mrb[45].mxu1 }
 0x5e3   : > { %8817 = vst [vmem:[#allocation31_spill] sm:$0xff] %v7487_v24  ;;  %1994 = vmax.xlane.f32.xlu0 %v1993_v42 }
 0x5e4   : > { %2021 = vmax.xlane.f32.xlu1 %v2020_v38  ;;  %v1904_v42 = vpop.xlane.xlu0 %1903  ;;  %v2156_v38 = vmul.f32 1.442695, %v2092_v22  ;;  %v2032_v22 = vsel %vm834_vm1, %v7439_v47, -inf }
 0x5e5   : > { %v2093_v59 = vsub.f32 %v7279_v25, %v1904_v42  ;;  %v2053_v25 = vsel %vm834_vm1, %v7425_v5, -inf }
 0x5e6   : > { %6105 = vpow2.f32 %v2156_v38  ;;  %v1913_v38 = vpop.xlane.xlu1 %1912 }
 0x5e7   : > { %2018 = vmax.xlane.f32.xlu0 %v2017_v43  ;;  %v2029_v43 = vsel %vm834_vm1, %v7423_v4, -inf }
 0x5e8   : > { %2045 = vmax.xlane.f32.xlu1 %v2044_v28  ;;  %v2158_v28 = vmul.f32 1.442695, %v2093_v59  ;;  %v2035_v59 = vsel %vm834_vm1, %v7435_v31, -inf }
 0x5ea   : > { %6107 = vpow2.f32 %v2158_v28  ;;  %v2059_v28 = vsel %vm834_vm1, %v7437_v32, -inf }
 0x5eb   : > { %2024 = vmax.xlane.f32.xlu0 %v2023_v56  ;;  %v2056_v56 = vsel %vm834_vm1, %v7441_v49, -inf }
 0x5ec   : > { %2027 = vmax.xlane.f32.xlu1 %v2026_v35  ;;  %v2094_v35 = vsub.f32 %v7289_v30, %v1907_v17  ;;  %v2096_v17 = vsub.f32 %v7297_v34, %v1913_v38 }
 0x5ee   : > { %v2160_v42 = vmul.f32 1.442695, %v2094_v35  ;;  %v2038_v35 = vsel %vm834_vm1, %v7451_v0, -inf }
 0x5ef   : > { %2048 = vmax.xlane.f32.xlu0 %v2047_v36  ;;  %v1910_v36 = vpop.xlane.xlu0 %1909 }
 0x5f0   : > { %2051 = vmax.xlane.f32.xlu1 %v2050_v26  ;;  %v7514_v26 = vpop.eup %6105  ;;  %v2095_v30 = vsub.f32 %v7287_v29, %v1910_v36  ;;  %6109 = vpow2.f32 %v2160_v42  ;;  %v1919_v29 = vpop.xlane.xlu1 %1918  ;;  %v2062_v36 = vsel %vm834_vm1, %v7453_v10, -inf }
 0x5f1   : > { %v2098_v42 = vsub.f32 %v7305_v41, %v1919_v29  ;;  %v2065_v41 = vsel %vm1920_vm3, %v7449_v21, -inf }
 0x5f3   : > { %2030 = vmax.xlane.f32.xlu0 %v2029_v43  ;;  %v2284_v43 = vsel %vm834_vm1, %v7514_v26, 0.0 }
 0x5f4   : > { %2033 = vmax.xlane.f32.xlu1 %v2032_v22  ;;  %v2162_v22 = vmul.f32 1.442695, %v2095_v30  ;;  %v7526_v27 = vpop.eup %6107  ;;  %v2041_v30 = vsel %vm1920_vm3, %v7447_v23, -inf }
 0x5f5   : > { %v2287_v38 = vsel %vm834_vm1, %v7526_v27, 0.0 }
 0x5f6   : > { %6111 = vpow2.f32 %v2162_v22 }
 0x5f7   : > { %2054 = vmax.xlane.f32.xlu0 %v2053_v25  ;;  %v1916_v25 = vpop.xlane.xlu0 %1915 }
 0x5f8   : > { %2057 = vmax.xlane.f32.xlu1 %v2056_v56  ;;  %v2164_v56 = vmul.f32 1.442695, %v2096_v17  ;;  %v2097_v34 = vsub.f32 %v7295_v33, %v1916_v25 }
 0x5fa   : > { %6113 = vpow2.f32 %v2164_v56  ;;  %v2166_v17 = vmul.f32 1.442695, %v2097_v34 }
 0x5fb   : > { %2036 = vmax.xlane.f32.xlu0 %v2035_v59  ;;  %v7534_v59 = vpop.eup %6109 }
 0x5fc   : > { %2285 = vadd.xlane.f32.xlu1 %v2284_v43  ;;  %v1923_v43 = vpop.xlane.xlu0 %1922  ;;  %v2290_v33 = vsel %vm834_vm1, %v7534_v59, 0.0  ;;  %6115 = vpow2.f32 %v2166_v17 }
 0x5fd   : > { %v2099_v22 = vsub.f32 %v7303_v40, %v1923_v43  ;;  %v2071_v40 = vsel %vm834_vm1, %v7459_v20, -inf }
 0x5ff   : > { %2060 = vmax.xlane.f32.xlu0 %v2059_v28  ;;  %v2168_v28 = vmul.f32 1.442695, %v2098_v42  ;;  %v2170_v29 = vmul.f32 1.442695, %v2099_v22  ;;  %v2074_v42 = vsel %vm834_vm1, %v7469_v1, -inf  ;;  %v2086_v22 = vsel %vm834_vm1, %v7487_v24, -inf }
 0x600   : > { %2039 = vmax.xlane.f32.xlu1 %v2038_v35  ;;  %v2068_v35 = vsel %vm834_vm1, %v7461_v16, -inf  ;;  %v7545_v25 = vpop.eup %6111 }
 0x601   : > { %6117 = vpow2.f32 %v2168_v28  ;;  %v2293_v34 = vsel %vm834_vm1, %v7545_v25, 0.0  ;;  %v2077_v28 = vsel %vm834_vm1, %v7467_v63, -inf }
 0x602   : > { %6119 = vpow2.f32 %v2170_v29  ;;  %v2083_v29 = vsel %vm834_vm1, %v7475_v18, -inf }
 0x603   : > { %2288 = vadd.xlane.f32.xlu0 %v2287_v38 }
 0x604   : > { %2063 = vmax.xlane.f32.xlu1 %v2062_v36  ;;  %v7547_v56 = vpop.eup %6113 }
 0x605   : > { %v2296_v36 = vsel %vm834_vm1, %v7547_v56, 0.0 }
 0x606   : > { %v7557_v38 = vpop.eup %6115 }
 0x607   : > { %2042 = vmax.xlane.f32.xlu0 %v2041_v30  ;;  %v2299_v17 = vsel %vm834_vm1, %v7557_v38, 0.0 }
 0x608   : > { %2291 = vadd.xlane.f32.xlu1 %v2290_v33  ;;  %v2080_v33 = vsel %vm834_vm1, %v7477_v19, -inf }
 0x60b   : > { %2066 = vmax.xlane.f32.xlu0 %v2065_v41  ;;  %v7559_v30 = vpop.eup %6117 }
 0x60c   : > { %2069 = vmax.xlane.f32.xlu1 %v2068_v35  ;;  %v2302_v43 = vsel %vm834_vm1, %v7559_v30, 0.0  ;;  %v7569_v41 = vpop.eup %6119 }
 0x60d   : > { %v2305_v35 = vsel %vm1920_vm3, %v7569_v41, 0.0 }
 0x60f   : > { %2294 = vadd.xlane.f32.xlu0 %v2293_v34  ;;  %v2089_v34 = vsel %vm1920_vm3, %v7485_v61, -inf }
 0x610   : > { %2297 = vadd.xlane.f32.xlu1 %v2296_v36 }
 0x613   : > { %2072 = vmax.xlane.f32.xlu0 %v2071_v40 }
 0x614   : > { %2075 = vmax.xlane.f32.xlu1 %v2074_v42 }
 0x617   : > { %2300 = vadd.xlane.f32.xlu0 %v2299_v17 }
 0x618   : > { %2303 = vadd.xlane.f32.xlu1 %v2302_v43 }
 0x61b   : > { %2078 = vmax.xlane.f32.xlu0 %v2077_v28 }
 0x61c   : > { %2081 = vmax.xlane.f32.xlu1 %v2080_v33 }
 0x61f   : > { %2306 = vadd.xlane.f32.xlu0 %v2305_v35 }
 0x620   : > { %2087 = vmax.xlane.f32.xlu1 %v2086_v22 }
 0x623   : > { %2084 = vmax.xlane.f32.xlu0 %v2083_v29 }
 0x627   : > { %2090 = vmax.xlane.f32.xlu0 %v2089_v34 }
 0x634   : > { %v1929_v36 = vpop.xlane.xlu0 %1928 }
 0x635   : > { %v2101_v40 = vsub.f32 %v7311_v44, %v1929_v36  ;;  %v1950_v42 = vpop.xlane.xlu1 %1949 }
 0x636   : > { %v2108_v22 = vsub.f32 %v7315_v46, %v1950_v42 }
 0x637   : > { %v2174_v17 = vmul.f32 1.442695, %v2101_v40 }
 0x638   : > { %v1953_v43 = vpop.xlane.xlu0 %1952  ;;  %v2188_v61 = vmul.f32 1.442695, %v2108_v22 }
 0x639   : > { %6121 = vpow2.f32 %v2174_v17  ;;  %v2109_v28 = vsub.f32 %v7313_v45, %v1953_v43  ;;  %v1932_v33 = vpop.xlane.xlu1 %1931 }
 0x63a   : > { %v2102_v34 = vsub.f32 %v7329_v53, %v1932_v33 }
 0x63b   : > { %v2190_v35 = vmul.f32 1.442695, %v2109_v28 }
 0x63c   : > { %v1926_v21 = vpop.xlane.xlu0 %1925  ;;  %v2176_v45 = vmul.f32 1.442695, %v2102_v34 }
 0x63d   : > { %6123 = vpow2.f32 %v2190_v35  ;;  %v2100_v29 = vsub.f32 %v7319_v48, %v1926_v21  ;;  %v1956_v18 = vpop.xlane.xlu1 %1955 }
 0x63e   : > { %v2110_v46 = vsub.f32 %v7331_v54, %v1956_v18 }
 0x63f   : > { %v2172_v24 = vmul.f32 1.442695, %v2100_v29 }
 0x640   : > { %v1935_v44 = vpop.xlane.xlu0 %1934 }
 0x641   : > { %6125 = vpow2.f32 %v2172_v24  ;;  %v2103_v36 = vsub.f32 %v7325_v51, %v1935_v44  ;;  %v1938_v40 = vpop.xlane.xlu1 %1937  ;;  %v2192_v51 = vmul.f32 1.442695, %v2110_v46 }
 0x642   : > { %6127 = vpow2.f32 %v2188_v61  ;;  %v2104_v28 = vsub.f32 %v7343_v60, %v1938_v40 }
 0x643   : > { %v7585_v17 = vpop.eup %6121  ;;  %v2178_v42 = vmul.f32 1.442695, %v2103_v36 }
 0x644   : > { %v1959_v43 = vpop.xlane.xlu0 %1958  ;;  %v2311_v21 = vsel %vm834_vm1, %v7585_v17, 0.0  ;;  %v2180_v29 = vmul.f32 1.442695, %v2104_v28 }
 0x645   : > { %6129 = vpow2.f32 %v2178_v42  ;;  %v2111_v48 = vsub.f32 %v7327_v52, %v1959_v43  ;;  %v1962_v53 = vpop.xlane.xlu1 %1961  ;;  %2312 = vadd.xlane.f32.xlu0 %v2311_v21 }
 0x646   : > { %6131 = vpow2.f32 %v2176_v45  ;;  %v2112_v52 = vsub.f32 %v7345_v62, %v1962_v53 }
 0x647   : > { %v7591_v24 = vpop.eup %6123  ;;  %v2194_v61 = vmul.f32 1.442695, %v2111_v48 }
 0x648   : > { %v1941_v33 = vpop.xlane.xlu0 %1940  ;;  %v2335_v54 = vsel %vm834_vm1, %v7591_v24, 0.0  ;;  %v2196_v46 = vmul.f32 1.442695, %v2112_v52 }
 0x649   : > { %6133 = vpow2.f32 %v2194_v61  ;;  %v2105_v18 = vsub.f32 %v7337_v57, %v1941_v33  ;;  %v1944_v22 = vpop.xlane.xlu1 %1943  ;;  %2336 = vadd.xlane.f32.xlu0 %v2335_v54 }
 0x64a   : > { %6135 = vpow2.f32 %v2192_v51  ;;  %v2106_v44 = vsub.f32 %v7355_v37, %v1944_v22 }
 0x64b   : > { %v7598_v35 = vpop.eup %6125  ;;  %v2182_v34 = vmul.f32 1.442695, %v2105_v18 }
 0x64c   : > { %v1965_v60 = vpop.xlane.xlu0 %1964  ;;  %v2308_v36 = vsel %vm834_vm1, %v7598_v35, 0.0  ;;  %v7603_v40 = vpop.eup %6127  ;;  %v2184_v43 = vmul.f32 1.442695, %v2106_v44 }
 0x64d   : > { %6137 = vpow2.f32 %v2182_v34  ;;  %v2113_v57 = vsub.f32 %v7339_v58, %v1965_v60  ;;  %v1968_v45 = vpop.xlane.xlu1 %1967  ;;  %2309 = vadd.xlane.f32.xlu1 %v2308_v36  ;;  %v2332_v53 = vsel %vm834_vm1, %v7603_v40, 0.0 }
 0x64e   : > { %v2114_v62 = vsub.f32 %v7357_v39, %v1968_v45  ;;  %6139 = vpow2.f32 %v2180_v29 }
 0x64f   : > { %v7607_v42 = vpop.eup %6129  ;;  %v2198_v21 = vmul.f32 1.442695, %v2113_v57 }
 0x650   : > { %v1947_v37 = vpop.xlane.xlu0 %1946  ;;  %v2317_v48 = vsel %vm834_vm1, %v7607_v42, 0.0  ;;  %v7613_v51 = vpop.eup %6131  ;;  %v2200_v39 = vmul.f32 1.442695, %v2114_v62 }
 0x651   : > { %6141 = vpow2.f32 %v2198_v21  ;;  %v2107_v58 = vsub.f32 %v7351_v2, %v1947_v37  ;;  %v1974_v28 = vpop.xlane.xlu1 %1973  ;;  %2318 = vadd.xlane.f32.xlu0 %v2317_v48  ;;  %2333 = vadd.xlane.f32.xlu1 %v2332_v53  ;;  %v2314_v52 = vsel %vm834_vm1, %v7613_v51, 0.0 }
 0x652   : > { %6143 = vpow2.f32 %v2196_v46  ;;  %v2116_v61 = vsub.f32 %v7367_v8, %v1974_v28 }
 0x653   : > { %v7617_v33 = vpop.eup %6133  ;;  %6145 = vpow2.f32 %v2184_v43  ;;  %v2186_v54 = vmul.f32 1.442695, %v2107_v58 }
 0x654   : > { %v1971_v18 = vpop.xlane.xlu0 %1970  ;;  %v2341_v22 = vsel %vm834_vm1, %v7617_v33, 0.0  ;;  %v7623_v29 = vpop.eup %6135  ;;  %6147 = vpow2.f32 %v2200_v39  ;;  %v2204_v8 = vmul.f32 1.442695, %v2116_v61 }
 0x655   : > { %v2115_v2 = vsub.f32 %v7353_v3, %v1971_v18  ;;  %v1998_v34 = vpop.xlane.xlu1 %1997  ;;  %2342 = vadd.xlane.f32.xlu0 %v2341_v22  ;;  %2315 = vadd.xlane.f32.xlu1 %v2314_v52  ;;  %6149 = vpow2.f32 %v2186_v54  ;;  %v2338_v45 = vsel %vm834_vm1, %v7623_v29, 0.0 }
 0x656   : > { %6151 = vpow2.f32 %v2204_v8 }
 0x657   : > { %v7626_v44 = vpop.eup %6137  ;;  %v2202_v60 = vmul.f32 1.442695, %v2115_v2 }
 0x658   : > { %v1977_v36 = vpop.xlane.xlu0 %1976  ;;  %v2323_v57 = vsel %vm834_vm1, %v7626_v44, 0.0  ;;  %v7632_v46 = vpop.eup %6139 }
 0x659   : > { %v2117_v3 = vsub.f32 %v7363_v6, %v1977_v36  ;;  %v1980_v62 = vpop.xlane.xlu1 %1979  ;;  %2324 = vadd.xlane.f32.xlu0 %v2323_v57  ;;  %2339 = vadd.xlane.f32.xlu1 %v2338_v45  ;;  %6153 = vpow2.f32 %v2202_v60  ;;  %v2320_v6 = vsel %vm834_vm1, %v7632_v46, 0.0 }
 0x65a   : > { %v2118_v43 = vsub.f32 %v7379_v15, %v1980_v62  ;;  %v2124_v15 = vsub.f32 %v7369_v9, %v1998_v34 }
 0x65b   : > { %v7636_v21 = vpop.eup %6141  ;;  %v2206_v37 = vmul.f32 1.442695, %v2117_v3 }
 0x65c   : > { %v7638_v48 = vpop.eup %6143  ;;  %v2208_v53 = vmul.f32 1.442695, %v2118_v43  ;;  %v2001_v58 = vpop.xlane.xlu0 %2000  ;;  %v2347_v28 = vsel %vm834_vm1, %v7636_v21, 0.0  ;;  %v2220_v36 = vmul.f32 1.442695, %v2124_v15 }
 0x65d   : > { %v7644_v39 = vpop.eup %6145  ;;  %v2125_v61 = vsub.f32 %v7365_v7, %v2001_v58  ;;  %v2004_v54 = vpop.xlane.xlu1 %2003  ;;  %2348 = vadd.xlane.f32.xlu0 %v2347_v28  ;;  %2321 = vadd.xlane.f32.xlu1 %v2320_v6  ;;  %6155 = vpow2.f32 %v2206_v37  ;;  %v2344_v2 = vsel %vm834_vm1, %v7638_v48, 0.0 }
 0x65e   : > { %6157 = vpow2.f32 %v2208_v53  ;;  %v7648_v22 = vpop.eup %6147  ;;  %v2326_v8 = vsel %vm834_vm1, %v7644_v39, 0.0 }
 0x65f   : > { %v2222_v18 = vmul.f32 1.442695, %v2125_v61  ;;  %8819 = vst [vmem:[#allocation33_spill] sm:$0xff] %v7648_v22  ;;  %v7654_v60 = vpop.eup %6149  ;;  %v2350_v3 = vsel %vm834_vm1, %v7648_v22, 0.0 }
 0x660   : > { %v1983_v52 = vpop.xlane.xlu0 %1982  ;;  %v7657_v34 = vpop.eup %6151  ;;  %v2329_v45 = vsel %vm1920_vm3, %v7654_v60, 0.0 }
 0x661   : > { %v1986_v7 = vpop.xlane.xlu1 %1985  ;;  %2345 = vadd.xlane.f32.xlu0 %v2344_v2  ;;  %2327 = vadd.xlane.f32.xlu1 %v2326_v8  ;;  %6159 = vpow2.f32 %v2222_v18  ;;  %v2119_v9 = vsub.f32 %v7375_v13, %v1983_v52  ;;  %8820 = vst [vmem:[#allocation34_spill] sm:$0xff] %v7657_v34  ;;  %v2356_v6 = vsel %vm834_vm1, %v7657_v34, 0.0  ;;  %v8824_v18 = vld [vmem:[#allocation16_spill] sm:$0xff] }
 0x662   : > { %6161 = vpow2.f32 %v2220_v36  ;;  %v2126_v52 = vsub.f32 %v8824_v18, %v2004_v54  ;;  %v8828_v54 = vld [vmem:[#allocation17_spill] sm:$0xff] }
 0x663   : > { %v7663_v62 = vpop.eup %6153  ;;  %v2210_v37 = vmul.f32 1.442695, %v2119_v9 }
 0x664   : > { %v2007_v57 = vpop.xlane.xlu0 %2006  ;;  %8821 = vst [vmem:[#allocation35_spill] sm:$0xff] %v7663_v62  ;;  %v2353_v28 = vsel %vm1920_vm3, %v7663_v62, 0.0 }
 0x665   : > { %v2010_v43 = vpop.xlane.xlu1 %2009  ;;  %2330 = vadd.xlane.f32.xlu0 %v2329_v45  ;;  %2351 = vadd.xlane.f32.xlu1 %v2350_v3  ;;  %v2127_v53 = vsub.f32 %v7377_v14, %v2007_v57  ;;  %6163 = vpow2.f32 %v2210_v37  ;;  %v8826_v57 = vld [vmem:[#allocation18_spill] sm:$0xff] }
 0x667   : > { %v7666_v58 = vpop.eup %6155  ;;  %v2226_v2 = vmul.f32 1.442695, %v2127_v53 }
 0x668   : > { %8822 = vst [vmem:[#allocation36_spill] sm:$0xff] %v7666_v58  ;;  %v1989_v13 = vpop.xlane.xlu0 %1988  ;;  %v7672_v61 = vpop.eup %6157  ;;  %v2359_v8 = vsel %vm834_vm1, %v7666_v58, 0.0 }
 0x669   : > { %8823 = vst [vmem:[#allocation37_spill] sm:$0xff] %v7672_v61  ;;  %v7674_v15 = vpop.xlane.xlu1 %1991  ;;  %2354 = vadd.xlane.f32.xlu0 %v2353_v28  ;;  %2357 = vadd.xlane.f32.xlu1 %v2356_v6  ;;  %v2362_v36 = vsel %vm834_vm1, %v7672_v61, 0.0  ;;  %v2224_v28 = vmul.f32 1.442695, %v2126_v52  ;;  %v8827_v6 = vld [vmem:[#allocation24_spill] sm:$0xff]  ;;  %6165 = vpow2.f32 %v2226_v2  ;;  %v2121_v37 = vsub.f32 %v8828_v54, %v1989_v13 }
 0x66b   : > { %v7681_v9 = vpop.eup %6159 }
 0x66c   : > { %v2013_v14 = vpop.xlane.xlu0 %2012  ;;  %8825 = vst [vmem:[#allocation16_spill] sm:$0xff] %v7681_v9  ;;  %v2383_v58 = vsel %vm834_vm1, %v7681_v9, 0.0  ;;  %v7688_v61 = vpop.eup %6161 }
 0x66d   : > { %v2129_v45 = vsub.f32 %v8826_v57, %v2013_v14  ;;  %v2016_v3 = vpop.xlane.xlu1 %2015  ;;  %2360 = vadd.xlane.f32.xlu0 %v2359_v8  ;;  %2363 = vadd.xlane.f32.xlu1 %v2362_v36  ;;  %v8829_v14 = vld [vmem:[#allocation19_spill] sm:$0xff]  ;;  %v2214_v8 = vmul.f32 1.442695, %v2121_v37  ;;  %v2380_v13 = vsel %vm834_vm1, %v7688_v61, 0.0  ;;  %v8831_v57 = vld [vmem:[#allocation26_spill] sm:$0xff] }
 0x66e   : > { %v2130_v34 = vsub.f32 %v8827_v6, %v2016_v3  ;;  %v2120_v52 = vsub.f32 %v8829_v14, %v1986_v7  ;;  %v8832_v6 = vld [vmem:[#allocation20_spill] sm:$0xff] }
 0x66f   : > { %v2230_v53 = vmul.f32 1.442695, %v2129_v45  ;;  %v2128_v54 = vsub.f32 %v8832_v6, %v2010_v43 }
 0x670   : > { %v2232_v18 = vmul.f32 1.442695, %v2130_v34  ;;  %v1995_v62 = vpop.xlane.xlu0 %1994  ;;  %v7695_v34 = vpop.eup %6163  ;;  %v2212_v3 = vmul.f32 1.442695, %v2120_v52 }
 0x671   : > { %6167 = vpow2.f32 %v2230_v53  ;;  %v7690_v22 = vpop.xlane.xlu1 %2021  ;;  %2384 = vadd.xlane.f32.xlu0 %v2383_v58  ;;  %8830 = vst [vmem:[#allocation18_spill] sm:$0xff] %v7695_v34  ;;  %v2365_v7 = vsel %vm834_vm1, %v7695_v34, 0.0  ;;  %v2228_v14 = vmul.f32 1.442695, %v2128_v54 }
 0x672   : > { %6169 = vpow2.f32 %v2224_v28 }
 0x673   : > { %6171 = vpow2.f32 %v2232_v18  ;;  %v7701_v37 = vpop.eup %6165 }
 0x674   : > { %v2019_v2 = vpop.xlane.xlu0 %2018  ;;  %6173 = vpow2.f32 %v2214_v8  ;;  %8833 = vst [vmem:[#allocation24_spill] sm:$0xff] %v7701_v37  ;;  %v2389_v8 = vsel %vm834_vm1, %v7701_v37, 0.0 }
 0x675   : > { %v2046_v36 = vpop.xlane.xlu1 %2045  ;;  %2381 = vadd.xlane.f32.xlu0 %v2380_v13  ;;  %v8835_v13 = vld [vmem:[#allocation21_spill] sm:$0xff] }
 0x676   : > { %v2140_v45 = vsub.f32 %v8831_v57, %v2046_v36  ;;  %v2123_v36 = vsub.f32 %v8835_v13, %v1995_v62 }
 0x678   : > { %v2252_v58 = vmul.f32 1.442695, %v2140_v45  ;;  %v2025_v28 = vpop.xlane.xlu0 %2024 }
 0x679   : > { %v2028_v53 = vpop.xlane.xlu1 %2027  ;;  %2366 = vadd.xlane.f32.xlu0 %v2365_v7 }
 0x67a   : > { %6175 = vpow2.f32 %v2252_v58  ;;  %v8838_v58 = vld [vmem:[#allocation22_spill] sm:$0xff]  ;;  %v2134_v62 = vsub.f32 %v7427_v11, %v2028_v53 }
 0x67b   : > { %v7703_v18 = vpop.eup %6167  ;;  %6177 = vpow2.f32 %v2212_v3  ;;  %v2131_v7 = vsub.f32 %v8838_v58, %v2019_v2  ;;  %v2218_v3 = vmul.f32 1.442695, %v2123_v36 }
 0x67c   : > { %8834 = vst [vmem:[#allocation17_spill] sm:$0xff] %v7703_v18  ;;  %v7706_v52 = vpop.eup %6169  ;;  %v2049_v43 = vpop.xlane.xlu0 %2048  ;;  %v2395_v57 = vsel %vm834_vm1, %v7703_v18, 0.0  ;;  %6179 = vpow2.f32 %v2228_v14  ;;  %v8839_v18 = vld [vmem:[#allocation23_spill] sm:$0xff]  ;;  %v2240_v53 = vmul.f32 1.442695, %v2134_v62 }
 0x67d   : > { %8836 = vst [vmem:[#allocation19_spill] sm:$0xff] %v7706_v52  ;;  %v7712_v45 = vpop.eup %6171  ;;  %v2052_v6 = vpop.xlane.xlu1 %2051  ;;  %2390 = vadd.xlane.f32.xlu0 %v2389_v8  ;;  %2396 = vadd.xlane.f32.xlu1 %v2395_v57  ;;  %v2386_v13 = vsel %vm834_vm1, %v7706_v52, 0.0  ;;  %v2122_v9 = vsub.f32 %v8839_v18, %v7674_v15  ;;  %v2234_v2 = vmul.f32 1.442695, %v2131_v7  ;;  %6181 = vpow2.f32 %v2218_v3 }
 0x67e   : > { %8837 = vst [vmem:[#allocation26_spill] sm:$0xff] %v7712_v45  ;;  %v2398_v37 = vsel %vm834_vm1, %v7712_v45, 0.0  ;;  %v7720_v34 = vpop.eup %6173  ;;  %v2142_v11 = vsub.f32 %v7429_v12, %v2052_v6  ;;  %v2133_v12 = vsub.f32 %v7411_v50, %v2025_v28 }
 0x67f   : > { %v2371_v45 = vsel %vm834_vm1, %v7720_v34, 0.0  ;;  %v2216_v15 = vmul.f32 1.442695, %v2122_v9 }
 0x680   : > { %v2031_v54 = vpop.xlane.xlu0 %2030  ;;  %v2256_v18 = vmul.f32 1.442695, %v2142_v11 }
 0x681   : > { %v2135_v8 = vsub.f32 %v7423_v4, %v2031_v54  ;;  %v7725_v57 = vpop.xlane.xlu1 %2033  ;;  %2387 = vadd.xlane.f32.xlu0 %v2386_v13  ;;  %2399 = vadd.xlane.f32.xlu1 %v2398_v37  ;;  %v2141_v54 = vsub.f32 %v7413_v55, %v2049_v43 }
 0x683   : > { %v2242_v14 = vmul.f32 1.442695, %v2135_v8 }
 0x684   : > { %v7728_v36 = vpop.eup %6175  ;;  %v2055_v58 = vpop.xlane.xlu0 %2054 }
 0x685   : > { %v7732_v52 = vpop.eup %6177  ;;  %6183 = vpow2.f32 %v2242_v14  ;;  %v2058_v4 = vpop.xlane.xlu1 %2057  ;;  %2372 = vadd.xlane.f32.xlu0 %v2371_v45  ;;  %v2428_v37 = vsel %vm834_vm1, %v7728_v36, 0.0  ;;  %v2238_v45 = vmul.f32 1.442695, %v2133_v12 }
 0x686   : > { %6185 = vpow2.f32 %v2234_v2  ;;  %2429 = vadd.xlane.f32.xlu1 %v2428_v37  ;;  %v2144_v6 = vsub.f32 %v7441_v49, %v2058_v4  ;;  %v2368_v3 = vsel %vm834_vm1, %v7732_v52, 0.0  ;;  %v7740_v62 = vpop.eup %6179  ;;  %v8840_v2 = vld [vmem:[#allocation25_spill] sm:$0xff] }
 0x687   : > { %6187 = vpow2.f32 %v2240_v53  ;;  %v2392_v49 = vsel %vm834_vm1, %v7740_v62, 0.0  ;;  %v7747_v28 = vpop.eup %6181  ;;  %v2132_v11 = vsub.f32 %v8840_v2, %v7690_v22  ;;  %v2254_v53 = vmul.f32 1.442695, %v2141_v54 }
 0x688   : > { %v2037_v7 = vpop.xlane.xlu0 %2036  ;;  %6189 = vpow2.f32 %v2216_v15  ;;  %v2260_v13 = vmul.f32 1.442695, %v2144_v6  ;;  %v2377_v37 = vsel %vm1920_vm3, %v7747_v28, 0.0 }
 0x689   : > { %v2286_v9 = vpop.xlane.xlu1 %2285  ;;  %2369 = vadd.xlane.f32.xlu0 %v2368_v3  ;;  %6191 = vpow2.f32 %v2256_v18  ;;  %v2143_v3 = vsub.f32 %v7425_v5, %v2055_v58 }
 0x68a   : > { %6193 = vrcp.f32 %v2286_v9 }
 0x68b   : > { %6195 = vpow2.f32 %v2238_v45  ;;  %v2258_v58 = vmul.f32 1.442695, %v2143_v3 }
 0x68c   : > { %v7743_v50 = vpop.xlane.xlu0 %2060  ;;  %6197 = vpow2.f32 %v2260_v13 }
 0x68d   : > { %v2040_v8 = vpop.xlane.xlu1 %2039  ;;  %2393 = vadd.xlane.f32.xlu0 %v2392_v49  ;;  %6199 = vpow2.f32 %v2254_v53 }
 0x68e   : > { %v2138_v14 = vsub.f32 %v7451_v0, %v2040_v8  ;;  %v2236_v0 = vmul.f32 1.442695, %v2132_v11  ;;  %v2137_v8 = vsub.f32 %v7435_v31, %v2037_v7 }
 0x68f   : > { %v7752_v55 = vpop.eup %6183 }
 0x690   : > { %v7754_v43 = vpop.eup %6185  ;;  %v2248_v15 = vmul.f32 1.442695, %v2138_v14  ;;  %v2289_v4 = vpop.xlane.xlu0 %2288  ;;  %v2413_v12 = vsel %vm834_vm1, %v7752_v55, 0.0 }
 0x691   : > { %v7760_v18 = vpop.eup %6187  ;;  %v7762_v22 = vpop.xlane.xlu1 %2063  ;;  %2378 = vadd.xlane.f32.xlu0 %v2377_v37  ;;  %2414 = vadd.xlane.f32.xlu1 %v2413_v12  ;;  %6201 = vrcp.f32 %v2289_v4  ;;  %v2401_v54 = vsel %vm1920_vm3, %v7754_v43, 0.0  ;;  %v8841_v37 = vld [vmem:[#allocation29_spill] sm:$0xff] }
 0x692   : > { %v7764_v6 = vpop.eup %6189  ;;  %6203 = vpow2.f32 %v2248_v15  ;;  %v2410_v13 = vsel %vm834_vm1, %v7760_v18, 0.0  ;;  %v2246_v15 = vmul.f32 1.442695, %v2137_v8  ;;  %v5945_v12 = vunpack.i.h.bf16 %v8841_v37 }
 0x693   : > { %v7767_v9 = vpop.eup %6191  ;;  %6205 = vpow2.f32 %v2236_v0  ;;  %v2374_v14 = vsel %vm834_vm1, %v7764_v6, 0.0  ;;  %v2145_v0 = vsub.f32 %v7437_v32, %v7743_v50 }
 0x694   : > { %v7769_v45 = vpop.xlane.xlu0 %2042  ;;  %v6194_v49 = vpop.eup %6193  ;;  %v2434_v31 = vsel %vm834_vm1, %v7767_v9, 0.0 }
 0x695   : > { %v2292_v2 = vpop.xlane.xlu1 %2291  ;;  %2402 = vadd.xlane.f32.xlu0 %v2401_v54  ;;  %2411 = vadd.xlane.f32.xlu1 %v2410_v13  ;;  %v2540_v5 = vmul.f32 %v6194_v49, %v7514_v26  ;;  %v7777_v11 = vpop.eup %6195  ;;  %v5944_v54 = vunpack.i.l.bf16 %v8841_v37  ;;  %v8842_v37 = vld [vmem:[#allocation14_spill] sm:$0xff] }
 0x696   : > { %6207 = vrcp.f32 %v2292_v2  ;;  %v7786_v7 = vpop.eup %6197  ;;  %v2407_v8 = vsel %vm834_vm1, %v7777_v11, 0.0 }
 0x697   : > { %5360 = vmatprep.mubr.msk.f32.mxu0 %vm834_vm1, %v2540_v5  ;;  %6209 = vpow2.f32 %v2258_v58  ;;  %v7792_v3 = vpop.eup %6199  ;;  %v2440_v2 = vsel %vm834_vm1, %v7786_v7, 0.0 }
 0x698   : > { %v7780_v53 = vpop.xlane.xlu0 %2066  ;;  %6211 = vpow2.f32 %v2246_v15 }
 0x699   : > { %v2070_v4 = vpop.xlane.xlu1 %2069  ;;  %2375 = vadd.xlane.f32.xlu0 %v2374_v14  ;;  %2435 = vadd.xlane.f32.xlu1 %v2434_v31  ;;  %v2262_v14 = vmul.f32 1.442695, %v2145_v0 }
 0x69a   : > { %v2148_v26 = vsub.f32 %v7461_v16, %v2070_v4  ;;  %v2136_v16 = vsub.f32 %v7439_v47, %v7725_v57  ;;  %v7807_v4 = vpack.c.bf16 %v5945_v12, %v5944_v54  ;;  %v2431_v47 = vsel %vm834_vm1, %v7792_v3, 0.0 }
 0x69b   : > { %v6202_v5 = vpop.eup %6201  ;;  %v2139_v54 = vsub.f32 %v7447_v23, %v7769_v45 }
 0x69c   : > { %v2268_v13 = vmul.f32 1.442695, %v2148_v26  ;;  %v2295_v49 = vpop.xlane.xlu0 %2294  ;;  %v7801_v32 = vpop.eup %6203  ;;  %v2541_v50 = vmul.f32 %v6202_v5, %v7526_v27  ;;  %v2244_v15 = vmul.f32 1.442695, %v2136_v16 }
 0x69d   : > { %v2298_v58 = vpop.xlane.xlu1 %2297  ;;  %2408 = vadd.xlane.f32.xlu0 %v2407_v8  ;;  %2441 = vadd.xlane.f32.xlu1 %v2440_v2  ;;  %v7804_v31 = vpop.eup %6205  ;;  %v2422_v27 = vsel %vm834_vm1, %v7801_v32, 0.0 }
 0x69e   : > { %6213 = vpow2.f32 %v2268_v13  ;;  %5361 = vmatmul.mubr.msk.f32.vlgmr.msra.gmra.mrb[28].mxu0 %vm834_vm1, %v2541_v50  ;;  %v2404_v2 = vsel %vm834_vm1, %v7804_v31, 0.0 }
 0x69f   : > { %6215 = vrcp.f32 %v2295_v49  ;;  %5690 = vmatpush3.bf16.msra.mxu0 %v8842_v37 }
 0x6a0   : > { %6217 = vrcp.f32 %v2298_v58  ;;  %v2073_v26 = vpop.xlane.xlu0 %2072  ;;  %v6208_v57 = vpop.eup %6207  ;;  %5696 = vmatprep.subr.bf16.mxu0 %v7807_v4  ;;  %v2250_v58 = vmul.f32 1.442695, %v2139_v54 }
 0x6a1   : > { %v2076_v8 = vpop.xlane.xlu1 %2075  ;;  %2432 = vadd.xlane.f32.xlu0 %v2431_v47  ;;  %2423 = vadd.xlane.f32.xlu1 %v2422_v27  ;;  %v2542_v12 = vmul.f32 %v6208_v57, %v7534_v59  ;;  %6219 = vpow2.f32 %v2262_v14  ;;  %v7822_v5 = vpop.eup %6209 }
 0x6a2   : > { %v2150_v0 = vsub.f32 %v7469_v1, %v2076_v8  ;;  %6221 = vpow2.f32 %v2244_v15  ;;  %v2149_v1 = vsub.f32 %v7459_v20, %v2073_v26  ;;  %v7825_v59 = vpop.eup %6211  ;;  %v2437_v50 = vsel %vm834_vm1, %v7822_v5, 0.0 }
 0x6a3   : > { %5363 = vmatprep.mubr.msk.f32.mxu0 %vm834_vm1, %v2542_v12  ;;  %v2419_v27 = vsel %vm834_vm1, %v7825_v59, 0.0 }
 0x6a4   : > { %v2272_v13 = vmul.f32 1.442695, %v2150_v0  ;;  %v2301_v49 = vpop.xlane.xlu0 %2300  ;;  %v2270_v15 = vmul.f32 1.442695, %v2149_v1 }
 0x6a5   : > { %v2304_v16 = vpop.xlane.xlu1 %2303  ;;  %2405 = vadd.xlane.f32.xlu0 %v2404_v2 }
 0x6a6   : > { %6223 = vpow2.f32 %v2272_v13 }
 0x6a7   : > { %6225 = vrcp.f32 %v2301_v49 }
 0x6a8   : > { %v7827_v23 = vpop.eup %6213  ;;  %6227 = vrcp.f32 %v2304_v16  ;;  %v2079_v45 = vpop.xlane.xlu0 %2078 }
 0x6a9   : > { %v6216_v14 = vpop.eup %6215  ;;  %2438 = vadd.xlane.f32.xlu0 %v2437_v50  ;;  %v2452_v47 = vsel %vm834_vm1, %v7827_v23, 0.0  ;;  %6229 = vpow2.f32 %v2250_v58  ;;  %v2151_v26 = vsub.f32 %v7467_v63, %v2079_v45 }
 0x6aa   : > { %v6218_v57 = vpop.eup %6217  ;;  %v2543_v20 = vmul.f32 %v6216_v14, %v7545_v25  ;;  %2453 = vadd.xlane.f32.xlu1 %v2452_v47  ;;  %6231 = vpow2.f32 %v2270_v15  ;;  %v8843_v15 = vld [vmem:[#allocation13_spill] sm:$0xff] }
 0x6ab   : > { %v2544_v37 = vmul.f32 %v6218_v57, %v7547_v56  ;;  %v7839_v0 = vpop.eup %6219  ;;  %v2274_v25 = vmul.f32 1.442695, %v2151_v26  ;;  %v2082_v26 = vpop.xlane.xlu1 %2081 }
 0x6ac   : > { %5364 = vmatmul.mubr.msk.f32.gmra.mrb[30].mxu0 %vm834_vm1, %v2543_v20  ;;  %v2307_v8 = vpop.xlane.xlu0 %2306  ;;  %v7842_v12 = vpop.eup %6221  ;;  %v2443_v63 = vsel %vm834_vm1, %v7839_v0, 0.0 }
 0x6ad   : > { %5366 = vmatprep.mubr.msk.f32.mxu0 %vm834_vm1, %v2544_v37  ;;  %2420 = vadd.xlane.f32.xlu0 %v2419_v27  ;;  %6233 = vrcp.f32 %v2307_v8  ;;  %v2416_v1 = vsel %vm834_vm1, %v7842_v12, 0.0  ;;  %v2146_v27 = vsub.f32 %v7453_v10, %v7762_v22  ;;  %v8846_v10 = vld [vmem:[#allocation27_spill] sm:$0xff] }
 0x6ae   : > { %6235 = vpow2.f32 %v2274_v25  ;;  %v2147_v22 = vsub.f32 %v8846_v10, %v7780_v53  ;;  %v8849_v10 = vld [vmem:[#allocation15_spill] sm:$0xff] }
 0x6b0   : > { %v7844_v54 = vpop.eup %6223  ;;  %v2085_v20 = vpop.xlane.xlu0 %2084 }
 0x6b1   : > { %v6226_v56 = vpop.eup %6225  ;;  %2444 = vadd.xlane.f32.xlu0 %v2443_v63  ;;  %v2458_v13 = vsel %vm834_vm1, %v7844_v54, 0.0  ;;  %v2088_v63 = vpop.xlane.xlu1 %2087 }
 0x6b2   : > { %v6228_v49 = vpop.eup %6227  ;;  %v2545_v2 = vmul.f32 %v6226_v56, %v7557_v38  ;;  %2459 = vadd.xlane.f32.xlu1 %v2458_v13  ;;  %v2264_v56 = vmul.f32 1.442695, %v2146_v27  ;;  %v8844_v13 = vld [vmem:[#allocation31_spill] sm:$0xff]  ;;  %v8847_v27 = vld [vmem:[#allocation32_spill] sm:$0xff] }
 0x6b3   : > { %v2546_v16 = vmul.f32 %v6228_v49, %v7559_v30  ;;  %v7855_v58 = vpop.eup %6229  ;;  %v2154_v49 = vsub.f32 %v8844_v13, %v2088_v63  ;;  %v8848_v63 = vld [vmem:[#allocation30_spill] sm:$0xff]  ;;  %v2266_v13 = vmul.f32 1.442695, %v2147_v22 }
 0x6b4   : > { %5367 = vmatmul.mubr.msk.f32.gmra.mrb[32].mxu0 %vm834_vm1, %v2545_v2  ;;  %v7858_v45 = vpop.eup %6231  ;;  %v2425_v50 = vsel %vm1920_vm3, %v7855_v58, 0.0  ;;  %v2091_v37 = vpop.xlane.xlu0 %2090 }
 0x6b5   : > { %5369 = vmatprep.mubr.msk.f32.mxu0 %vm834_vm1, %v2546_v16  ;;  %2417 = vadd.xlane.f32.xlu0 %v2416_v1  ;;  %v2455_v30 = vsel %vm834_vm1, %v7858_v45, 0.0  ;;  %v2280_v1 = vmul.f32 1.442695, %v2154_v49 }
 0x6b7   : > { %v6234_v38 = vpop.eup %6233 }
 0x6b8   : > { %v2547_v14 = vmul.f32 %v6234_v38, %v7569_v41  ;;  %v7866_v47 = vpop.eup %6235  ;;  %v2152_v41 = vsub.f32 %v7477_v19, %v2082_v26  ;;  %v8845_v19 = vld [vmem:[#allocation28_spill] sm:$0xff] }
 0x6b9   : > { %2426 = vadd.xlane.f32.xlu0 %v2425_v50  ;;  %v2461_v57 = vsel %vm834_vm1, %v7866_v47, 0.0  ;;  %v2153_v50 = vsub.f32 %v8845_v19, %v2085_v20  ;;  %v5949_v20 = vunpack.i.l.bf16 %v8847_v27 }
 0x6ba   : > { %5370 = vmatmul.mubr.msk.f32.gmra.mrb[34].mxu0 %vm834_vm1, %v2547_v14  ;;  %v2276_v25 = vmul.f32 1.442695, %v2152_v41 }
 0x6bc   : > { %6237 = vpow2.f32 %v2276_v25  ;;  %v5950_v25 = vunpack.i.h.bf16 %v8847_v27 }
 0x6bd   : > { %2456 = vadd.xlane.f32.xlu0 %v2455_v30  ;;  %v2278_v30 = vmul.f32 1.442695, %v2153_v50 }
 0x6c1   : > { %2462 = vadd.xlane.f32.xlu0 %v2461_v57 }
 0x6c3   : > { %5952 = vrot.lane.b32.xlu1 %v8843_v15, %s8782_s11 }
 0x6c6   : > { %v7881_v26 = vpop.eup %6237 }
 0x6c7   : > { %v2464_v53 = vsel %vm834_vm1, %v7881_v26, 0.0 }
 0x6d2   : > { %v2313_v8 = vpop.xlane.xlu0 %2312 }
 0x6d3   : > { %6239 = vrcp.f32 %v2313_v8 }
 0x6d6   : > { %v2337_v2 = vpop.xlane.xlu0 %2336 }
 0x6d7   : > { %5957 = vrot.lane.b32.xlu0 %v8843_v15, %s8783_s20 }
 0x6da   : > { %v2310_v16 = vpop.xlane.xlu1 %2309 }
 0x6db   : > { %6241 = vrcp.f32 %v2310_v16 }
 0x6dc   : > { %6243 = vpow2.f32 %v2264_v56  ;;  %v2155_v56 = vsub.f32 %v8848_v63, %v2091_v37 }
 0x6dd   : > { %6245 = vrcp.f32 %v2337_v2  ;;  %v6240_v41 = vpop.eup %6239 }
 0x6de   : > { %v2319_v38 = vpop.xlane.xlu0 %2318  ;;  %v2334_v14 = vpop.xlane.xlu1 %2333  ;;  %v2549_v19 = vmul.f32 %v6240_v41, %v7585_v17  ;;  %v2282_v37 = vmul.f32 1.442695, %v2155_v56 }
 0x6df   : > { %6247 = vrcp.f32 %v2334_v14 }
 0x6e0   : > { %6249 = vpow2.f32 %v2280_v1 }
 0x6e1   : > { %6251 = vrcp.f32 %v2319_v38  ;;  %v7894_v38 = vpack.c.bf16 %v5950_v25, %v5949_v20 }
 0x6e2   : > { %v2343_v57 = vpop.xlane.xlu0 %2342  ;;  %v2316_v15 = vpop.xlane.xlu1 %2315 }
 0x6e3   : > { %6253 = vrcp.f32 %v2316_v15 }
 0x6e4   : > { %6255 = vpow2.f32 %v2278_v30 }
 0x6e5   : > { %v6242_v8 = vpop.eup %6241  ;;  %6257 = vrcp.f32 %v2343_v57 }
 0x6e6   : > { %v2325_v49 = vpop.xlane.xlu0 %2324  ;;  %v2340_v2 = vpop.xlane.xlu1 %2339  ;;  %v2548_v16 = vmul.f32 %v6242_v8, %v7598_v35 }
 0x6e7   : > { %v7889_v1 = vpop.eup %6243  ;;  %2465 = vadd.xlane.f32.xlu1 %v2464_v53  ;;  %6259 = vrcp.f32 %v2340_v2 }
 0x6e8   : > { %5376 = vmatprep.mubr.msk.f32.mxu1 %vm834_vm1, %v2548_v16  ;;  %v6246_v50 = vpop.eup %6245  ;;  %6261 = vpow2.f32 %v2266_v13  ;;  %v2446_v17 = vsel %vm834_vm1, %v7889_v1, 0.0 }
 0x6e9   : > { %5377 = vmatmul.mubr.msk.f32.vlgmr.msra.gmra.mrb[46].mxu1 %vm834_vm1, %v2549_v19  ;;  %v6248_v14 = vpop.eup %6247  ;;  %6263 = vrcp.f32 %v2325_v49  ;;  %v2557_v15 = vmul.f32 %v6246_v50, %v7591_v24 }
 0x6ea   : > { %5694 = vmatpush3.bf16.msra.mxu1 %v8849_v10  ;;  %v2349_v35 = vpop.xlane.xlu0 %2348  ;;  %v2322_v22 = vpop.xlane.xlu1 %2321  ;;  %v2556_v57 = vmul.f32 %v6248_v14, %v7603_v40 }
 0x6eb   : > { %v7899_v30 = vpop.eup %6249  ;;  %5700 = vmatprep.subr.bf16.mxu1 %v7894_v38  ;;  %2447 = vadd.xlane.f32.xlu1 %v2446_v17  ;;  %6265 = vrcp.f32 %v2322_v22 }
 0x6ec   : > { %v6252_v41 = vpop.eup %6251  ;;  %6267 = vpow2.f32 %v2282_v37  ;;  %5392 = vmatprep.mubr.msk.f32.mxu0 %vm834_vm1, %v2556_v57  ;;  %v2470_v20 = vsel %vm834_vm1, %v7899_v30, 0.0 }
 0x6ed   : > { %v6254_v8 = vpop.eup %6253  ;;  %6269 = vrcp.f32 %v2349_v35  ;;  %5393 = vmatmul.mubr.msk.f32.vlgmr.msra.gmra.mrb[36].mxu0 %vm834_vm1, %v2557_v15  ;;  %v2551_v63 = vmul.f32 %v6252_v41, %v7607_v42 }
 0x6ee   : > { %v2346_v27 = vpop.xlane.xlu0 %2345  ;;  %v2328_v25 = vpop.xlane.xlu1 %2327  ;;  %5698 = vmatpush3.bf16.msra.mxu0 %v7807_v4  ;;  %v2550_v24 = vmul.f32 %v6254_v8, %v7613_v51 }
 0x6ef   : > { %6271 = vrcp.f32 %v2346_v27  ;;  %2471 = vadd.xlane.f32.xlu1 %v2470_v20  ;;  %v7910_v40 = vpop.eup %6255 }
 0x6f0   : > { %6273 = vrcp.f32 %v2328_v25  ;;  %v6258_v56 = vpop.eup %6257  ;;  %5379 = vmatprep.mubr.msk.f32.mxu1 %vm834_vm1, %v2550_v24  ;;  %v2467_v42 = vsel %vm834_vm1, %v7910_v40, 0.0  ;;  %v8850_v24 = vld [vmem:[#allocation33_spill] sm:$0xff] }
 0x6f1   : > { %v6260_v13 = vpop.eup %6259  ;;  %5380 = vmatmul.mubr.msk.f32.gmra.mrb[48].mxu1 %vm834_vm1, %v2551_v63  ;;  %v2559_v51 = vmul.f32 %v6258_v56, %v7617_v33 }
 0x6f2   : > { %v2331_v49 = vpop.xlane.xlu0 %2330  ;;  %v2352_v2 = vpop.xlane.xlu1 %2351  ;;  %v2558_v4 = vmul.f32 %v6260_v13, %v7623_v29  ;;  %v8851_v13 = vld [vmem:[#allocation35_spill] sm:$0xff] }
 0x6f3   : > { %6275 = vrcp.f32 %v2331_v49  ;;  %v7916_v53 = vpop.eup %6261 }
 0x6f4   : > { %6277 = vrcp.f32 %v2352_v2  ;;  %v6264_v16 = vpop.eup %6263  ;;  %5395 = vmatprep.mubr.msk.f32.mxu0 %vm834_vm1, %v2558_v4  ;;  %v2449_v22 = vsel %vm1920_vm3, %v7916_v53, 0.0  ;;  %v8852_v2 = vld [vmem:[#allocation34_spill] sm:$0xff] }
 0x6f5   : > { %v6266_v19 = vpop.eup %6265  ;;  %5396 = vmatmul.mubr.msk.f32.gmra.mrb[38].mxu0 %vm834_vm1, %v2559_v51  ;;  %v2553_v33 = vmul.f32 %v6264_v16, %v7626_v44  ;;  %v8853_v16 = vld [vmem:[#allocation36_spill] sm:$0xff] }
 0x6f6   : > { %2468 = vadd.xlane.f32.xlu0 %v2467_v42  ;;  %v2355_v50 = vpop.xlane.xlu0 %2354  ;;  %v2358_v37 = vpop.xlane.xlu1 %2357  ;;  %v2552_v29 = vmul.f32 %v6266_v19, %v7632_v46 }
 0x6f7   : > { %v7923_v14 = vpop.eup %6267  ;;  %6279 = vrcp.f32 %v2355_v50  ;;  %v8854_v50 = vld [vmem:[#allocation37_spill] sm:$0xff] }
 0x6f8   : > { %v6270_v10 = vpop.eup %6269  ;;  %6281 = vrcp.f32 %v2358_v37  ;;  %5382 = vmatprep.mubr.msk.f32.mxu1 %vm834_vm1, %v2552_v29  ;;  %v2473_v27 = vsel %vm1920_vm3, %v7923_v14, 0.0 }
 0x6f9   : > { %v6272_v35 = vpop.eup %6271  ;;  %5383 = vmatmul.mubr.msk.f32.gmra.mrb[50].mxu1 %vm834_vm1, %v2553_v33  ;;  %v2561_v8 = vmul.f32 %v6270_v10, %v7636_v21 }
 0x6fa   : > { %v6274_v17 = vpop.eup %6273  ;;  %2450 = vadd.xlane.f32.xlu0 %v2449_v22  ;;  %v2361_v57 = vpop.xlane.xlu0 %2360  ;;  %v2560_v41 = vmul.f32 %v6272_v35, %v7638_v48 }
 0x6fb   : > { %v2364_v15 = vpop.xlane.xlu1 %2363  ;;  %6283 = vrcp.f32 %v2361_v57  ;;  %v2554_v46 = vmul.f32 %v6274_v17, %v7644_v39  ;;  %v8855_v17 = vld [vmem:[#allocation16_spill] sm:$0xff] }
 0x6fc   : > { %6285 = vrcp.f32 %v2364_v15  ;;  %5398 = vmatprep.mubr.msk.f32.mxu0 %vm834_vm1, %v2560_v41 }
 0x6fd   : > { %v6276_v44 = vpop.eup %6275  ;;  %5385 = vmatprep.mubr.msk.f32.mxu1 %vm834_vm1, %v2554_v46  ;;  %5399 = vmatmul.mubr.msk.f32.gmra.mrb[40].mxu0 %vm834_vm1, %v2561_v8 }
 0x6fe   : > { %v6278_v25 = vpop.eup %6277  ;;  %2474 = vadd.xlane.f32.xlu0 %v2473_v27  ;;  %v2385_v20 = vpop.xlane.xlu0 %2384  ;;  %v2555_v48 = vmul.f32 %v6276_v44, %v7654_v60 }
 0x6ff   : > { %v2562_v39 = vmul.f32 %v6278_v25, %v8850_v24  ;;  %6287 = vrcp.f32 %v2385_v20 }
 0x700   : > { %5386 = vmatmul.mubr.msk.f32.gmra.mrb[52].mxu1 %vm834_vm1, %v2555_v48  ;;  %v8857_v48 = vld [vmem:[#allocation19_spill] sm:$0xff] }
 0x701   : > { %v6280_v21 = vpop.eup %6279  ;;  %5401 = vmatprep.mubr.msk.f32.mxu0 %vm834_vm1, %v2562_v39 }
 0x702   : > { %v6282_v63 = vpop.eup %6281  ;;  %v2382_v56 = vpop.xlane.xlu0 %2381  ;;  %v2563_v49 = vmul.f32 %v6280_v21, %v8851_v13  ;;  %v8858_v21 = vld [vmem:[#allocation24_spill] sm:$0xff] }
 0x703   : > { %6289 = vrcp.f32 %v2382_v56  ;;  %v2564_v4 = vmul.f32 %v6282_v63, %v8852_v2 }
 0x704   : > { %5402 = vmatmul.mubr.msk.f32.gmra.mrb[42].mxu0 %vm834_vm1, %v2563_v49 }
 0x705   : > { %v6284_v51 = vpop.eup %6283  ;;  %5408 = vmatprep.mubr.msk.f32.mxu1 %vm834_vm1, %v2564_v4 }
 0x706   : > { %v6286_v60 = vpop.eup %6285  ;;  %v2565_v42 = vmul.f32 %v6284_v51, %v8853_v16  ;;  %v2367_v19 = vpop.xlane.xlu0 %2366 }
 0x707   : > { %6291 = vrcp.f32 %v2367_v19  ;;  %v2566_v37 = vmul.f32 %v6286_v60, %v8854_v50 }
 0x708   : > { %5409 = vmatmul.mubr.msk.f32.vlgmr.msra.gmra.mrb[54].mxu1 %vm834_vm1, %v2565_v42 }
 0x709   : > { %5702 = vmatpush3.bf16.msra.mxu1 %v7894_v38  ;;  %5411 = vmatprep.mubr.msk.f32.mxu1 %vm834_vm1, %v2566_v37  ;;  %v6288_v10 = vpop.eup %6287  ;;  %v8856_v38 = vld [vmem:[#allocation18_spill] sm:$0xff] }
 0x70a   : > { %v2391_v29 = vpop.xlane.xlu0 %2390  ;;  %v2573_v57 = vmul.f32 %v6288_v10, %v8855_v17  ;;  %v2397_v15 = vpop.xlane.xlu1 %2396  ;;  %v8859_v10 = vld [vmem:[#allocation17_spill] sm:$0xff] }
 0x70b   : > { %6293 = vrcp.f32 %v2391_v29 }
 0x70d   : > { %v6290_v33 = vpop.eup %6289 }
 0x70e   : > { %v2388_v35 = vpop.xlane.xlu0 %2387  ;;  %v2572_v22 = vmul.f32 %v6290_v33, %v7688_v61  ;;  %v2400_v44 = vpop.xlane.xlu1 %2399 }
 0x70f   : > { %6295 = vrcp.f32 %v2388_v35 }
 0x710   : > { %5424 = vmatprep.mubr.msk.f32.mxu0 %vm834_vm1, %v2572_v22 }
 0x711   : > { %v6292_v41 = vpop.eup %6291  ;;  %5425 = vmatmul.mubr.msk.f32.vlgmr.msra.gmra.mrb[44].mxu0 %vm834_vm1, %v2573_v57 }
 0x712   : > { %v2373_v46 = vpop.xlane.xlu0 %2372  ;;  %v2567_v8 = vmul.f32 %v6292_v41, %v8856_v38 }
 0x713   : > { %6297 = vrcp.f32 %v2373_v46  ;;  %v2430_v39 = vpop.xlane.xlu1 %2429 }
 0x714   : > { %5412 = vmatmul.mubr.msk.f32.gmra.mrb[56].mxu1 %vm834_vm1, %v2567_v8 }
 0x715   : > { %v6294_v25 = vpop.eup %6293 }
 0x716   : > { %v2370_v27 = vpop.xlane.xlu0 %2369  ;;  %v2575_v63 = vmul.f32 %v6294_v25, %v8858_v21 }
 0x717   : > { %6299 = vrcp.f32 %v2370_v27 }
 0x718   : > { %6301 = vrcp.f32 %v2397_v15 }
 0x719   : > { %v6296_v61 = vpop.eup %6295  ;;  %6303 = vrcp.f32 %v2400_v44 }
 0x71a   : > { %v2394_v20 = vpop.xlane.xlu0 %2393  ;;  %v2574_v24 = vmul.f32 %v6296_v61, %v8857_v48 }
 0x71b   : > { %6305 = vrcp.f32 %v2394_v20 }
 0x71c   : > { %5427 = vmatprep.mubr.msk.f32.mxu0 %vm834_vm1, %v2574_v24  ;;  %6307 = vrcp.f32 %v2430_v39 }
 0x71d   : > { %5428 = vmatmul.mubr.msk.f32.gmra.mrb[46].mxu0 %vm834_vm1, %v2575_v63  ;;  %v6298_v49 = vpop.eup %6297 }
 0x71e   : > { %v2379_v56 = vpop.xlane.xlu0 %2378  ;;  %v2415_v13 = vpop.xlane.xlu1 %2414  ;;  %v2569_v16 = vmul.f32 %v6298_v49, %v7720_v34 }
 0x721   : > { %v6300_v2 = vpop.eup %6299 }
 0x722   : > { %v2403_v4 = vpop.xlane.xlu0 %2402  ;;  %v2568_v51 = vmul.f32 %v6300_v2, %v7732_v52  ;;  %v6302_v60 = vpop.eup %6301  ;;  %v8860_v52 = vld [vmem:[#allocation26_spill] sm:$0xff] }
 0x723   : > { %6309 = vrcp.f32 %v2403_v4  ;;  %v6304_v42 = vpop.eup %6303  ;;  %v2412_v50 = vpop.xlane.xlu1 %2411  ;;  %v2577_v33 = vmul.f32 %v6302_v60, %v8859_v10 }
 0x724   : > { %5414 = vmatprep.mubr.msk.f32.mxu1 %vm834_vm1, %v2568_v51  ;;  %6311 = vrcp.f32 %v2379_v56  ;;  %v2578_v35 = vmul.f32 %v6304_v42, %v8860_v52 }
 0x725   : > { %v6306_v19 = vpop.eup %6305  ;;  %5415 = vmatmul.mubr.msk.f32.gmra.mrb[58].mxu1 %vm834_vm1, %v2569_v16 }
 0x726   : > { %v2376_v37 = vpop.xlane.xlu0 %2375  ;;  %v2576_v29 = vmul.f32 %v6306_v19, %v7740_v62  ;;  %v6308_v17 = vpop.eup %6307 }
 0x727   : > { %6313 = vrcp.f32 %v2376_v37  ;;  %v2436_v22 = vpop.xlane.xlu1 %2435  ;;  %v2588_v62 = vmul.f32 %v6308_v17, %v7728_v36 }
 0x728   : > { %5430 = vmatprep.mubr.msk.f32.mxu0 %vm834_vm1, %v2576_v29  ;;  %6315 = vrcp.f32 %v2412_v50 }
 0x729   : > { %5431 = vmatmul.mubr.msk.f32.gmra.mrb[48].mxu0 %vm834_vm1, %v2577_v33 }
 0x72a   : > { %v2409_v34 = vpop.xlane.xlu0 %2408  ;;  %5433 = vmatprep.mubr.msk.f32.mxu0 %vm834_vm1, %v2578_v35 }
 0x72b   : > { %v2442_v8 = vpop.xlane.xlu1 %2441  ;;  %6317 = vrcp.f32 %v2409_v34 }
 0x72d   : > { %v6310_v57 = vpop.eup %6309 }
 0x72e   : > { %v2433_v15 = vpop.xlane.xlu0 %2432  ;;  %v2579_v41 = vmul.f32 %v6310_v57, %v7754_v43  ;;  %v6312_v46 = vpop.eup %6311 }
 0x72f   : > { %v2571_v25 = vmul.f32 %v6312_v46, %v7747_v28  ;;  %v2424_v43 = vpop.xlane.xlu1 %2423 }
 0x730   : > { %5434 = vmatmul.mubr.msk.f32.gmra.mrb[50].mxu0 %vm834_vm1, %v2579_v41 }
 0x731   : > { %v6314_v38 = vpop.eup %6313  ;;  %5456 = vmatprep.mubr.msk.f32.mxu0 %vm834_vm1, %v2588_v62 }
 0x732   : > { %v2406_v44 = vpop.xlane.xlu0 %2405  ;;  %v2570_v27 = vmul.f32 %v6314_v38, %v7764_v6  ;;  %v6316_v20 = vpop.eup %6315 }
 0x733   : > { %6319 = vrcp.f32 %v2406_v44 }
 0x734   : > { %5417 = vmatprep.mubr.msk.f32.mxu1 %vm834_vm1, %v2570_v27  ;;  %6321 = vrcp.f32 %v2415_v13  ;;  %v2582_v13 = vmul.f32 %v6316_v20, %v7760_v18 }
 0x735   : > { %5418 = vmatmul.mubr.msk.f32.gmra.mrb[60].mxu1 %vm834_vm1, %v2571_v25  ;;  %v6318_v24 = vpop.eup %6317  ;;  %6323 = vrcp.f32 %v2433_v15 }
 0x736   : > { %v2439_v36 = vpop.xlane.xlu0 %2438  ;;  %6325 = vrcp.f32 %v2436_v22  ;;  %v2581_v63 = vmul.f32 %v6318_v24, %v7777_v11 }
 0x737   : > { %v2454_v48 = vpop.xlane.xlu1 %2453  ;;  %6327 = vrcp.f32 %v2442_v8 }
 0x738   : > { %6329 = vrcp.f32 %v2424_v43 }
 0x739   : > { %6331 = vrcp.f32 %v2439_v36 }
 0x73a   : > { %v2421_v61 = vpop.xlane.xlu0 %2420 }
 0x73b   : > { %6333 = vrcp.f32 %v2421_v61 }
 0x73d   : > { %v6320_v39 = vpop.eup %6319 }
 0x73e   : > { %v2445_v21 = vpop.xlane.xlu0 %2444  ;;  %v2580_v6 = vmul.f32 %v6320_v39, %v7804_v31  ;;  %v6322_v56 = vpop.eup %6321 }
 0x73f   : > { %v2460_v28 = vpop.xlane.xlu1 %2459  ;;  %v2583_v31 = vmul.f32 %v6322_v56, %v7752_v55  ;;  %v6324_v18 = vpop.eup %6323 }
 0x740   : > { %5440 = vmatprep.mubr.msk.f32.mxu1 %vm834_vm1, %v2580_v6  ;;  %v6326_v16 = vpop.eup %6325  ;;  %v2589_v50 = vmul.f32 %v6324_v18, %v7792_v3 }
 0x741   : > { %5441 = vmatmul.mubr.msk.f32.vlgmr.msra.gmra.mrb[62].mxu1 %vm834_vm1, %v2581_v63  ;;  %v6328_v42 = vpop.eup %6327  ;;  %v2590_v55 = vmul.f32 %v6326_v16, %v7767_v9 }
 0x742   : > { %v2418_v49 = vpop.xlane.xlu0 %2417  ;;  %5443 = vmatprep.mubr.msk.f32.mxu1 %vm834_vm1, %v2582_v13  ;;  %v6330_v19 = vpop.eup %6329  ;;  %v2592_v17 = vmul.f32 %v6328_v42, %v7786_v7 }
 0x743   : > { %6335 = vrcp.f32 %v2418_v49  ;;  %v5953_v2 = vpop.permute.xlu1 %5952  ;;  %v6332_v29 = vpop.eup %6331  ;;  %v2586_v9 = vmul.f32 %v6330_v19, %v7801_v32 }
 0x744   : > { %v5955_v11 = vunpack.i.h.bf16 %v5953_v2  ;;  %v5954_v4 = vunpack.i.l.bf16 %v5953_v2  ;;  %6337 = vrcp.f32 %v2445_v21  ;;  %v2591_v34 = vmul.f32 %v6332_v29, %v7822_v5 }
 0x745   : > { %5444 = vmatmul.mubr.msk.f32.gmra.mrb[64].mxu1 %vm834_vm1, %v2583_v31  ;;  %6339 = vrcp.f32 %v2454_v48  ;;  %v6334_v10 = vpop.eup %6333 }
 0x746   : > { %v5703_v51 = vpack.c.bf16 %v5955_v11, %v5954_v4  ;;  %v2427_v60 = vpop.xlane.xlu0 %2426  ;;  %v2585_v3 = vmul.f32 %v6334_v10, %v7825_v59 }
 0x747   : > { %6341 = vrcp.f32 %v2427_v60 }
 0x748   : > { %5704 = vmatprep.subr.bf16.mxu0 %v5703_v51 }
 0x749   : > { %5706 = vmatpush3.bf16.msra.mxu0 %v5703_v51  ;;  %v8861_v51 = vmov 0.0  }
 0x74a   : > { %v2457_v37 = vpop.xlane.xlu0 %2456 }
 0x74b   : > { %6343 = vrcp.f32 %v2457_v37 }
 0x74c   : > { %5457 = vmatmul.mubr.msk.f32.vlgmr.msra.gmra.mrb[52].mxu0 %vm834_vm1, %v2589_v50  ;;  %6345 = vrcp.f32 %v2460_v28 }
 0x74d   : > { %v6336_v33 = vpop.eup %6335  ;;  %5459 = vmatprep.mubr.msk.f32.mxu0 %vm834_vm1, %v2590_v55 }
 0x74e   : > { %v2463_v52 = vpop.xlane.xlu0 %2462  ;;  %v2584_v35 = vmul.f32 %v6336_v33, %v7842_v12  ;;  %v6338_v22 = vpop.eup %6337 }
 0x74f   : > { %v6340_v57 = vpop.eup %6339  ;;  %6347 = vrcp.f32 %v2463_v52  ;;  %v2593_v5 = vmul.f32 %v6338_v22, %v7839_v0 }
 0x750   : > { %5446 = vmatprep.mubr.msk.f32.mxu1 %vm834_vm1, %v2584_v35  ;;  %5460 = vmatmul.mubr.msk.f32.gmra.mrb[54].mxu0 %vm834_vm1, %v2591_v34  ;;  %v2596_v62 = vmul.f32 %v6340_v57, %v7827_v23 }
 0x751   : > { %v6342_v15 = vpop.eup %6341  ;;  %5447 = vmatmul.mubr.msk.f32.gmra.mrb[66].mxu1 %vm834_vm1, %v2585_v3  ;;  %5462 = vmatprep.mubr.msk.f32.mxu0 %vm834_vm1, %v2592_v17 }
 0x752   : > { %v5958_v12 = vpop.permute.xlu0 %5957  ;;  %5449 = vmatprep.mubr.msk.f32.mxu1 %vm834_vm1, %v2586_v9  ;;  %v2587_v7 = vmul.f32 %v6342_v15, %v7855_v58 }
 0x753   : > { %v5960_v59 = vunpack.i.h.bf16 %v5958_v12  ;;  %v5959_v41 = vunpack.i.l.bf16 %v5958_v12 }
 0x754   : > { %5463 = vmatmul.mubr.msk.f32.gmra.mrb[56].mxu0 %vm834_vm1, %v2593_v5 }
 0x755   : > { %v5707_v46 = vpack.c.bf16 %v5960_v59, %v5959_v41  ;;  %5450 = vmatmul.mubr.msk.f32.gmra.mrb[68].mxu1 %vm834_vm1, %v2587_v7  ;;  %v6344_v32 = vpop.eup %6343 }
 0x756   : > { %5472 = vmatprep.mubr.msk.f32.mxu1 %vm834_vm1, %v2596_v62  ;;  %v6346_v38 = vpop.eup %6345  ;;  %v2597_v8 = vmul.f32 %v6344_v32, %v7858_v45 }
 0x757   : > { %5708 = vmatprep.subr.bf16.mxu1 %v5707_v46  ;;  %v2598_v58 = vmul.f32 %v6346_v38, %v7844_v54 }
 0x758   : > { %5710 = vmatpush3.bf16.msra.mxu1 %v5707_v46 }
 0x759   : > { %v6348_v0 = vpop.eup %6347 }
 0x75a   : > { %v2599_v23 = vmul.f32 %v6348_v0, %v7866_v47  ;;  %v3921_v0 = vld [vmem:[%s8728_s4] sm:$0xff] }
 0x75b   : > { %5473 = vmatmul.mubr.msk.f32.vlgmr.msra.gmra.mrb[70].mxu1 %vm834_vm1, %v2597_v8 }
 0x75c   : > { %5475 = vmatprep.mubr.msk.f32.mxu1 %vm834_vm1, %v2598_v58  ;;  %v3922_v58 = vld [vmem:[%s8728_s4 + $0x8] sm:$0xff] }
 0x75f   : > { %5476 = vmatmul.mubr.msk.f32.gmra.mrb[72].mxu1 %vm834_vm1, %v2599_v23 }
 0x771   : > { %v8014_v44 = vpop.f32.mrb[28].mxu0 }
 0x772   : > { %v8016_v27 = vpop.f32.mrb[29].mxu0 }
 0x774   : > { %v2466_v25 = vpop.xlane.xlu1 %2465 }
 0x775   : > { %6349 = vrcp.f32 %v2466_v25  ;;  %v5711_v25 = vpack.c.bf16 %v3922_v58, %v3921_v0  ;;  %v3935_v0 = vld [vmem:[%s8728_s4 + $0x70] sm:$0xff]  ;;  %v3936_v58 = vld [vmem:[%s8728_s4 + $0x78] sm:$0xff] }
 0x777   : > { %5712 = vmatprep.subr.bf16.mxu0 %v5711_v25 }
 0x778   : > { %v2448_v36 = vpop.xlane.xlu1 %2447  ;;  %5714 = vmatpush3.bf16.msra.mxu0 %v5711_v25  ;;  %v5739_v25 = vpack.c.bf16 %v3936_v58, %v3935_v0 }
 0x779   : > { %6351 = vrcp.f32 %v2448_v36 }
 0x77c   : > { %v2472_v54 = vpop.xlane.xlu1 %2471 }
 0x77d   : > { %6353 = vrcp.f32 %v2472_v54 }
 0x77f   : > { %v6350_v45 = vpop.eup %6349  ;;  %v8018_v43 = vpop.f32.mrb[30].mxu0 }
 0x780   : > { %v8020_v61 = vpop.f32.mrb[31].mxu0  ;;  %v2600_v20 = vmul.f32 %v6350_v45, %v7881_v26 }
 0x782   : > { %5478 = vmatprep.mubr.msk.f32.mxu1 %vm834_vm1, %v2600_v20 }
 0x783   : > { %v6352_v47 = vpop.eup %6351  ;;  %v2469_v48 = vpop.xlane.xlu0 %2468 }
 0x784   : > { %6355 = vrcp.f32 %v2469_v48  ;;  %v2594_v24 = vmul.f32 %v6352_v47, %v7889_v1 }
 0x786   : > { %5465 = vmatprep.mubr.msk.f32.mxu0 %vm834_vm1, %v2594_v24 }
 0x787   : > { %v8026_v39 = vpop.f32.mrb[32].mxu0  ;;  %v2451_v21 = vpop.xlane.xlu0 %2450 }
 0x788   : > { %v8028_v6 = vpop.f32.mrb[33].mxu0  ;;  %6357 = vrcp.f32 %v2451_v21  ;;  %v6354_v28 = vpop.eup %6353 }
 0x789   : > { %v2602_v1 = vmul.f32 %v6354_v28, %v7899_v30 }
 0x78b   : > { %v2475_v63 = vpop.xlane.xlu0 %2474 }
 0x78c   : > { %6359 = vrcp.f32 %v2475_v63 }
 0x78d   : > { %v8030_v56 = vpop.f32.mrb[34].mxu0 }
 0x78e   : > { %v6356_v26 = vpop.eup %6355  ;;  %v8033_v49 = vpop.f32.mrb[35].mxu0 }
 0x78f   : > { %v2601_v13 = vmul.f32 %v6356_v26, %v7910_v40 }
 0x791   : > { %5479 = vmatmul.mubr.msk.f32.gmra.mrb[74].mxu1 %vm834_vm1, %v2601_v13 }
 0x792   : > { %v6358_v2 = vpop.eup %6357  ;;  %5481 = vmatprep.mubr.msk.f32.mxu1 %vm834_vm1, %v2602_v1 }
 0x793   : > { %v2595_v31 = vmul.f32 %v6358_v2, %v7916_v53  ;;  %v3923_v2 = vld [vmem:[%s8728_s4 + $0x10] sm:$0xff] }
 0x795   : > { %5466 = vmatmul.mubr.msk.f32.gmra.mrb[58].mxu0 %vm834_vm1, %v2595_v31  ;;  %v3924_v31 = vld [vmem:[%s8728_s4 + $0x18] sm:$0xff] }
 0x796   : > { %v6360_v11 = vpop.eup %6359 }
 0x797   : > { %v2603_v4 = vmul.f32 %v6360_v11, %v7923_v14  ;;  %v3925_v11 = vld [vmem:[%s8728_s4 + $0x20] sm:$0xff] }
 0x799   : > { %5482 = vmatmul.mubr.msk.f32.gmra.mrb[76].mxu1 %vm834_vm1, %v2603_v4  ;;  %v5715_v4 = vpack.c.bf16 %v3924_v31, %v3923_v2 }
 0x79a   : > { %4278 = vmatprep.mubr.f32.mxu1 %v8861_v51 }
 0x79b   : > { %5716 = vmatprep.subr.bf16.mxu0 %v5715_v4 }
 0x79c   : > { %5718 = vmatpush3.bf16.msra.mxu0 %v5715_v4 }
 0x7bc   : > { %v5378_v40 = vpop.f32.mrb[46].mxu1 }
 0x7bd   : > { %v2823_v60 = vpop.f32.mrb[47].mxu1 }
 0x7be   : > { %v5961_v18 = vpack.i.bf16 %v5378_v40, %v2823_v60  ;;  %v3926_v40 = vld [vmem:[%s8728_s4 + $0x28] sm:$0xff] }
 0x7bf   : > { %v5719_v60 = vpack.c.bf16 %v3926_v40, %v3925_v11 }
 0x7c0   : > { %5962 = vrot.lane.b32.xlu1 %v5961_v18, %s8783_s20  ;;  %v5394_v30 = vpop.f32.mrb[36].mxu0  ;;  %v3927_v18 = vld [vmem:[%s8728_s4 + $0x30] sm:$0xff] }
 0x7c1   : > { %v2952_v16 = vpop.f32.mrb[37].mxu0  ;;  %5720 = vmatprep.subr.bf16.mxu0 %v5719_v60 }
 0x7c2   : > { %v5966_v42 = vpack.i.bf16 %v5394_v30, %v2952_v16  ;;  %v3928_v30 = vld [vmem:[%s8728_s4 + $0x38] sm:$0xff]  ;;  %5722 = vmatpush3.bf16.msra.mxu0 %v5719_v60 }
 0x7c3   : > { %v5723_v16 = vpack.c.bf16 %v3928_v30, %v3927_v18 }
 0x7c4   : > { %5967 = vrot.lane.b32.xlu0 %v5966_v42, %s8782_s11  ;;  %v5381_v53 = vpop.f32.mrb[48].mxu1 }
 0x7c5   : > { %v2833_v19 = vpop.f32.mrb[49].mxu1  ;;  %5724 = vmatprep.subr.bf16.mxu0 %v5723_v16 }
 0x7c6   : > { %v5971_v50 = vpack.i.bf16 %v5381_v53, %v2833_v19  ;;  %5726 = vmatpush3.bf16.msra.mxu0 %v5723_v16 }
 0x7c8   : > { %5972 = vrot.lane.b32.xlu1 %v5971_v50, %s8783_s20  ;;  %v5397_v14 = vpop.f32.mrb[38].mxu0 }
 0x7c9   : > { %v2962_v37 = vpop.f32.mrb[39].mxu0 }
 0x7ca   : > { %v5976_v29 = vpack.i.bf16 %v5397_v14, %v2962_v37  ;;  %v3929_v14 = vld [vmem:[%s8728_s4 + $0x40] sm:$0xff]  ;;  %v3930_v37 = vld [vmem:[%s8728_s4 + $0x48] sm:$0xff] }
 0x7cc   : > { %5977 = vrot.lane.b32.xlu0 %v5976_v29, %s8782_s11  ;;  %v5384_v55 = vpop.f32.mrb[50].mxu1 }
 0x7cd   : > { %v2843_v10 = vpop.f32.mrb[51].mxu1 }
 0x7ce   : > { %v5981_v33 = vpack.i.bf16 %v5384_v55, %v2843_v10  ;;  %v5727_v55 = vpack.c.bf16 %v3930_v37, %v3929_v14 }
 0x7d0   : > { %v5400_v52 = vpop.f32.mrb[40].mxu0  ;;  %5982 = vrot.lane.b32.xlu0 %v5981_v33, %s8783_s20  ;;  %v3931_v33 = vld [vmem:[%s8728_s4 + $0x50] sm:$0xff]  ;;  %5728 = vmatprep.subr.bf16.mxu0 %v5727_v55  ;;  %s8862_s20 = smov 96  }
 0x7d1   : > { %v2972_v35 = vpop.f32.mrb[41].mxu0  ;;  %5730 = vmatpush3.bf16.msra.mxu0 %v5727_v55 }
 0x7d2   : > { %v5986_v34 = vpack.i.bf16 %v5400_v52, %v2972_v35  ;;  %v3932_v52 = vld [vmem:[%s8728_s4 + $0x58] sm:$0xff] }
 0x7d3   : > { %v8048_v22 = vpop.f32.mrb[52].mxu1  ;;  %v5731_v35 = vpack.c.bf16 %v3932_v52, %v3931_v33 }
 0x7d4   : > { %5987 = vrot.lane.b32.xlu1 %v5986_v34, %s8782_s11  ;;  %v8051_v3 = vpop.f32.mrb[53].mxu1  ;;  %v3933_v34 = vld [vmem:[%s8728_s4 + $0x60] sm:$0xff] }
 0x7d5   : > { %v6061_v17 = vpack.i.bf16 %v8048_v22, %v8051_v3  ;;  %5732 = vmatprep.subr.bf16.mxu0 %v5731_v35 }
 0x7d6   : > { %5734 = vmatpush3.bf16.msra.mxu0 %v5731_v35 }
 0x7d7   : > { %v8055_v57 = vpop.f32.mrb[42].mxu0 }
 0x7d8   : > { %v8057_v9 = vpop.f32.mrb[43].mxu0 }
 0x7d9   : > { %v6066_v15 = vpack.i.bf16 %v8055_v57, %v8057_v9 }
 0x7db   : > { %v5410_v12 = vpop.f32.mrb[54].mxu1 }
 0x7dc   : > { %v3081_v5 = vpop.f32.mrb[55].mxu1 }
 0x7dd   : > { %v5991_v7 = vpack.i.bf16 %v5410_v12, %v3081_v5  ;;  %v3934_v12 = vld [vmem:[%s8728_s4 + $0x68] sm:$0xff] }
 0x7df   : > { %5992 = vrot.lane.b32.xlu1 %v5991_v7, %s6534_s18  ;;  %v5735_v7 = vpack.c.bf16 %v3934_v12, %v3933_v34 }
 0x7e1   : > { %5736 = vmatprep.subr.bf16.mxu0 %v5735_v7 }
 0x7e2   : > { %5738 = vmatpush3.bf16.msra.mxu0 %v5735_v7 }
 0x7e3   : > { %5740 = vmatprep.subr.bf16.mxu0 %v5739_v25 }
 0x7e4   : > { %v5426_v59 = vpop.f32.mrb[44].mxu0 }
 0x7e5   : > { %v3210_v41 = vpop.f32.mrb[45].mxu0 }
 0x7e6   : > { %v5996_v62 = vpack.i.bf16 %v5426_v59, %v3210_v41  ;;  %5742 = vmatpush3.bf16.msra.mxu0 %v5739_v25 }
 0x7e7   : > { %v5413_v46 = vpop.f32.mrb[56].mxu1 }
 0x7e8   : > { %5997 = vrot.lane.b32.xlu1 %v5996_v62, %s6535_s22  ;;  %v3091_v32 = vpop.f32.mrb[57].mxu1 }
 0x7e9   : > { %v6001_v38 = vpack.i.bf16 %v5413_v46, %v3091_v32 }
 0x7ec   : > { %6002 = vrot.lane.b32.xlu1 %v6001_v38, %s6534_s18 }
 0x7f0   : > { %v5429_v8 = vpop.f32.mrb[46].mxu0 }
 0x7f1   : > { %v3220_v23 = vpop.f32.mrb[47].mxu0 }
 0x7f2   : > { %v6006_v36 = vpack.i.bf16 %v5429_v8, %v3220_v23 }
 0x7f4   : > { %6007 = vrot.lane.b32.xlu0 %v6006_v36, %s6535_s22 }
 0x7f8   : > { %v8071_v45 = vpop.f32.mrb[58].mxu1 }
 0x7f9   : > { %v8073_v54 = vpop.f32.mrb[59].mxu1 }
 0x7fa   : > { %v6036_v20 = vpack.i.bf16 %v8071_v45, %v8073_v54 }
 0x7fc   : > { %v8077_v47 = vpop.f32.mrb[48].mxu0 }
 0x7fd   : > { %v8079_v48 = vpop.f32.mrb[49].mxu0 }
 0x7fe   : > { %v6041_v24 = vpack.i.bf16 %v8077_v47, %v8079_v48 }
 0x803   : > { %v8083_v21 = vpop.f32.mrb[50].mxu0 }
 0x804   : > { %v8085_v63 = vpop.f32.mrb[51].mxu0 }
 0x805   : > { %v6081_v28 = vpack.i.bf16 %v8083_v21, %v8085_v63 }
 0x808   : > { %v8089_v26 = vpop.f32.mrb[60].mxu1 }
 0x809   : > { %v8091_v13 = vpop.f32.mrb[61].mxu1 }
 0x80a   : > { %v6071_v1 = vpack.i.bf16 %v8089_v26, %v8091_v13 }
 0x814   : > { %v5442_v42 = vpop.f32.mrb[62].mxu1 }
 0x815   : > { %v3339_v53 = vpop.f32.mrb[63].mxu1 }
 0x816   : > { %v6011_v19 = vpack.i.bf16 %v5442_v42, %v3339_v53 }
 0x818   : > { %6012 = vrot.lane.b32.xlu0 %v6011_v19, %s6533_s15  ;;  %v5445_v50 = vpop.f32.mrb[64].mxu1 }
 0x819   : > { %v3349_v29 = vpop.f32.mrb[65].mxu1 }
 0x81a   : > { %v6021_v10 = vpack.i.bf16 %v5445_v50, %v3349_v29 }
 0x81f   : > { %v5458_v5 = vpop.f32.mrb[52].mxu0 }
 0x820   : > { %v3468_v59 = vpop.f32.mrb[53].mxu0 }
 0x821   : > { %v6016_v41 = vpack.i.bf16 %v5458_v5, %v3468_v59 }
 0x823   : > { %6017 = vrot.lane.b32.xlu1 %v6016_v41, %s8862_s20  ;;  %v5461_v62 = vpop.f32.mrb[54].mxu0 }
 0x824   : > { %v5448_v46 = vpop.f32.mrb[66].mxu1  ;;  %v3478_v32 = vpop.f32.mrb[55].mxu0 }
 0x825   : > { %v6026_v38 = vpack.i.bf16 %v5461_v62, %v3478_v32  ;;  %v3359_v8 = vpop.f32.mrb[67].mxu1 }
 0x826   : > { %v6046_v23 = vpack.i.bf16 %v5448_v46, %v3359_v8 }
 0x827   : > { %6022 = vrot.lane.b32.xlu1 %v6021_v10, %s6533_s15  ;;  %6027 = vrot.lane.b32.xlu0 %v6026_v38, %s8862_s20  ;;  %v5464_v36 = vpop.f32.mrb[56].mxu0 }
 0x828   : > { %v5451_v2 = vpop.f32.mrb[68].mxu1  ;;  %v3488_v31 = vpop.f32.mrb[57].mxu0 }
 0x829   : > { %v6051_v11 = vpack.i.bf16 %v5464_v36, %v3488_v31  ;;  %v3369_v4 = vpop.f32.mrb[69].mxu1 }
 0x82a   : > { %v6086_v40 = vpack.i.bf16 %v5451_v2, %v3369_v4 }
 0x82b   : > { %6042 = vrot.lane.b32.xlu1 %v6041_v24, %s6535_s22 }
 0x82e   : > { %v5474_v60 = vpop.f32.mrb[70].mxu1 }
 0x82f   : > { %v3597_v18 = vpop.f32.mrb[71].mxu1  ;;  %6052 = vrot.lane.b32.xlu1 %v6051_v11, %s8862_s20 }
 0x830   : > { %v6031_v30 = vpack.i.bf16 %v5474_v60, %v3597_v18 }
 0x832   : > { %v5477_v16 = vpop.f32.mrb[72].mxu1  ;;  %6032 = vrot.lane.b32.xlu0 %v6031_v30, %s8863_s26  ;;  %v5963_v48 = vpop.permute.xlu1 %5962 }
 0x833   : > { %v3607_v42 = vpop.f32.mrb[73].mxu1  ;;  %v5965_v12 = vunpack.i.h.bf16 %v5963_v48  ;;  %v5964_v5 = vunpack.i.l.bf16 %v5963_v48 }
 0x834   : > { %v6056_v53 = vpack.i.bf16 %v5477_v16, %v3607_v42 }
 0x835   : > { %v3861_v63 = vsel %vm834_vm1, %v8014_v44, %v5965_v12 }
 0x836   : > { %6037 = vrot.lane.b32.xlu0 %v6036_v20, %s6534_s18  ;;  %6057 = vrot.lane.b32.xlu1 %v6056_v53, %s8863_s26  ;;  %v5968_v47 = vpop.permute.xlu0 %5967 }
 0x837   : > { %v5970_v59 = vunpack.i.h.bf16 %v5968_v47  ;;  %v5969_v41 = vunpack.i.l.bf16 %v5968_v47 }
 0x839   : > { %v3870_v0 = vsel %vm3868_vm4, %v3861_v63, %v5970_v59 }
 0x83a   : > { %6047 = vrot.lane.b32.xlu0 %v6046_v23, %s6533_s15  ;;  %6062 = vrot.lane.b32.xlu1 %v6061_v17, %s8864_s13  ;;  %v5973_v54 = vpop.permute.xlu1 %5972 }
 0x83b   : > { %v5975_v62 = vunpack.i.h.bf16 %v5973_v54  ;;  %v5974_v46 = vunpack.i.l.bf16 %v5973_v54 }
 0x83d   : > { %v3863_v36 = vsel %vm834_vm1, %v8018_v43, %v5975_v62  ;;  %v3862_v44 = vsel %vm834_vm1, %v8020_v61, %v5974_v46 }
 0x83e   : > { %6067 = vrot.lane.b32.xlu0 %v6066_v15, %s8865_s16  ;;  %6072 = vrot.lane.b32.xlu1 %v6071_v1, %s6534_s18  ;;  %v8165_v45 = vpop.permute.xlu0 %5977  ;;  %s8680_s16 = scalar_lea.hbm %s8732_s8, %s4946_s21  ;;  %s6451_s18 = scalar_lea.vmem %s8682_s17, 16 }
 0x83f   : > { %v5980_v32 = vunpack.i.h.bf16 %v8165_v45  ;;  %v5979_v38 = vunpack.i.l.bf16 %v8165_v45  ;;  %p6452_p4 = scmp.ne.s32.totalorder %s8682_s17, %s6451_s18 }
 0x841   : > { %v3871_v18 = vsel %vm3868_vm4, %v3862_v44, %v5979_v38  ;;  %v3872_v30 = vsel %vm3868_vm4, %v3863_v36, %v5980_v32  ;;  %p6453_p6 = pnand %p6452_p4, %p6677_p12 }
 0x842   : > { %6087 = vrot.lane.b32.xlu1 %v6086_v40, %s6533_s15  ;;  %v5983_v20 = vpop.permute.xlu0 %5982  ;;  %s4690_s15 = scalar_lea.sflag [#allocation4], %s6725_s10 }
 0x843   : > { %v5985_v22 = vunpack.i.h.bf16 %v5983_v20  ;;  %v5984_v3 = vunpack.i.l.bf16 %v5983_v20  ;;  %p6454_p8 = pneg %p6453_p6 }
 0x845   : > { %v3865_v17 = vsel %vm834_vm1, %v8026_v39, %v5985_v22  ;;  %v3864_v57 = vsel %vm834_vm1, %v8028_v6, %v5984_v3 }
 0x846   : > { %v5988_v9 = vpop.permute.xlu1 %5987 }
 0x847   : > { %v5990_v15 = vunpack.i.h.bf16 %v5988_v9  ;;  %v5989_v24 = vunpack.i.l.bf16 %v5988_v9 }
 0x849   : > { %v8173_v26 = vsel %vm3868_vm4, %v3865_v17, %v5990_v15  ;;  %v8176_v13 = vsel %vm3868_vm4, %v3864_v57, %v5989_v24 }
 0x851   : > { %v5993_v10 = vpop.permute.xlu1 %5992 }
 0x852   : > { %v5995_v58 = vunpack.i.h.bf16 %v5993_v10  ;;  %v5994_v23 = vunpack.i.l.bf16 %v5993_v10 }
 0x854   : > { %v3879_v43 = vsel %vm3877_vm5, %v3870_v0, %v5995_v58 }
 0x85a   : > { %v5998_v33 = vpop.permute.xlu1 %5997 }
 0x85b   : > { %v6000_v31 = vunpack.i.h.bf16 %v5998_v33  ;;  %v5999_v11 = vunpack.i.l.bf16 %v5998_v33 }
 0x85d   : > { %v3887_v3 = vsel %vm367_vm0, %v3879_v43, %v6000_v31 }
 0x85e   : > { %v6003_v52 = vpop.permute.xlu1 %6002 }
 0x85f   : > { %v6005_v2 = vunpack.i.h.bf16 %v6003_v52 }
 0x861   : > { %v3881_v45 = vsel %vm3877_vm5, %v3872_v30, %v6005_v2 }
 0x864   : > { %v5480_v1 = vpop.f32.mrb[74].mxu1 }
 0x865   : > { %v3617_v19 = vpop.f32.mrb[75].mxu1 }
 0x866   : > { %v6076_v50 = vpack.i.bf16 %v5480_v1, %v3617_v19  ;;  %v6008_v34 = vpop.permute.xlu0 %6007 }
 0x867   : > { %v6010_v4 = vunpack.i.h.bf16 %v6008_v34  ;;  %v6009_v40 = vunpack.i.l.bf16 %v6008_v34 }
 0x868   : > { %6077 = vrot.lane.b32.xlu0 %v6076_v50, %s8863_s26  ;;  %v5467_v14 = vpop.f32.mrb[58].mxu0 }
 0x869   : > { %v3498_v39 = vpop.f32.mrb[59].mxu0  ;;  %v3889_v57 = vsel %vm367_vm0, %v3881_v45, %v6010_v4 }
 0x86a   : > { %v6091_v37 = vpack.i.bf16 %v5467_v14, %v3498_v39 }
 0x86c   : > { %v5483_v29 = vpop.f32.mrb[76].mxu1  ;;  %6082 = vrot.lane.b32.xlu0 %v6081_v28, %s6535_s22  ;;  %v3860_v28 = vsel %vm834_vm1, %v8016_v27, %v5964_v5  ;;  %v6004_v27 = vunpack.i.l.bf16 %v6003_v52  ;;  %s6455_s22 = sshll.u32 %s6540_s9, 4  ;;  %s6456_s22 = int_to_ptr.vmem [resolvable:$false] %s6455_s22 }
 0x86d   : > { %v3627_v6 = vpop.f32.mrb[77].mxu1  ;;  %v3869_v8 = vsel %vm3868_vm4, %v3860_v28, %v5969_v41  ;;  %s6457_s25 = scalar_lea.vmem %s6456_s22, 32  ;;  %p6458_p10 = scmp.lt.s32.totalorder %s8682_s17, %s6456_s22 }
 0x86e   : > { %v6096_v55 = vpack.i.bf16 %v5483_v29, %v3627_v6  ;;  %v3878_v53 = vsel %vm3877_vm5, %v3869_v8, %v5994_v23  ;;  %v3880_v61 = vsel %vm3877_vm5, %v3871_v18, %v6004_v27  ;;  %p6459_p13 = scmp.lt.s32.totalorder %s6457_s25, %s6451_s18 }
 0x86f   : > { %v3886_v22 = vsel %vm367_vm0, %v3878_v53, %v5999_v11  ;;  %v3888_v17 = vsel %vm367_vm0, %v3880_v61, %v6009_v40 }
 0x870   : > { %6097 = vrot.lane.b32.xlu1 %v6096_v55, %s8863_s26  ;;  %6092 = vrot.lane.b32.xlu0 %v6091_v37, %s8862_s20  ;;  %p6460_p3 = por %p6459_p13, %p6458_p10 }
 0x872   : > { %p6461_p7 = pnand %p6460_p3, %p6454_p8 }
 0x88a   : > { %v6013_v21 = vpop.permute.xlu0 %6012 }
 0x88b   : > { %v6015_v16 = vunpack.i.h.bf16 %v6013_v21  ;;  %v6014_v42 = vunpack.i.l.bf16 %v6013_v21 }
 0x88d   : > { %v3896_v24 = vsel %vm3894_vm6, %v3887_v3, %v6015_v16  ;;  %v3895_v50 = vsel %vm3894_vm6, %v3886_v22, %v6014_v42 }
 0x895   : > { %v6018_v35 = vpop.permute.xlu1 %6017 }
 0x896   : > { %v6020_v47 = vunpack.i.h.bf16 %v6018_v35  ;;  %v6019_v48 = vunpack.i.l.bf16 %v6018_v35 }
 0x898   : > { %v3905_v14 = vsel %vm3903_vm7, %v3896_v24, %v6020_v47  ;;  %v3904_v29 = vsel %vm3903_vm7, %v3895_v50, %v6019_v48 }
 0x899   : > { %v6023_v7 = vpop.permute.xlu1 %6022  ;;  %v6028_v60 = vpop.permute.xlu0 %6027 }
 0x89a   : > { %v6025_v54 = vunpack.i.h.bf16 %v6023_v7  ;;  %v6024_v20 = vunpack.i.l.bf16 %v6023_v7  ;;  %v6030_v39 = vunpack.i.h.bf16 %v6028_v60  ;;  %v6029_v37 = vunpack.i.l.bf16 %v6028_v60 }
 0x89c   : > { %v3897_v10 = vsel %vm3894_vm6, %v3888_v17, %v6024_v20  ;;  %v3898_v33 = vsel %vm3894_vm6, %v3889_v57, %v6025_v54 }
 0x89d   : > { %v8193_v25 = vpop.permute.xlu1 %6042  ;;  %v3906_v5 = vsel %vm3903_vm7, %v3897_v10, %v6029_v37  ;;  %v3907_v7 = vsel %vm3903_vm7, %v3898_v33, %v6030_v39 }
 0x89e   : > { %v6045_v11 = vunpack.i.h.bf16 %v8193_v25  ;;  %v6044_v4 = vunpack.i.l.bf16 %v8193_v25 }
 0x8a1   : > { %v6053_v9 = vpop.permute.xlu1 %6052 }
 0x8a2   : > { %v6054_v42 = vunpack.i.l.bf16 %v6053_v9 }
 0x8a4   : > { %v6033_v15 = vpop.permute.xlu0 %6032 }
 0x8a5   : > { %v6035_v1 = vunpack.i.h.bf16 %v6033_v15  ;;  %v6034_v19 = vunpack.i.l.bf16 %v6033_v15 }
 0x8a7   : > { %v3913_v6 = vsel %vm3912_vm8, %v3904_v29, %v6034_v19  ;;  %v3914_v55 = vsel %vm3912_vm8, %v3905_v14, %v6035_v1 }
 0x8a8   : > { %v6038_v52 = vpop.permute.xlu0 %6037  ;;  %5516 = vmatprep.mubr.f32.mxu0 %v3913_v6  ;;  %v6058_v35 = vpop.permute.xlu1 %6057 }
 0x8a9   : > { %v6060_v34 = vunpack.i.h.bf16 %v6058_v35  ;;  %v6059_v12 = vunpack.i.l.bf16 %v6058_v35  ;;  %5517 = vmatmul.mubr.f32.vlgmr.msra.gmra.mrb[60].mxu0 %v3914_v55  ;;  %v6040_v23 = vunpack.i.h.bf16 %v6038_v52  ;;  %v6039_v36 = vunpack.i.l.bf16 %v6038_v52 }
 0x8ab   : > { %v3915_v59 = vsel %vm3912_vm8, %v3906_v5, %v6059_v12  ;;  %v3916_v41 = vsel %vm3912_vm8, %v3907_v7, %v6060_v34  ;;  %v3883_v44 = vsel %vm3877_vm5, %v8173_v26, %v6040_v23  ;;  %v3882_v2 = vsel %vm3877_vm5, %v8176_v13, %v6039_v36  ;;  %v3937_v34 = vld [vmem:[%s8731_s7 + $0x5] ss:$0 sm:$0xff]  ;;  %v4044_v5 = vld [vmem:[%s8730_s6 + $0x8] sm:$0xff] }
 0x8ac   : > { %v6048_v62 = vpop.permute.xlu0 %6047  ;;  %v6063_v46 = vpop.permute.xlu1 %6062  ;;  %5519 = vmatprep.mubr.f32.mxu0 %v3915_v59  ;;  %v3891_v60 = vsel %vm367_vm0, %v3883_v44, %v6045_v11  ;;  %v6055_v26 = vunpack.i.h.bf16 %v6053_v9  ;;  %v4048_v44 = vld [vmem:[%s8730_s6 + $0x28] sm:$0xff] }
 0x8ad   : > { %5520 = vmatmul.mubr.f32.gmra.mrb[62].mxu0 %v3916_v41  ;;  %v6065_v21 = vunpack.i.h.bf16 %v6063_v46  ;;  %v6050_v27 = vunpack.i.h.bf16 %v6048_v62  ;;  %v6049_v31 = vunpack.i.l.bf16 %v6048_v62  ;;  %v6064_v40 = vunpack.i.l.bf16 %v6063_v46  ;;  %v4043_v41 = vld [vmem:[%s8730_s6] sm:$0xff] }
 0x8af   : > { %v3867_v8 = vsel %vm834_vm1, %v8030_v56, %v6065_v21  ;;  %v3890_v56 = vsel %vm367_vm0, %v3882_v2, %v6044_v4  ;;  %v3900_v16 = vsel %vm3894_vm6, %v3891_v60, %v6050_v27  ;;  %v3866_v47 = vsel %vm834_vm1, %v8033_v49, %v6064_v40  ;;  %v4050_v60 = vld [vmem:[%s8730_s6 + $0x38] sm:$0xf] }
 0x8b0   : > { %v6068_v63 = vpop.permute.xlu0 %6067  ;;  %v6073_v28 = vpop.permute.xlu1 %6072  ;;  %v3899_v30 = vsel %vm3894_vm6, %v3890_v56, %v6049_v31  ;;  %v3909_v61 = vsel %vm3903_vm7, %v3900_v16, %v6055_v26  ;;  %v4047_v31 = vld [vmem:[%s8730_s6 + $0x20] sm:$0xff]  ;;  %v4049_v16 = vld [vmem:[%s8730_s6 + $0x30] sm:$0xff] }
 0x8b1   : > { %v6070_v32 = vunpack.i.h.bf16 %v6068_v63  ;;  %v6075_v38 = vunpack.i.h.bf16 %v6073_v28  ;;  %v6069_v18 = vunpack.i.l.bf16 %v6068_v63  ;;  %v6074_v48 = vunpack.i.l.bf16 %v6073_v28 }
 0x8b2   : > { %v3908_v25 = vsel %vm3903_vm7, %v3899_v30, %v6054_v42 }
 0x8b3   : > { %v3876_v0 = vsel %vm3868_vm4, %v3867_v8, %v6070_v32  ;;  %v3875_v45 = vsel %vm3868_vm4, %v3866_v47, %v6069_v18  ;;  %v4045_v32 = vld [vmem:[%s8730_s6 + $0x10] sm:$0xff]  ;;  %v4172_v47 = vld [vmem:[%s8727_s3 + $0x118] sm:$0xff] }
 0x8b4   : > { %v3885_v58 = vsel %vm3877_vm5, %v3876_v0, %v6075_v38  ;;  %v6088_v54 = vpop.permute.xlu1 %6087  ;;  %v3884_v9 = vsel %vm3877_vm5, %v3875_v45, %v6074_v48  ;;  %v4169_v48 = vld [vmem:[%s8727_s3 + $0x100] sm:$0xff]  ;;  %v4174_v45 = vld [vmem:[%s8727_s3 + $0x128] sm:$0xff] }
 0x8b5   : > { %v6090_v49 = vunpack.i.h.bf16 %v6088_v54  ;;  %v6089_v1 = vunpack.i.l.bf16 %v6088_v54  ;;  %v4176_v54 = vld [vmem:[%s8727_s3 + $0x138] sm:$0xff] }
 0x8da   : > { %v6078_v53 = vpop.permute.xlu0 %6077 }
 0x8db   : > { %v6080_v13 = vunpack.i.h.bf16 %v6078_v53  ;;  %v6079_v43 = vunpack.i.l.bf16 %v6078_v53 }
 0x8dd   : > { %v3917_v20 = vsel %vm3912_vm8, %v3908_v25, %v6079_v43  ;;  %v3918_v22 = vsel %vm3912_vm8, %v3909_v61, %v6080_v13  ;;  %v4170_v43 = vld [vmem:[%s8727_s3 + $0x108] sm:$0xff]  ;;  %v4171_v61 = vld [vmem:[%s8727_s3 + $0x110] sm:$0xff] }
 0x8de   : > { %v6083_v3 = vpop.permute.xlu0 %6082  ;;  %5522 = vmatprep.mubr.f32.mxu0 %v3917_v20  ;;  %v5743_v25 = vpack.c.bf16 %v4172_v47, %v4170_v43  ;;  %v5745_v20 = vpack.c.bf16 %v4171_v61, %v4169_v48  ;;  %v4200_v43 = vld [vmem:[%s8727_s3 + $0x1f8] sm:$0xff]  ;;  %v4197_v47 = vld [vmem:[%s8727_s3 + $0x1e0] sm:$0xff] }
 0x8df   : > { %v6085_v17 = vunpack.i.h.bf16 %v6083_v3  ;;  %v6084_v57 = vunpack.i.l.bf16 %v6083_v3  ;;  %5523 = vmatmul.mubr.f32.gmra.mrb[64].mxu0 %v3918_v22  ;;  %v5747_v22 = vpack.c.bf16 %v4176_v54, %v4174_v45  ;;  %v4173_v3 = vld [vmem:[%s8727_s3 + $0x120] sm:$0xff]  ;;  %v8866_v45 = vmov 0.0|0.0  }
 0x8e0   : > { %5744 = vmatprep.subr.bf16.mxu1 %v5743_v25  ;;  %v4199_v25 = vld [vmem:[%s8727_s3 + $0x1f0] sm:$0xff] }
 0x8e1   : > { %v3892_v15 = vsel %vm367_vm0, %v3884_v9, %v6084_v57  ;;  %v3893_v24 = vsel %vm367_vm0, %v3885_v58, %v6085_v17  ;;  %v4046_v58 = vld [vmem:[%s8730_s6 + $0x18] sm:$0xff]  ;;  %v4175_v17 = vld [vmem:[%s8727_s3 + $0x130] sm:$0xff]  ;;  %v4178_v57 = vld [vmem:[%s8727_s3 + $0x148] sm:$0xff]  ;;  %5746 = vmatpush1.bf16.msra.mxu1 %v5745_v20  ;;  %v5773_v61 = vpack.c.bf16 %v4199_v25, %v4197_v47 }
 0x8e2   : > { %v6098_v19 = vpop.permute.xlu1 %6097  ;;  %v6093_v50 = vpop.permute.xlu0 %6092  ;;  %v3902_v14 = vsel %vm3894_vm6, %v3893_v24, %v6090_v49  ;;  %v3901_v55 = vsel %vm3894_vm6, %v3892_v15, %v6089_v1  ;;  %v4180_v9 = vld [vmem:[%s8727_s3 + $0x158] sm:$0xff]  ;;  %v5749_v49 = vpack.c.bf16 %v4175_v17, %v4173_v3  ;;  %5748 = vmatprep.subr.bf16.mxu1 %v5747_v22  ;;  %v4177_v24 = vld [vmem:[%s8727_s3 + $0x140] sm:$0xff]  ;;  %v4179_v1 = vld [vmem:[%s8727_s3 + $0x150] sm:$0xff] }
 0x8e3   : > { %v6100_v39 = vunpack.i.h.bf16 %v6098_v19  ;;  %v6099_v37 = vunpack.i.l.bf16 %v6098_v19  ;;  %v6095_v29 = vunpack.i.h.bf16 %v6093_v50  ;;  %v6094_v6 = vunpack.i.l.bf16 %v6093_v50 }
 0x8e4   : > { %v5751_v15 = vpack.c.bf16 %v4180_v9, %v4178_v57  ;;  %v5753_v19 = vpack.c.bf16 %v4179_v1, %v4177_v24 }
 0x8e5   : > { %v3910_v10 = vsel %vm3903_vm7, %v3901_v55, %v6094_v6  ;;  %v3911_v33 = vsel %vm3903_vm7, %v3902_v14, %v6095_v29  ;;  %5750 = vmatpush1.bf16.msra.mxu1 %v5749_v49 }
 0x8e6   : > { %v3919_v52 = vsel %vm3912_vm8, %v3910_v10, %v6099_v37  ;;  %v3920_v35 = vsel %vm3912_vm8, %v3911_v33, %v6100_v39  ;;  %5752 = vmatprep.subr.bf16.mxu1 %v5751_v15 }
 0x8e7   : > { %5525 = vmatprep.mubr.f32.mxu0 %v3919_v52 }
 0x8e8   : > { %5526 = vmatmul.mubr.f32.gmra.mrb[66].mxu0 %v3920_v35 }
 0x8e9   : > { %5754 = vmatpush1.bf16.msra.mxu1 %v5753_v19 }
 0x97c   : > { %v5518_v12 = vpop.f32.mrb[60].mxu0 }
 0x97d   : > { %v4010_v7 = vadd.f32 %v5518_v12, %v3937_v34  ;;  %v4004_v59 = vpop.f32.mrb[61].mxu0 }
 0x97e   : > { %v4005_v62 = vadd.f32 %v4004_v59, %v3937_v34 }
 0x97f   : > { %v8260_v46 = vadd.f32 %v4044_v5, %v4010_v7 }
 0x980   : > { %v8262_v21 = vadd.f32 %v4043_v41, %v4005_v62  ;;  %v5521_v63 = vpop.f32.mrb[62].mxu0  ;;  %v4182_v41 = vld [vmem:[%s8727_s3 + $0x168] sm:$0xff]  ;;  %v4184_v62 = vld [vmem:[%s8727_s3 + $0x178] sm:$0xff] }
 0x981   : > { %4063 = vadd.xlane.f32.xlu1 %v8260_v46  ;;  %v4014_v28 = vpop.f32.mrb[63].mxu0  ;;  %v4020_v8 = vadd.f32 %v5521_v63, %v3937_v34  ;;  %v4183_v63 = vld [vmem:[%s8727_s3 + $0x170] sm:$0xff] }
 0x982   : > { %v4015_v38 = vadd.f32 %v4014_v28, %v3937_v34  ;;  %4061 = vadd.xlane.f32.xlu0 %v8262_v21 }
 0x983   : > { %v8272_v23 = vadd.f32 %v4046_v58, %v4020_v8  ;;  %v4187_v58 = vld [vmem:[%s8727_s3 + $0x190] sm:$0xff] }
 0x984   : > { %v4053_v0 = vadd.f32 %v4045_v32, %v4015_v38  ;;  %v4186_v32 = vld [vmem:[%s8727_s3 + $0x188] sm:$0xff]  ;;  %v4188_v38 = vld [vmem:[%s8727_s3 + $0x198] sm:$0xff] }
 0x985   : > { %v5759_v8 = vpack.c.bf16 %v4188_v38, %v4186_v32  ;;  %v4365_v32 = vld [vmem:[%s8728_s4 + $0x130] sm:$0xff]  ;;  %v4366_v38 = vld [vmem:[%s8728_s4 + $0x138] sm:$0xff] }
 0x986   : > { %4065 = vadd.xlane.f32.xlu0 %v4053_v0 }
 0x98a   : > { %4067 = vadd.xlane.f32.xlu0 %v8272_v23 }
 0x9b2   : > { %v5524_v36 = vpop.f32.mrb[64].mxu0 }
 0x9b3   : > { %v4030_v2 = vadd.f32 %v5524_v36, %v3937_v34  ;;  %v4024_v27 = vpop.f32.mrb[65].mxu0  ;;  %v4190_v36 = vld [vmem:[%s8727_s3 + $0x1a8] sm:$0xff] }
 0x9b4   : > { %v4025_v11 = vadd.f32 %v4024_v27, %v3937_v34  ;;  %v4189_v27 = vld [vmem:[%s8727_s3 + $0x1a0] sm:$0xff] }
 0x9b5   : > { %v8281_v4 = vadd.f32 %v4048_v44, %v4030_v2  ;;  %v4192_v44 = vld [vmem:[%s8727_s3 + $0x1b8] sm:$0xff] }
 0x9b6   : > { %v8283_v40 = vadd.f32 %v4047_v31, %v4025_v11  ;;  %v5763_v2 = vpack.c.bf16 %v4192_v44, %v4190_v36  ;;  %v4191_v31 = vld [vmem:[%s8727_s3 + $0x1b0] sm:$0xff]  ;;  %v4367_v36 = vld [vmem:[%s8728_s4 + $0x140] sm:$0xff]  ;;  %v4368_v44 = vld [vmem:[%s8728_s4 + $0x148] sm:$0xff] }
 0x9b7   : > { %4071 = vadd.xlane.f32.xlu0 %v8281_v4  ;;  %v5765_v11 = vpack.c.bf16 %v4191_v31, %v4189_v27  ;;  %v5791_v27 = vpack.c.bf16 %v4368_v44, %v4367_v36  ;;  %v4351_v31 = vld [vmem:[%s8728_s4 + $0xc0] sm:$0xff] }
 0x9b8   : > { %4069 = vadd.xlane.f32.xlu1 %v8283_v40 }
 0x9bb   : > { %v5527_v56 = vpop.f32.mrb[66].mxu0 }
 0x9bc   : > { %v4040_v18 = vadd.f32 %v5527_v56, %v3937_v34  ;;  %v4034_v30 = vpop.f32.mrb[67].mxu0  ;;  %v4194_v56 = vld [vmem:[%s8727_s3 + $0x1c8] sm:$0xff] }
 0x9bd   : > { %v4035_v26 = vadd.f32 %v4034_v30, %v3937_v34  ;;  %v4193_v30 = vld [vmem:[%s8727_s3 + $0x1c0] sm:$0xff] }
 0x9be   : > { %v8293_v42 = vadd.f32 %v4050_v60, %v4040_v18  ;;  %v4196_v60 = vld [vmem:[%s8727_s3 + $0x1d8] sm:$0xff] }
 0x9bf   : > { %v8295_v53 = vadd.f32 %v4049_v16, %v4035_v26  ;;  %v5767_v18 = vpack.c.bf16 %v4196_v60, %v4194_v56  ;;  %v4195_v16 = vld [vmem:[%s8727_s3 + $0x1d0] sm:$0xff]  ;;  %v4370_v60 = vld [vmem:[%s8728_s4 + $0x158] sm:$0xff] }
 0x9c0   : > { %v4076_v13 = vsel %vm4075_vm9, %v8293_v42, 0.0  ;;  %v5769_v26 = vpack.c.bf16 %v4195_v16, %v4193_v30  ;;  %v4369_v56 = vld [vmem:[%s8728_s4 + $0x150] sm:$0xff] }
 0x9c1   : > { %4073 = vadd.xlane.f32.xlu1 %v8295_v53  ;;  %4077 = vadd.xlane.f32.xlu0 %v4076_v13  ;;  %v4198_v13 = vld [vmem:[%s8727_s3 + $0x1e8] sm:$0xff]  ;;  %v5795_v30 = vpack.c.bf16 %v4370_v60, %v4369_v56  ;;  %v4353_v16 = vld [vmem:[%s8728_s4 + $0xd0] sm:$0xff] }
 0x9c2   : > { %v5771_v48 = vpack.c.bf16 %v4200_v43, %v4198_v13  ;;  %v4371_v13 = vld [vmem:[%s8728_s4 + $0x160] sm:$0xff]  ;;  %v4372_v43 = vld [vmem:[%s8728_s4 + $0x168] sm:$0xff] }
 0xa0e   : > { %v4064_v50 = vpop.xlane.xlu1 %4063 }
 0xa0f   : > { %v4081_v14 = vmul.f32 0.0078125, %v4064_v50  ;;  %v4062_v39 = vpop.xlane.xlu0 %4061 }
 0xa10   : > { %v4080_v37 = vmul.f32 0.0078125, %v4062_v39 }
 0xa11   : > { %v8337_v29 = vsub.f32 %v8260_v46, %v4081_v14  ;;  %v5755_v46 = vpack.c.bf16 %v4184_v62, %v4182_v41  ;;  %v4363_v41 = vld [vmem:[%s8728_s4 + $0x120] sm:$0xff]  ;;  %v4364_v62 = vld [vmem:[%s8728_s4 + $0x128] sm:$0xff] }
 0xa12   : > { %v8340_v6 = vsub.f32 %v8262_v21, %v4080_v37  ;;  %v4181_v21 = vld [vmem:[%s8727_s3 + $0x160] sm:$0xff] }
 0xa13   : > { %v4066_v55 = vpop.xlane.xlu0 %4065  ;;  %v4097_v10 = vmul.f32 %v8337_v29, %v8337_v29  ;;  %v5757_v28 = vpack.c.bf16 %v4183_v63, %v4181_v21  ;;  %5756 = vmatprep.subr.bf16.mxu1 %v5755_v46  ;;  %v4359_v37 = vld [vmem:[%s8728_s4 + $0x100] sm:$0xff]  ;;  %v5783_v21 = vpack.c.bf16 %v4364_v62, %v4363_v41 }
 0xa14   : > { %v4082_v33 = vmul.f32 0.0078125, %v4066_v55  ;;  %v4096_v52 = vmul.f32 %v8340_v6, %v8340_v6  ;;  %v4347_v63 = vld [vmem:[%s8728_s4 + $0xa0] sm:$0xff] }
 0xa15   : > { %4106 = vadd.xlane.f32.xlu0 %v4097_v10  ;;  %5758 = vmatpush1.bf16.msra.mxu1 %v5757_v28  ;;  %v4344_v10 = vld [vmem:[%s8728_s4 + $0x88] sm:$0xff] }
 0xa16   : > { %v8346_v35 = vsub.f32 %v4053_v0, %v4082_v33  ;;  %4104 = vadd.xlane.f32.xlu1 %v4096_v52  ;;  %v4185_v0 = vld [vmem:[%s8727_s3 + $0x180] sm:$0xff]  ;;  %5760 = vmatprep.subr.bf16.mxu1 %v5759_v8  ;;  %v4361_v33 = vld [vmem:[%s8728_s4 + $0x110] sm:$0xff]  ;;  %v4362_v52 = vld [vmem:[%s8728_s4 + $0x118] sm:$0xff] }
 0xa17   : > { %v4068_v34 = vpop.xlane.xlu0 %4067  ;;  %v4348_v28 = vld [vmem:[%s8728_s4 + $0xa8] sm:$0xff] }
 0xa18   : > { %v4083_v12 = vmul.f32 0.0078125, %v4068_v34  ;;  %v4098_v5 = vmul.f32 %v8346_v35, %v8346_v35  ;;  %v5785_v8 = vpack.c.bf16 %v4348_v28, %v4347_v63 }
 0xa1a   : > { %v8351_v7 = vsub.f32 %v8272_v23, %v4083_v12  ;;  %4108 = vadd.xlane.f32.xlu1 %v4098_v5  ;;  %v5761_v23 = vpack.c.bf16 %v4187_v58, %v4185_v0  ;;  %v5779_v12 = vpack.c.bf16 %v4362_v52, %v4361_v33  ;;  %v4345_v5 = vld [vmem:[%s8728_s4 + $0x90] sm:$0xff]  ;;  %v5787_v0 = vpack.c.bf16 %v4366_v38, %v4365_v32 }
 0xa1b   : > { %v4349_v58 = vld [vmem:[%s8728_s4 + $0xb0] sm:$0xff] }
 0xa1c   : > { %v4099_v59 = vmul.f32 %v8351_v7, %v8351_v7  ;;  %5762 = vmatpush1.bf16.msra.mxu1 %v5761_v23  ;;  %v4350_v23 = vld [vmem:[%s8728_s4 + $0xb8] sm:$0xff] }
 0xa1d   : > { %5764 = vmatprep.subr.bf16.mxu1 %v5763_v2  ;;  %v5789_v2 = vpack.c.bf16 %v4350_v23, %v4349_v58 }
 0xa1e   : > { %4110 = vadd.xlane.f32.xlu0 %v4099_v59  ;;  %v4346_v59 = vld [vmem:[%s8728_s4 + $0x98] sm:$0xff] }
 0xa1f   : > { %v5781_v46 = vpack.c.bf16 %v4346_v59, %v4345_v5 }
 0xa20   : > { %5766 = vmatpush1.bf16.msra.mxu1 %v5765_v11  ;;  %v4352_v11 = vld [vmem:[%s8728_s4 + $0xc8] sm:$0xff] }
 0xa21   : > { %5768 = vmatprep.subr.bf16.mxu1 %v5767_v18  ;;  %v5793_v18 = vpack.c.bf16 %v4352_v11, %v4351_v31 }
 0xa24   : > { %5770 = vmatpush1.bf16.msra.mxu1 %v5769_v26  ;;  %v4354_v26 = vld [vmem:[%s8728_s4 + $0xd8] sm:$0xff] }
 0xa25   : > { %5772 = vmatprep.subr.bf16.mxu1 %v5771_v48  ;;  %v5797_v47 = vpack.c.bf16 %v4354_v26, %v4353_v16  ;;  %v5799_v48 = vpack.c.bf16 %v4372_v43, %v4371_v13 }
 0xa28   : > { %5774 = vmatpush1.bf16.msra.mxu1 %v5773_v61 }
 0xa29   : > { %5807 = vmatprep.subr.bf16.mxu1 %v8866_v45 }
 0xa44   : > { %v4072_v54 = vpop.xlane.xlu0 %4071 }
 0xa45   : > { %v4085_v20 = vmul.f32 0.0078125, %v4072_v54  ;;  %v4070_v22 = vpop.xlane.xlu1 %4069 }
 0xa46   : > { %v4084_v3 = vmul.f32 0.0078125, %v4070_v22 }
 0xa47   : > { %v8417_v17 = vsub.f32 %v8281_v4, %v4085_v20 }
 0xa48   : > { %v8420_v57 = vsub.f32 %v8283_v40, %v4084_v3 }
 0xa49   : > { %v4101_v9 = vmul.f32 %v8417_v17, %v8417_v17 }
 0xa4a   : > { %v4100_v49 = vmul.f32 %v8420_v57, %v8420_v57 }
 0xa4b   : > { %4114 = vadd.xlane.f32.xlu0 %v4101_v9 }
 0xa4c   : > { %4112 = vadd.xlane.f32.xlu1 %v4100_v49 }
 0xa4e   : > { %v4074_v15 = vpop.xlane.xlu1 %4073  ;;  %v4078_v24 = vpop.xlane.xlu0 %4077 }
 0xa4f   : > { %v4086_v1 = vmul.f32 0.0078125, %v4074_v15  ;;  %v4087_v19 = vmul.f32 0.0078125, %v4078_v24 }
 0xa51   : > { %v8427_v50 = vsub.f32 %v8295_v53, %v4086_v1  ;;  %v8430_v4 = vsub.f32 %v8293_v42, %v4087_v19  ;;  %v4360_v53 = vld [vmem:[%s8728_s4 + $0x108] sm:$0xff]  ;;  %v4343_v42 = vld [vmem:[%s8728_s4 + $0x80] sm:$0xff] }
 0xa52   : > { %v5775_v55 = vpack.c.bf16 %v4360_v53, %v4359_v37  ;;  %v5777_v34 = vpack.c.bf16 %v4344_v10, %v4343_v42  ;;  %v4060_v42 = vld [vmem:[%s8731_s7 + $0x7] ss:$0 sm:$0xff] }
 0xa53   : > { %v4102_v40 = vmul.f32 %v8427_v50, %v8427_v50  ;;  %v4103_v14 = vmul.f32 %v8430_v4, %v8430_v4 }
 0xa54   : > { %5776 = vmatprep.subr.bf16.mxu0 %v5775_v55 }
 0xa55   : > { %4116 = vadd.xlane.f32.xlu1 %v4102_v40  ;;  %v4118_v39 = vsel %vm4075_vm9, %v4103_v14, 0.0  ;;  %5778 = vmatpush3.bf16.msra.mxu0 %v5777_v34 }
 0xa56   : > { %4119 = vadd.xlane.f32.xlu0 %v4118_v39  ;;  %5780 = vmatprep.subr.bf16.mxu0 %v5779_v12  ;;  %v4059_v39 = vld [vmem:[%s8731_s7 + $0x6] ss:$0 sm:$0xff] }
 0xa59   : > { %5782 = vmatpush3.bf16.msra.mxu0 %v5781_v46 }
 0xa5a   : > { %5784 = vmatprep.subr.bf16.mxu0 %v5783_v21 }
 0xa5d   : > { %5786 = vmatpush3.bf16.msra.mxu0 %v5785_v8 }
 0xa5e   : > { %5788 = vmatprep.subr.bf16.mxu0 %v5787_v0 }
 0xa61   : > { %5790 = vmatpush3.bf16.msra.mxu0 %v5789_v2 }
 0xa62   : > { %5792 = vmatprep.subr.bf16.mxu0 %v5791_v27 }
 0xa65   : > { %5794 = vmatpush3.bf16.msra.mxu0 %v5793_v18 }
 0xa66   : > { %5796 = vmatprep.subr.bf16.mxu0 %v5795_v30 }
 0xa69   : > { %5798 = vmatpush3.bf16.msra.mxu0 %v5797_v47 }
 0xa6a   : > { %5800 = vmatprep.subr.bf16.mxu0 %v5799_v48  ;;  %v4373_v48 = vld [vmem:[%s8728_s4 + $0x170] sm:$0xff] }
 0xaa2   : > { %v4107_v25 = vpop.xlane.xlu0 %4106 }
 0xaa3   : > { %v4122_v61 = vmul.f32 0.0078125, %v4107_v25  ;;  %v4105_v54 = vpop.xlane.xlu1 %4104  ;;  %v4374_v25 = vld [vmem:[%s8728_s4 + $0x178] sm:$0xff] }
 0xaa4   : > { %v4121_v20 = vmul.f32 0.0078125, %v4105_v54  ;;  %v4357_v54 = vld [vmem:[%s8728_s4 + $0xf0] sm:$0xff] }
 0xaa5   : > { %v4130_v22 = vadd.f32 1e-05, %v4122_v61  ;;  %v5803_v61 = vpack.c.bf16 %v4374_v25, %v4373_v48 }
 0xaa6   : > { %v4129_v3 = vadd.f32 1e-05, %v4121_v20  ;;  %v4358_v20 = vld [vmem:[%s8728_s4 + $0xf8] sm:$0xff] }
 0xaa7   : > { %6361 = vrsqrt.f32 %v4130_v22  ;;  %v4109_v9 = vpop.xlane.xlu1 %4108  ;;  %v5805_v22 = vpack.c.bf16 %v4358_v20, %v4357_v54 }
 0xaa8   : > { %6363 = vrsqrt.f32 %v4129_v3  ;;  %v4123_v49 = vmul.f32 0.0078125, %v4109_v9  ;;  %v4937_v3 = vld [vmem:[%s8731_s7 + $0x10] ss:$8 sm:$0x3]  ;;  %v8867_v9 = vld [vmem:[#allocation12_spill] sm:$0xff] }
 0xaaa   : > { %v4131_v15 = vadd.f32 1e-05, %v4123_v49  ;;  %v8868_v49 = vsub.s32 0, %v8867_v9 }
 0xaab   : > { %v4111_v24 = vpop.xlane.xlu0 %4110 }
 0xaac   : > { %6365 = vrsqrt.f32 %v4131_v15  ;;  %v4124_v1 = vmul.f32 0.0078125, %v4111_v24  ;;  %v4207_v15 = vrot.slane %v4937_v3, %v8868_v49  ;;  %v8869_v24 = vsub.s32 1, %v8867_v9  ;;  %v4375_v9 = vld [vmem:[%s8731_s7 + $0x11] ss:$0 sm:$0xff] }
 0xaae   : > { %v4132_v19 = vadd.f32 1e-05, %v4124_v1  ;;  %v4211_v1 = vrot.slane %v4937_v3, %v8869_v24 }
 0xab0   : > { %6367 = vrsqrt.f32 %v4132_v19 }
 0xab1   : > { %v6362_v40 = vpop.eup %6361 }
 0xab2   : > { %v6364_v14 = vpop.eup %6363  ;;  %v4146_v53 = vmul.f32 %v6362_v40, %v8337_v29 }
 0xab3   : > { %v4145_v37 = vmul.f32 %v6364_v14, %v8340_v6 }
 0xab4   : > { %v4154_v52 = vmul.f32 %v4146_v53, %v4059_v39 }
 0xab5   : > { %v4153_v55 = vmul.f32 %v4145_v37, %v4059_v39 }
 0xab6   : > { %v6366_v10 = vpop.eup %6365  ;;  %v8528_v5 = vadd.f32 %v4154_v52, %v4060_v42 }
 0xab7   : > { %v8523_v33 = vadd.f32 %v4153_v55, %v4060_v42  ;;  %v4147_v34 = vmul.f32 %v6366_v10, %v8346_v35 }
 0xab9   : > { %4279 = vmatmul.mubr.f32.vlgmr.msra.gmra.mrb[78].mxu1 %v8523_v33  ;;  %v4155_v6 = vmul.f32 %v4147_v34, %v4059_v39 }
 0xaba   : > { %v6368_v12 = vpop.eup %6367  ;;  %4284 = vmatprep.mubr.f32.mxu1 %v8861_v51 }
 0xabb   : > { %v4148_v29 = vmul.f32 %v6368_v12, %v8351_v7  ;;  %v8533_v59 = vadd.f32 %v4155_v6, %v4060_v42 }
 0xabd   : > { %4285 = vmatmul.mubr.f32.gmra.mrb[80].mxu1 %v8528_v5  ;;  %v4156_v41 = vmul.f32 %v4148_v29, %v4059_v39 }
 0xabe   : > { %4290 = vmatprep.mubr.f32.mxu1 %v8861_v51 }
 0xabf   : > { %v8537_v35 = vadd.f32 %v4156_v41, %v4060_v42 }
 0xac1   : > { %4291 = vmatmul.mubr.f32.gmra.mrb[82].mxu1 %v8533_v59 }
 0xac2   : > { %4296 = vmatprep.mubr.f32.mxu1 %v8861_v51 }
 0xac5   : > { %4297 = vmatmul.mubr.f32.gmra.mrb[84].mxu1 %v8537_v35 }
 0xac6   : > { %4302 = vmatprep.mubr.f32.mxu1 %v8861_v51 }
 0xad8   : > { %v4115_v62 = vpop.xlane.xlu0 %4114 }
 0xad9   : > { %v4126_v46 = vmul.f32 0.0078125, %v4115_v62  ;;  %v4113_v7 = vpop.xlane.xlu1 %4112 }
 0xada   : > { %v4125_v21 = vmul.f32 0.0078125, %v4113_v7 }
 0xadb   : > { %v4134_v63 = vadd.f32 1e-05, %v4126_v46 }
 0xadc   : > { %v4133_v28 = vadd.f32 1e-05, %v4125_v21 }
 0xadd   : > { %6369 = vrsqrt.f32 %v4134_v63 }
 0xade   : > { %6371 = vrsqrt.f32 %v4133_v28 }
 0xae2   : > { %v4117_v32 = vpop.xlane.xlu1 %4116 }
 0xae3   : > { %v4127_v38 = vmul.f32 0.0078125, %v4117_v32  ;;  %v4120_v8 = vpop.xlane.xlu0 %4119 }
 0xae4   : > { %v4128_v0 = vmul.f32 0.0078125, %v4120_v8 }
 0xae5   : > { %v4135_v58 = vadd.f32 1e-05, %v4127_v38 }
 0xae6   : > { %v4136_v23 = vadd.f32 1e-05, %v4128_v0 }
 0xae7   : > { %v6370_v36 = vpop.eup %6369  ;;  %6373 = vrsqrt.f32 %v4135_v58 }
 0xae8   : > { %v6372_v44 = vpop.eup %6371  ;;  %6375 = vrsqrt.f32 %v4136_v23  ;;  %v4150_v27 = vmul.f32 %v6370_v36, %v8417_v17 }
 0xae9   : > { %v4149_v2 = vmul.f32 %v6372_v44, %v8420_v57 }
 0xaea   : > { %v4158_v56 = vmul.f32 %v4150_v27, %v4059_v39 }
 0xaeb   : > { %v4157_v31 = vmul.f32 %v4149_v2, %v4059_v39 }
 0xaec   : > { %v8547_v18 = vadd.f32 %v4158_v56, %v4060_v42 }
 0xaed   : > { %v8543_v11 = vadd.f32 %v4157_v31, %v4060_v42 }
 0xaef   : > { %4303 = vmatmul.mubr.f32.gmra.mrb[86].mxu1 %v8543_v11 }
 0xaf0   : > { %4308 = vmatprep.mubr.f32.mxu1 %v8861_v51 }
 0xaf1   : > { %v6374_v60 = vpop.eup %6373 }
 0xaf2   : > { %v6376_v30 = vpop.eup %6375  ;;  %v4151_v16 = vmul.f32 %v6374_v60, %v8427_v50  ;;  %v4355_v50 = vld [vmem:[%s8728_s4 + $0xe0] sm:$0xff] }
 0xaf3   : > { %4309 = vmatmul.mubr.f32.gmra.mrb[88].mxu1 %v8547_v18  ;;  %v4152_v57 = vmul.f32 %v6376_v30, %v8430_v4  ;;  %v4356_v4 = vld [vmem:[%s8728_s4 + $0xe8] sm:$0xff] }
 0xaf4   : > { %4314 = vmatprep.mubr.f32.mxu1 %v8861_v51  ;;  %v4159_v17 = vmul.f32 %v4151_v16, %v4059_v39  ;;  %v5801_v47 = vpack.c.bf16 %v4356_v4, %v4355_v50 }
 0xaf5   : > { %v4160_v13 = vmul.f32 %v4152_v57, %v4059_v39 }
 0xaf6   : > { %v8553_v26 = vadd.f32 %v4159_v17, %v4060_v42  ;;  %5802 = vmatpush3.bf16.msra.mxu0 %v5801_v47 }
 0xaf7   : > { %v8557_v43 = vadd.f32 %v4160_v13, %v4060_v42  ;;  %5804 = vmatprep.subr.bf16.mxu0 %v5803_v61 }
 0xaf8   : > { %4315 = vmatmul.mubr.f32.gmra.mrb[90].mxu1 %v8553_v26 }
 0xaf9   : > { %4320 = vmatprep.mubr.f32.mxu1 %v8861_v51 }
 0xafa   : > { %5806 = vmatpush3.bf16.msra.mxu0 %v5805_v22 }
 0xafc   : > { %4321 = vmatmul.mubr.f32.gmra.mrb[92].mxu1 %v8557_v43 }
 0xafd   : > { %5544 = vmatprep.mubr.msk.f32.mxu1 %vm6538_vm10, %v8861_v51  ;;  %v8618_v51 = vld [vmem:[%s8731_s7 + $0x12] ss:$0 sm:$0xff] }
 0xb8c   : > { %v4280_v19 = vpop.f32.mrb[78].mxu1 }
 0xb8d   : > { %v4281_v40 = vadd.f32 %v4280_v19, %v4207_v15  ;;  %v4282_v14 = vpop.f32.mrb[79].mxu1 }
 0xb8e   : > { %v4283_v39 = vadd.f32 %v4282_v14, %v4211_v1 }
 0xb8f   : > { %v4327_v42 = vmax.f32 %v4281_v40, 0.0 }
 0xb90   : > { %v4328_v37 = vmax.f32 %v4283_v39, 0.0  ;;  %v4286_v53 = vpop.f32.mrb[80].mxu1 }
 0xb91   : > { %v4287_v55 = vadd.f32 %v4286_v53, %v4207_v15  ;;  %v4288_v10 = vpop.f32.mrb[81].mxu1 }
 0xb92   : > { %v4289_v52 = vadd.f32 %v4288_v10, %v4211_v1  ;;  %4440 = vmatprep.mubr.f32.mxu0 %v4328_v37 }
 0xb93   : > { %4441 = vmatmul.mubr.f32.vlgmr.msra.gmra.mrb[68].mxu0 %v4327_v42  ;;  %v4329_v6 = vmax.f32 %v4287_v55, 0.0 }
 0xb94   : > { %v4330_v34 = vmax.f32 %v4289_v52, 0.0  ;;  %v4292_v12 = vpop.f32.mrb[82].mxu1 }
 0xb95   : > { %v4293_v29 = vadd.f32 %v4292_v12, %v4207_v15  ;;  %v4294_v41 = vpop.f32.mrb[83].mxu1 }
 0xb96   : > { %v4295_v62 = vadd.f32 %v4294_v41, %v4211_v1  ;;  %4445 = vmatprep.mubr.f32.mxu0 %v4330_v34 }
 0xb97   : > { %4446 = vmatmul.mubr.f32.gmra.mrb[70].mxu0 %v4329_v6  ;;  %v4331_v21 = vmax.f32 %v4293_v29, 0.0 }
 0xb98   : > { %v4332_v46 = vmax.f32 %v4295_v62, 0.0  ;;  %v4298_v7 = vpop.f32.mrb[84].mxu1 }
 0xb99   : > { %v4299_v63 = vadd.f32 %v4298_v7, %v4207_v15  ;;  %v4300_v28 = vpop.f32.mrb[85].mxu1 }
 0xb9a   : > { %v4301_v32 = vadd.f32 %v4300_v28, %v4211_v1  ;;  %4450 = vmatprep.mubr.f32.mxu0 %v4332_v46 }
 0xb9b   : > { %4451 = vmatmul.mubr.f32.gmra.mrb[72].mxu0 %v4331_v21  ;;  %v4333_v8 = vmax.f32 %v4299_v63, 0.0 }
 0xb9c   : > { %v4334_v38 = vmax.f32 %v4301_v32, 0.0 }
 0xb9e   : > { %4455 = vmatprep.mubr.f32.mxu0 %v4334_v38 }
 0xb9f   : > { %4456 = vmatmul.mubr.f32.gmra.mrb[74].mxu0 %v4333_v8 }
 0xbc2   : > { %v4304_v0 = vpop.f32.mrb[86].mxu1 }
 0xbc3   : > { %v4305_v58 = vadd.f32 %v4304_v0, %v4207_v15  ;;  %v4306_v23 = vpop.f32.mrb[87].mxu1 }
 0xbc4   : > { %v4307_v36 = vadd.f32 %v4306_v23, %v4211_v1 }
 0xbc5   : > { %v4335_v27 = vmax.f32 %v4305_v58, 0.0 }
 0xbc6   : > { %v4336_v44 = vmax.f32 %v4307_v36, 0.0  ;;  %v4310_v2 = vpop.f32.mrb[88].mxu1 }
 0xbc7   : > { %v4311_v31 = vadd.f32 %v4310_v2, %v4207_v15  ;;  %v4312_v56 = vpop.f32.mrb[89].mxu1 }
 0xbc8   : > { %v4313_v60 = vadd.f32 %v4312_v56, %v4211_v1  ;;  %4460 = vmatprep.mubr.f32.mxu0 %v4336_v44 }
 0xbc9   : > { %4461 = vmatmul.mubr.f32.gmra.mrb[76].mxu0 %v4335_v27  ;;  %v4337_v16 = vmax.f32 %v4311_v31, 0.0 }
 0xbca   : > { %v4338_v30 = vmax.f32 %v4313_v60, 0.0 }
 0xbcb   : > { %v4316_v57 = vpop.f32.mrb[90].mxu1 }
 0xbcc   : > { %v4317_v17 = vadd.f32 %v4316_v57, %v4207_v15  ;;  %v4318_v13 = vpop.f32.mrb[91].mxu1  ;;  %4465 = vmatprep.mubr.f32.mxu0 %v4338_v30 }
 0xbcd   : > { %v4319_v50 = vadd.f32 %v4318_v13, %v4211_v1  ;;  %4466 = vmatmul.mubr.f32.gmra.mrb[78].mxu0 %v4337_v16 }
 0xbce   : > { %v4339_v48 = vmax.f32 %v4317_v17, 0.0 }
 0xbcf   : > { %v4340_v4 = vmax.f32 %v4319_v50, 0.0  ;;  %v4322_v47 = vpop.f32.mrb[92].mxu1 }
 0xbd0   : > { %v4323_v25 = vadd.f32 %v4322_v47, %v4207_v15  ;;  %v4324_v61 = vpop.f32.mrb[93].mxu1 }
 0xbd1   : > { %v4325_v54 = vadd.f32 %v4324_v61, %v4211_v1  ;;  %4470 = vmatprep.mubr.f32.mxu0 %v4340_v4 }
 0xbd2   : > { %4471 = vmatmul.mubr.f32.gmra.mrb[80].mxu0 %v4339_v48  ;;  %v4341_v22 = vmax.f32 %v4323_v25, 0.0 }
 0xbd3   : > { %v4342_v20 = vmax.f32 %v4325_v54, 0.0 }
 0xbd5   : > { %4475 = vmatprep.mubr.f32.mxu0 %v4342_v20 }
 0xbd6   : > { %4476 = vmatmul.mubr.f32.gmra.mrb[82].mxu0 %v4341_v22 }
 0xc66   : > { %v5176_v3 = vpop.f32.mrb[68].mxu0 }
 0xc67   : > { %v5177_v49 = vpop.f32.mrb[69].mxu0 }
 0xc68   : > { %v5178_v24 = vadd.f32 %v5177_v49, %v5176_v3 }
 0xc6a   : > { %v4443_v19 = vadd.f32 %v5178_v24, %v4375_v9  ;;  %v5179_v40 = vpop.f32.mrb[70].mxu0 }
 0xc6b   : > { %v5180_v14 = vpop.f32.mrb[71].mxu0 }
 0xc6c   : > { %v5181_v39 = vadd.f32 %v5180_v14, %v5179_v40  ;;  %v4481_v15 = vadd.f32 %v4443_v19, %v8523_v33 }
 0xc6e   : > { %v4448_v1 = vadd.f32 %v5181_v39, %v4375_v9  ;;  %4491 = vadd.xlane.f32.xlu1 %v4481_v15  ;;  %v5182_v37 = vpop.f32.mrb[72].mxu0 }
 0xc6f   : > { %v5183_v53 = vpop.f32.mrb[73].mxu0 }
 0xc70   : > { %v5184_v42 = vadd.f32 %v5183_v53, %v5182_v37  ;;  %v4482_v55 = vadd.f32 %v4448_v1, %v8528_v5 }
 0xc72   : > { %v4453_v10 = vadd.f32 %v5184_v42, %v4375_v9  ;;  %4493 = vadd.xlane.f32.xlu0 %v4482_v55  ;;  %v5185_v52 = vpop.f32.mrb[74].mxu0 }
 0xc73   : > { %v5186_v34 = vpop.f32.mrb[75].mxu0 }
 0xc74   : > { %v5187_v12 = vadd.f32 %v5186_v34, %v5185_v52  ;;  %v4483_v6 = vadd.f32 %v4453_v10, %v8533_v59 }
 0xc76   : > { %v4458_v29 = vadd.f32 %v5187_v12, %v4375_v9  ;;  %4495 = vadd.xlane.f32.xlu1 %v4483_v6 }
 0xc78   : > { %v4484_v41 = vadd.f32 %v4458_v29, %v8537_v35 }
 0xc7a   : > { %4497 = vadd.xlane.f32.xlu0 %v4484_v41 }
 0xc9c   : > { %v5188_v33 = vpop.f32.mrb[76].mxu0 }
 0xc9d   : > { %v5189_v62 = vpop.f32.mrb[77].mxu0 }
 0xc9e   : > { %v5190_v46 = vadd.f32 %v5189_v62, %v5188_v33 }
 0xca0   : > { %v4463_v7 = vadd.f32 %v5190_v46, %v4375_v9  ;;  %v5191_v21 = vpop.f32.mrb[78].mxu0 }
 0xca1   : > { %v5192_v63 = vpop.f32.mrb[79].mxu0 }
 0xca2   : > { %v5193_v28 = vadd.f32 %v5192_v63, %v5191_v21  ;;  %v4485_v5 = vadd.f32 %v4463_v7, %v8543_v11 }
 0xca4   : > { %v4468_v32 = vadd.f32 %v5193_v28, %v4375_v9  ;;  %4499 = vadd.xlane.f32.xlu1 %v4485_v5 }
 0xca5   : > { %v5194_v38 = vpop.f32.mrb[80].mxu0 }
 0xca6   : > { %v5195_v8 = vpop.f32.mrb[81].mxu0  ;;  %v4486_v59 = vadd.f32 %v4468_v32, %v8547_v18  ;;  %v8624_v32 = vld [vmem:[%s8731_s7 + $0x13] ss:$0 sm:$0xff] }
 0xca7   : > { %v5196_v0 = vadd.f32 %v5195_v8, %v5194_v38 }
 0xca8   : > { %4501 = vadd.xlane.f32.xlu0 %v4486_v59 }
 0xca9   : > { %v4473_v58 = vadd.f32 %v5196_v0, %v4375_v9  ;;  %v5197_v35 = vpop.f32.mrb[82].mxu0 }
 0xcaa   : > { %v5198_v23 = vpop.f32.mrb[83].mxu0 }
 0xcab   : > { %v5199_v36 = vadd.f32 %v5198_v23, %v5197_v35  ;;  %v4487_v44 = vadd.f32 %v4473_v58, %v8553_v26  ;;  %v4938_v58 = vld [vmem:[%s8730_s6 + $0x40] sm:$0xff]  ;;  %v4939_v35 = vld [vmem:[%s8730_s6 + $0x48] sm:$0xff] }
 0xcad   : > { %v4478_v2 = vadd.f32 %v5199_v36, %v4375_v9  ;;  %4503 = vadd.xlane.f32.xlu0 %v4487_v44 }
 0xcaf   : > { %v4488_v27 = vadd.f32 %v4478_v2, %v8557_v43 }
 0xcb1   : > { %v4505_v11 = vsel %vm4075_vm9, %v4488_v27, 0.0 }
 0xcb2   : > { %4506 = vadd.xlane.f32.xlu1 %v4505_v11 }
 0xcfb   : > { %v4492_v31 = vpop.xlane.xlu1 %4491 }
 0xcfc   : > { %v4508_v56 = vmul.f32 0.0078125, %v4492_v31 }
 0xcfe   : > { %v4516_v60 = vsub.f32 %v4481_v15, %v4508_v56 }
 0xcff   : > { %v4494_v30 = vpop.xlane.xlu0 %4493 }
 0xd00   : > { %v4509_v18 = vmul.f32 0.0078125, %v4494_v30  ;;  %v4524_v16 = vmul.f32 %v4516_v60, %v4516_v60 }
 0xd02   : > { %v4517_v57 = vsub.f32 %v4482_v55, %v4509_v18  ;;  %4532 = vadd.xlane.f32.xlu1 %v4524_v16  ;;  %v4940_v18 = vld [vmem:[%s8730_s6 + $0x50] sm:$0xff]  ;;  %v4941_v16 = vld [vmem:[%s8730_s6 + $0x58] sm:$0xff] }
 0xd03   : > { %v4496_v17 = vpop.xlane.xlu1 %4495 }
 0xd04   : > { %v4510_v13 = vmul.f32 0.0078125, %v4496_v17  ;;  %v4525_v50 = vmul.f32 %v4517_v57, %v4517_v57 }
 0xd06   : > { %v4518_v4 = vsub.f32 %v4483_v6, %v4510_v13  ;;  %4534 = vadd.xlane.f32.xlu0 %v4525_v50 }
 0xd07   : > { %v4498_v26 = vpop.xlane.xlu0 %4497 }
 0xd08   : > { %v4511_v47 = vmul.f32 0.0078125, %v4498_v26  ;;  %v4526_v48 = vmul.f32 %v4518_v4, %v4518_v4 }
 0xd0a   : > { %v4519_v43 = vsub.f32 %v4484_v41, %v4511_v47  ;;  %4536 = vadd.xlane.f32.xlu1 %v4526_v48 }
 0xd0c   : > { %v4527_v25 = vmul.f32 %v4519_v43, %v4519_v43 }
 0xd0e   : > { %4538 = vadd.xlane.f32.xlu0 %v4527_v25 }
 0xd31   : > { %v4500_v61 = vpop.xlane.xlu1 %4499 }
 0xd32   : > { %v4512_v54 = vmul.f32 0.0078125, %v4500_v61 }
 0xd34   : > { %v8597_v20 = vsub.f32 %v4485_v5, %v4512_v54 }
 0xd35   : > { %v4502_v22 = vpop.xlane.xlu0 %4501 }
 0xd36   : > { %v4513_v3 = vmul.f32 0.0078125, %v4502_v22  ;;  %v4528_v9 = vmul.f32 %v8597_v20, %v8597_v20 }
 0xd38   : > { %v8601_v49 = vsub.f32 %v4486_v59, %v4513_v3  ;;  %4540 = vadd.xlane.f32.xlu1 %v4528_v9 }
 0xd3a   : > { %v4504_v24 = vpop.xlane.xlu0 %4503  ;;  %v4529_v19 = vmul.f32 %v8601_v49, %v8601_v49 }
 0xd3b   : > { %v4514_v40 = vmul.f32 0.0078125, %v4504_v24 }
 0xd3c   : > { %4542 = vadd.xlane.f32.xlu0 %v4529_v19 }
 0xd3d   : > { %v8605_v14 = vsub.f32 %v4487_v44, %v4514_v40 }
 0xd3f   : > { %v4507_v39 = vpop.xlane.xlu1 %4506  ;;  %v4530_v15 = vmul.f32 %v8605_v14, %v8605_v14 }
 0xd40   : > { %v4515_v1 = vmul.f32 0.0078125, %v4507_v39 }
 0xd41   : > { %4544 = vadd.xlane.f32.xlu1 %v4530_v15 }
 0xd42   : > { %v8609_v37 = vsub.f32 %v4488_v27, %v4515_v1 }
 0xd44   : > { %v4531_v53 = vmul.f32 %v8609_v37, %v8609_v37 }
 0xd46   : > { %v4546_v42 = vsel %vm4075_vm9, %v4531_v53, 0.0 }
 0xd47   : > { %4547 = vadd.xlane.f32.xlu0 %v4546_v42 }
 0xd8f   : > { %v4533_v55 = vpop.xlane.xlu1 %4532 }
 0xd90   : > { %v4549_v10 = vmul.f32 0.0078125, %v4533_v55  ;;  %v4942_v55 = vld [vmem:[%s8730_s6 + $0x60] sm:$0xff] }
 0xd92   : > { %v4557_v52 = vadd.f32 1e-05, %v4549_v10 }
 0xd93   : > { %v4535_v34 = vpop.xlane.xlu0 %4534 }
 0xd94   : > { %6377 = vrsqrt.f32 %v4557_v52  ;;  %v4550_v12 = vmul.f32 0.0078125, %v4535_v34 }
 0xd96   : > { %v4558_v6 = vadd.f32 1e-05, %v4550_v12 }
 0xd97   : > { %v4537_v29 = vpop.xlane.xlu1 %4536 }
 0xd98   : > { %6379 = vrsqrt.f32 %v4558_v6  ;;  %v4551_v41 = vmul.f32 0.0078125, %v4537_v29 }
 0xd9a   : > { %v4559_v33 = vadd.f32 1e-05, %v4551_v41 }
 0xd9b   : > { %v4539_v62 = vpop.xlane.xlu0 %4538 }
 0xd9c   : > { %6381 = vrsqrt.f32 %v4559_v33  ;;  %v4552_v46 = vmul.f32 0.0078125, %v4539_v62 }
 0xd9e   : > { %v6378_v7 = vpop.eup %6377  ;;  %v4560_v21 = vadd.f32 1e-05, %v4552_v46 }
 0xd9f   : > { %v4573_v63 = vmul.f32 %v6378_v7, %v4516_v60  ;;  %v4945_v7 = vld [vmem:[%s8730_s6 + $0x78] sm:$0xf] }
 0xda0   : > { %6383 = vrsqrt.f32 %v4560_v21 }
 0xda1   : > { %v4581_v28 = vmul.f32 %v4573_v63, %v8618_v51 }
 0xda2   : > { %v6380_v5 = vpop.eup %6379 }
 0xda3   : > { %v4574_v38 = vmul.f32 %v6380_v5, %v4517_v57  ;;  %v4589_v59 = vadd.f32 %v4581_v28, %v8624_v32 }
 0xda5   : > { %v4582_v8 = vmul.f32 %v4574_v38, %v8618_v51  ;;  %v4606_v44 = vmul.f32 %v4938_v58, %v4589_v59 }
 0xda6   : > { %v6382_v0 = vpop.eup %6381 }
 0xda7   : > { %v4575_v23 = vmul.f32 %v6382_v0, %v4518_v4  ;;  %v4590_v36 = vadd.f32 %v4582_v8, %v8624_v32 }
 0xda9   : > { %v4607_v2 = vmul.f32 %v4939_v35, %v4590_v36  ;;  %v4583_v27 = vmul.f32 %v4575_v23, %v8618_v51 }
 0xdaa   : > { %v6384_v11 = vpop.eup %6383 }
 0xdab   : > { %v4576_v31 = vmul.f32 %v6384_v11, %v4519_v43  ;;  %v5808_v56 = vpack.c.bf16 %v4607_v2, %v4606_v44  ;;  %v4591_v30 = vadd.f32 %v4583_v27, %v8624_v32 }
 0xdad   : > { %5809 = vmatpush3.bf16.xpose.msra.mxu1 %v5808_v56  ;;  %v4584_v60 = vmul.f32 %v4576_v31, %v8618_v51  ;;  %v4608_v17 = vmul.f32 %v4940_v18, %v4591_v30 }
 0xdae   : > { %5810 = vmatprep.subr.bf16.mxu1 %v8866_v45 }
 0xdaf   : > { %v4592_v57 = vadd.f32 %v4584_v60, %v8624_v32 }
 0xdb1   : > { %v4609_v13 = vmul.f32 %v4941_v16, %v4592_v57 }
 0xdb3   : > { %v5811_v50 = vpack.c.bf16 %v4609_v13, %v4608_v17 }
 0xdb5   : > { %5812 = vmatpush3.bf16.xpose.msra.mxu1 %v5811_v50 }
 0xdb6   : > { %5813 = vmatprep.subr.bf16.mxu1 %v8866_v45 }
 0xdc5   : > { %v4541_v4 = vpop.xlane.xlu1 %4540 }
 0xdc6   : > { %v4553_v26 = vmul.f32 0.0078125, %v4541_v4 }
 0xdc8   : > { %v4561_v47 = vadd.f32 1e-05, %v4553_v26 }
 0xdc9   : > { %v4543_v48 = vpop.xlane.xlu0 %4542 }
 0xdca   : > { %6385 = vrsqrt.f32 %v4561_v47  ;;  %v4554_v43 = vmul.f32 0.0078125, %v4543_v48 }
 0xdcc   : > { %v4562_v25 = vadd.f32 1e-05, %v4554_v43 }
 0xdce   : > { %6387 = vrsqrt.f32 %v4562_v25  ;;  %v4545_v61 = vpop.xlane.xlu1 %4544 }
 0xdcf   : > { %v4555_v54 = vmul.f32 0.0078125, %v4545_v61 }
 0xdd1   : > { %v4563_v22 = vadd.f32 1e-05, %v4555_v54 }
 0xdd3   : > { %6389 = vrsqrt.f32 %v4563_v22 }
 0xdd4   : > { %v6386_v3 = vpop.eup %6385  ;;  %v4548_v9 = vpop.xlane.xlu0 %4547 }
 0xdd5   : > { %v4577_v24 = vmul.f32 %v6386_v3, %v8597_v20  ;;  %v4556_v19 = vmul.f32 0.0078125, %v4548_v9  ;;  %v4943_v20 = vld [vmem:[%s8730_s6 + $0x68] sm:$0xff] }
 0xdd7   : > { %v4564_v40 = vadd.f32 1e-05, %v4556_v19  ;;  %v4585_v39 = vmul.f32 %v4577_v24, %v8618_v51 }
 0xdd8   : > { %v6388_v15 = vpop.eup %6387 }
 0xdd9   : > { %v4578_v1 = vmul.f32 %v6388_v15, %v8601_v49  ;;  %6391 = vrsqrt.f32 %v4564_v40  ;;  %v4593_v42 = vadd.f32 %v4585_v39, %v8624_v32 }
 0xddb   : > { %v4586_v53 = vmul.f32 %v4578_v1, %v8618_v51  ;;  %v4610_v12 = vmul.f32 %v4942_v55, %v4593_v42 }
 0xddd   : > { %v6390_v10 = vpop.eup %6389  ;;  %v4594_v52 = vadd.f32 %v4586_v53, %v8624_v32 }
 0xdde   : > { %v4579_v34 = vmul.f32 %v6390_v10, %v8605_v14  ;;  %v4944_v14 = vld [vmem:[%s8730_s6 + $0x70] sm:$0xff] }
 0xddf   : > { %v4611_v49 = vmul.f32 %v4943_v20, %v4594_v52 }
 0xde0   : > { %v4587_v29 = vmul.f32 %v4579_v34, %v8618_v51 }
 0xde1   : > { %v5814_v6 = vpack.c.bf16 %v4611_v49, %v4610_v12 }
 0xde2   : > { %v4595_v46 = vadd.f32 %v4587_v29, %v8624_v32 }
 0xde3   : > { %v6392_v41 = vpop.eup %6391  ;;  %5815 = vmatpush3.bf16.xpose.msra.mxu1 %v5814_v6 }
 0xde4   : > { %v4580_v33 = vmul.f32 %v6392_v41, %v8609_v37  ;;  %5816 = vmatprep.subr.bf16.mxu1 %v8866_v45  ;;  %v4612_v63 = vmul.f32 %v4944_v14, %v4595_v46  ;;  %v6539_v45 = vmov 1.0  }
 0xde6   : > { %v4588_v62 = vmul.f32 %v4580_v33, %v8618_v51  ;;  %v4686_v51 = vld [vmem:[%s8731_s7 + $0x14] ss:$0 sm:$0xff] }
 0xde8   : > { %v4596_v21 = vadd.f32 %v4588_v62, %v8624_v32 }
 0xdea   : > { %v4613_v28 = vmul.f32 %v4945_v7, %v4596_v21 }
 0xdec   : > { %v5817_v37 = vpack.c.bf16 %v4613_v28, %v4612_v63 }
 0xdee   : > { %5818 = vmatpush3.bf16.xpose.msra.mxu1 %v5817_v37 }
 0xdf5   : > { %5545 = vmatmul.mubr.f32.vlgmr.msra.gmra.mrb[94].mxu1 %v6539_v45 }
 0xec8   : > { %v4680_v5 = vpop.f32.mrb[94].mxu1 }
 0xec9   : > { %v4685_v38 = vsel %vm4684_vm11, %v4680_v5, 0.0  ;;  %v5546_v8 = vpop.f32.mrb[95].mxu1 }
 0xeca   : > { %v4687_v32 = vadd.f32 %v4686_v51, %v4685_v38 }
 0xecc   : > { %4688 = vst [vmem:[%s337_s14] sm:$0x1] %v4687_v32 }
 0xecd   : > { %6464 = shalt.err (!%p6461_p7)
}
 0xece   : > { %s6465_s10 = scalar_lea.hbm %s8680_s16, 16  ;;  %s6469_s11 = scalar_lea.hbm %s8732_s8, 32 }
 0xecf   : > { %p6466_p9 = scmp.ne.s32.totalorder %s8680_s16, %s6465_s10  ;;  %p6470_p5 = scmp.lt.u32.totalorder %s8680_s16, %s8732_s8 }
 0xed0   : > { %p6471_p11 = scmp.lt.u32.totalorder %s6469_s11, %s6465_s10  ;;  %p6473_p4 = scmp.lt.u32.totalorder %s6465_s10, %s8680_s16 }
 0xed1   : > { %p6467_p2 = pnand %p6466_p9, %p6677_p12 }
 0xed2   : > { %p6472_p1 = por %p6471_p11, %p6470_p5 }
 0xed3   : > { %p6468_p0 = pneg %p6467_p2 }
 0xed4   : > { %p6474_p6 = por %p6473_p4, %p6472_p1 }
 0xed6   : > { %p6475_p8 = pnand %p6474_p6, %p6468_p0 }
 0xed8   : > { %6478 = shalt.err (!%p6475_p8)
}
 0xed9   : > { %5825 = dma.vmem_to_hbm [thread:$0]  (%p6677_p12), %s8682_s17, 16, %s8680_s16, %s4690_s15  }
 0xeda PF: > { %s4714_s26 = sand.u32 1, %s6509_s27   ;;  %p8870_p10 = scmp.ne.s32.totalorder %s8785_s12, 0 }
 0xedb   : > { %p8871_p13 = scmp.ge.s32.totalorder %s6521_s30, 2  ;;  %s4715_s13 = scalar_lea.sflag [#allocation4], %s4714_s26 }
 0xedd   : > { %p5836_p3 = pnand %p8871_p13, %p8870_p10 }
 0xedf   : > { %6504 = dma.done.wait (!%p5836_p3), %s4715_s13, 16  }
 0xee0   : > { %6506 = vsyncadd (!%p5836_p3), %s4715_s13, 4294967280  ;;  %s8872_s30 = sld [smem:[#allocation11_spill]]  ;;  %s8873_s27 = smov %s6513_s28 }
 0xee1   : > { %s8874_s28 = smov %s6517_s29  ;;  %s8875_s29 = smov %s6673_s23 }
 0xee6   : > { %p22_p7 = scmp.ge.s32.totalorder %s8872_s30, 4  }
 0xee8   :  { %24 = sbr.rel (!%p22_p7) target bundleno = 6 (0x6), region = 104 }
 0xeef   :  { %4719 = vsyncpa [#allocation3], 1 }
 0xef0   :  { %4721 = vsyncpa [#allocation3 + $0x1], 1 }
 0xef1   :  { %4722 = vsyncpa [#allocation6], 1 }
 0xef2   :  { %4723 = vsyncpa [#allocation4], 1 }
 0xef3   :  { %4725 = vsyncpa [#allocation4 + $0x1], 1 }

</bundles_post_ra>
